<compile_context>
chip_gen: v7x
topology: tpu7x:2x2x1
jax: 0.10.0
libtpu: 0.0.40
codegen_flags: <defaults>
</compile_context>

<pallas_src>
import numpy as np

import jax
import jax.numpy as jnp
from jax.experimental import pallas as pl
from jax.experimental.pallas import tpu as pltpu


MARGIN = 32  # lane margin around each padded activation buffer (>= Wp + 1)


# ----------------------------- Pallas kernels ------------------------------ #

def _conv3x3(ext_ref, w_ref, b_ref, mask_ref, Wp, HpWp):
    """3x3 same-conv on a padded flat (Cin, Hp*Wp) activation held in `ext_ref`.

    ext_ref : (Cin, 2*MARGIN + HpWp) bf16; real (zero-ring-padded) data lives at
              [:, MARGIN:MARGIN+HpWp].  Margin lanes may hold garbage: they only
              ever feed ring outputs, which are masked out with jnp.where below.
    w_ref   : (9, Cout, Cin) bf16 tap matrices, tap t -> (kh, kw) = (t//3-1, t%3-1).
    b_ref   : (Cout, 1) f32 bias.
    mask_ref: (1, HpWp) f32, 1.0 at valid interior positions, 0.0 on the ring.
    Returns (Cout, HpWp) f32 = tanh(conv + b), exactly 0 on the padding ring.
    """
    cout = w_ref.shape[1]
    acc = jnp.zeros((cout, HpWp), jnp.float32)
    for t in range(9):
        kh, kw = t // 3 - 1, t % 3 - 1
        off = MARGIN + kh * Wp + kw
        src = ext_ref[:, off:off + HpWp]                       # (Cin, HpWp) bf16
        acc = acc + jnp.dot(w_ref[t], src, preferred_element_type=jnp.float32)
    act = jnp.tanh(acc + b_ref[...])
    return jnp.where(mask_ref[...] > 0.5, act, 0.0)


def _conv_stack_kernel(x_ref, w1_ref, b1_ref, w2_ref, b2_ref, w3_ref, b3_ref,
                       p1_ref, p2_ref, m28_ref, m14_ref, o_ref,
                       ext1, ext2, ext3):
    M = MARGIN
    # conv1 (3->16, Cin zero-padded to 8) + tanh, 28x28 (padded 30x30 -> 900 lanes)
    ext1[:, M:M + 900] = x_ref[0]
    a1 = _conv3x3(ext1, w1_ref, b1_ref, m28_ref, Wp=30, HpWp=900)      # (16, 900)

    # conv2 (16->32) + tanh, then 2x2 avg-pool folded into a bf16 matmul
    ext2[:, M:M + 900] = a1.astype(jnp.bfloat16)
    a2 = _conv3x3(ext2, w2_ref, b2_ref, m28_ref, Wp=30, HpWp=900)      # (32, 900)
    pooled2 = jnp.dot(a2.astype(jnp.bfloat16), p1_ref[...],
                      preferred_element_type=jnp.float32)              # (32, 256)

    # conv3 (32->64) + tanh, 14x14 (padded 16x16 -> 256 lanes), then avg-pool -> 7x7
    ext3[:, M:M + 256] = pooled2.astype(jnp.bfloat16)
    a3 = _conv3x3(ext3, w3_ref, b3_ref, m14_ref, Wp=16, HpWp=256)      # (64, 256)
    pooled3 = jnp.dot(a3.astype(jnp.bfloat16), p2_ref[...],
                      preferred_element_type=jnp.float32)              # (64, 49)

    o_ref[0] = pooled3.astype(o_ref.dtype)


def _fc_fused_kernel(x_ref, w1_ref, b1_ref, w2_ref, b2_ref, o_ref):
    h = jnp.dot(x_ref[...], w1_ref[...], preferred_element_type=jnp.float32)
    h = jnp.tanh(h + b1_ref[...])
    out = jnp.dot(h.astype(jnp.bfloat16), w2_ref[...],
                  preferred_element_type=jnp.float32)
    o_ref[...] = out + b2_ref[...]


# ------------------------------ Pallas wrappers ----------------------------- #

def conv_stack(x_pad, w1t, b1, w2t, b2, w3t, b3, p1, p2, m28, m14):
    B = x_pad.shape[0]
    return pl.pallas_call(
        _conv_stack_kernel,
        out_shape=jax.ShapeDtypeStruct((B, 64, 49), jnp.bfloat16),
        grid=(B,),
        in_specs=[
            pl.BlockSpec((1, 8, 900), lambda b: (b, 0, 0)),    # padded input image
            pl.BlockSpec((9, 16, 8), lambda b: (0, 0, 0)),     # conv1 taps
            pl.BlockSpec((16, 1), lambda b: (0, 0)),
            pl.BlockSpec((9, 32, 16), lambda b: (0, 0, 0)),    # conv2 taps
            pl.BlockSpec((32, 1), lambda b: (0, 0)),
            pl.BlockSpec((9, 64, 32), lambda b: (0, 0, 0)),    # conv3 taps
            pl.BlockSpec((64, 1), lambda b: (0, 0)),
            pl.BlockSpec((900, 256), lambda b: (0, 0)),        # pool1 matrix
            pl.BlockSpec((256, 49), lambda b: (0, 0)),         # pool2 matrix
            pl.BlockSpec((1, 900), lambda b: (0, 0)),          # valid mask 28x28
            pl.BlockSpec((1, 256), lambda b: (0, 0)),          # valid mask 14x14
        ],
        out_specs=pl.BlockSpec((1, 64, 49), lambda b: (b, 0, 0)),
        scratch_shapes=[
            pltpu.VMEM((8, 2 * MARGIN + 900), jnp.bfloat16),   # padded input
            pltpu.VMEM((16, 2 * MARGIN + 900), jnp.bfloat16),  # conv1 activation
            pltpu.VMEM((32, 2 * MARGIN + 256), jnp.bfloat16),  # pooled conv2 act
        ],
        compiler_params=pltpu.CompilerParams(dimension_semantics=("parallel",)),
    )(x_pad, w1t, b1, w2t, b2, w3t, b3, p1, p2, m28, m14)


def fc_fused(feat, w1, b1, w2, b2):
    B, K = feat.shape
    N1, N2 = w1.shape[1], w2.shape[1]
    return pl.pallas_call(
        _fc_fused_kernel,
        out_shape=jax.ShapeDtypeStruct((B, N2), jnp.float32),
        in_specs=[
            pl.BlockSpec((B, K), lambda: (0, 0)),
            pl.BlockSpec((K, N1), lambda: (0, 0)),
            pl.BlockSpec((1, N1), lambda: (0, 0)),
            pl.BlockSpec((N1, N2), lambda: (0, 0)),
            pl.BlockSpec((1, N2), lambda: (0, 0)),
        ],
        out_specs=pl.BlockSpec((B, N2), lambda: (0, 0)),
    )(feat, w1, b1, w2, b2)


# ----------------------- constant matrices / weight prep -------------------- #

def _pool1_matrix():
    """AvgPool2d(2,2): padded 30x30 flat (valid 28x28) -> padded 16x16 flat (valid 14x14).

    The output padding ring columns are all-zero, so the pooled result is already
    correctly zero-padded for conv3.
    """
    P = np.zeros((900, 256), np.float32)
    for ho in range(14):
        for wo in range(14):
            q_out = (ho + 1) * 16 + (wo + 1)
            for dh in range(2):
                for dw in range(2):
                    q_in = (2 * ho + dh + 1) * 30 + (2 * wo + dw + 1)
                    P[q_in, q_out] = 0.25
    return P


def _pool2_matrix():
    """AvgPool2d(2,2): padded 16x16 flat (valid 14x14) -> unpadded 7x7 flat (ho*7+wo)."""
    P = np.zeros((256, 49), np.float32)
    for ho in range(7):
        for wo in range(7):
            for dh in range(2):
                for dw in range(2):
                    q_in = (2 * ho + dh + 1) * 16 + (2 * wo + dw + 1)
                    P[q_in, ho * 7 + wo] = 0.25
    return P


def _valid_mask(H, W):
    Hp, Wp = H + 2, W + 2
    m = np.zeros((Hp, Wp), np.float32)
    m[1:H + 1, 1:W + 1] = 1.0
    return m.reshape(1, Hp * Wp)


def _conv_w_to_taps(w_oihw):
    """(Cout, Cin, 3, 3) -> (9, Cout, Cin) bf16, tap t = (kh, kw) = (t//3, t%3)."""
    cout, cin = w_oihw.shape[0], w_oihw.shape[1]
    return jnp.transpose(w_oihw, (2, 3, 0, 1)).reshape(9, cout, cin).astype(jnp.bfloat16)


def init_params(key):
    """Deterministic init with PyTorch-default-like uniform bounds."""
    def uni(k, shape, fan_in):
        b = 1.0 / np.sqrt(fan_in)
        return jax.random.uniform(k, shape, jnp.float32, -b, b)

    ks = jax.random.split(key, 10)
    return {
        "w1": uni(ks[0], (16, 3, 3, 3), 3 * 9),   "b1": uni(ks[1], (16,), 3 * 9),
        "w2": uni(ks[2], (32, 16, 3, 3), 16 * 9), "b2": uni(ks[3], (32,), 16 * 9),
        "w3": uni(ks[4], (64, 32, 3, 3), 32 * 9), "b3": uni(ks[5], (64,), 32 * 9),
        "wf1": uni(ks[6], (7 * 7 * 64, 128), 7 * 7 * 64),
        "bf1": uni(ks[7], (128,), 7 * 7 * 64),
        "wf2": uni(ks[8], (128, 8), 128),
        "bf2": uni(ks[9], (8,), 128),
    }


# --------------------------------- forward ---------------------------------- #

def pallas_forward(x_nchw, params):
    B = x_nchw.shape[0]

    # Zero-pad spatially to 30x30, pad Cin 3->8 (zeros), flatten spatial -> (B, 8, 900).
    x_pad = jnp.pad(x_nchw, ((0, 0), (0, 5), (1, 1), (1, 1)))
    x_pad = x_pad.reshape(B, 8, 30 * 30).astype(jnp.bfloat16)

    w1p = jnp.pad(params["w1"], ((0, 0), (0, 5), (0, 0), (0, 0)))   # Cin 3 -> 8
    w1t = _conv_w_to_taps(w1p);            b1 = params["b1"].reshape(16, 1).astype(jnp.float32)
    w2t = _conv_w_to_taps(params["w2"]);   b2 = params["b2"].reshape(32, 1).astype(jnp.float32)
    w3t = _conv_w_to_taps(params["w3"]);   b3 = params["b3"].reshape(64, 1).astype(jnp.float32)

    p1 = jnp.asarray(_pool1_matrix(), jnp.bfloat16)
    p2 = jnp.asarray(_pool2_matrix(), jnp.bfloat16)
    m28 = jnp.asarray(_valid_mask(28, 28), jnp.float32)
    m14 = jnp.asarray(_valid_mask(14, 14), jnp.float32)

    # Fused conv stack: (B, 64, 49) bf16, channel-major (== NCHW flatten order).
    feat = conv_stack(x_pad, w1t, b1, w2t, b2, w3t, b3, p1, p2, m28, m14)
    feat = feat.reshape(B, 64 * 49)        # matches x.view(B, -1) on NCHW exactly

    wf1 = params["wf1"].astype(jnp.bfloat16)
    bf1 = params["bf1"].reshape(1, 128).astype(jnp.float32)
    wf2 = params["wf2"].astype(jnp.bfloat16)
    bf2 = params["bf2"].reshape(1, 8).astype(jnp.float32)
    return fc_fused(feat, wf1, bf1, wf2, bf2)


# ------------------------------ plain-JAX reference ------------------------- #

def reference_forward(x_nchw, params):
    def conv(x, w, b):
        y = jax.lax.conv_general_dilated(
            x, w, window_strides=(1, 1), padding=((1, 1), (1, 1)),
            dimension_numbers=("NCHW", "OIHW", "NCHW"))
        return y + b[None, :, None, None]

    def pool(x):
        B, C, H, W = x.shape
        return x.reshape(B, C, H // 2, 2, W // 2, 2).mean(axis=(3, 5))

    a = jnp.tanh(conv(x_nchw, params["w1"], params["b1"]))
    a = jnp.tanh(conv(a, params["w2"], params["b2"]))
    a = pool(a)
    a = jnp.tanh(conv(a, params["w3"], params["b3"]))
    a = pool(a)
    a = a.reshape(a.shape[0], -1)
    a = jnp.tanh(a @ params["wf1"] + params["bf1"])
    return a @ params["wf2"] + params["bf2"]


# ----------------------------------- main ----------------------------------- #

if __name__ == "__main__":
    key = jax.random.PRNGKey(0)
    pkey, xkey = jax.random.split(key)
    params = init_params(pkey)

    # Classifier hard-codes 7*7*64 features, so spatial must be 28x28 (NCHW).
    x = jax.random.normal(xkey, (2, 3, 28, 28), jnp.float32)

    out = jax.jit(pallas_forward)(x, params)
    out = jax.block_until_ready(out)
    assert out.shape == (2, 8) and out.dtype == jnp.float32

    ref = reference_forward(x, params)
    if not np.allclose(np.asarray(out), np.asarray(ref), atol=5e-2, rtol=5e-2):
        raise AssertionError("Pallas output does not match JAX reference")

    print("KERNEL_OK")
</pallas_src>

<mosaic_0001>
module attributes {stable_mosaic.version = 11 : i64} {
  func.func @_conv_stack_kernel(%arg0: i32, %arg1: memref<1x8x900xbf16, #tpu.memory_space<vmem>>, %arg2: memref<9x16x8xbf16, #tpu.memory_space<vmem>>, %arg3: memref<16x1xf32, #tpu.memory_space<vmem>>, %arg4: memref<9x32x16xbf16, #tpu.memory_space<vmem>>, %arg5: memref<32x1xf32, #tpu.memory_space<vmem>>, %arg6: memref<9x64x32xbf16, #tpu.memory_space<vmem>>, %arg7: memref<64x1xf32, #tpu.memory_space<vmem>>, %arg8: memref<900x256xbf16, #tpu.memory_space<vmem>>, %arg9: memref<256x49xbf16, #tpu.memory_space<vmem>>, %arg10: memref<1x900xf32, #tpu.memory_space<vmem>>, %arg11: memref<1x256xf32, #tpu.memory_space<vmem>>, %arg12: memref<1x64x49xbf16, #tpu.memory_space<vmem>>, %arg13: memref<8x964xbf16, #tpu.memory_space<vmem>>, %arg14: memref<16x964xbf16, #tpu.memory_space<vmem>>, %arg15: memref<32x320xbf16, #tpu.memory_space<vmem>>) attributes {dimension_semantics = [#tpu.dimension_semantics<parallel>], iteration_bounds = array<i64: 2>, scalar_prefetch = 0 : i64, scratch_operands = 3 : i64, tpu.core_type = #tpu.core_type<tc>, window_params = [{transform_indices = @transform_0, window_bounds = array<i64: 1, 8, 900>}, {pipeline_mode = #tpu.pipeline_mode<synchronous>, transform_indices = @transform_1, window_bounds = array<i64: 9, 16, 8>}, {pipeline_mode = #tpu.pipeline_mode<synchronous>, transform_indices = @transform_2, window_bounds = array<i64: 16, 1>}, {pipeline_mode = #tpu.pipeline_mode<synchronous>, transform_indices = @transform_3, window_bounds = array<i64: 9, 32, 16>}, {pipeline_mode = #tpu.pipeline_mode<synchronous>, transform_indices = @transform_4, window_bounds = array<i64: 32, 1>}, {pipeline_mode = #tpu.pipeline_mode<synchronous>, transform_indices = @transform_5, window_bounds = array<i64: 9, 64, 32>}, {pipeline_mode = #tpu.pipeline_mode<synchronous>, transform_indices = @transform_6, window_bounds = array<i64: 64, 1>}, {pipeline_mode = #tpu.pipeline_mode<synchronous>, transform_indices = @transform_7, window_bounds = array<i64: 900, 256>}, {pipeline_mode = #tpu.pipeline_mode<synchronous>, transform_indices = @transform_8, window_bounds = array<i64: 256, 49>}, {pipeline_mode = #tpu.pipeline_mode<synchronous>, transform_indices = @transform_9, window_bounds = array<i64: 1, 900>}, {pipeline_mode = #tpu.pipeline_mode<synchronous>, transform_indices = @transform_10, window_bounds = array<i64: 1, 256>}, {transform_indices = @transform_11, window_bounds = array<i64: 1, 64, 49>}]} {
    %c0 = arith.constant 0 : index
    %c0_0 = arith.constant 0 : index
    %c0_1 = arith.constant 0 : index
    %0 = vector.load %arg1[%c0, %c0_0, %c0_1] : memref<1x8x900xbf16, #tpu.memory_space<vmem>>, vector<1x8x900xbf16>
    %1 = vector.shape_cast %0 : vector<1x8x900xbf16> to vector<8x900xbf16>
    %c0_2 = arith.constant 0 : index
    %c32 = arith.constant 32 : index
    %2 = vector.load %arg13[%c0_2, %c32] : memref<8x964xbf16, #tpu.memory_space<vmem>>, vector<8x900xbf16>
    tpu.vector_store %arg13[%c0_2, %c32], %1 {strides = array<i32>} : memref<8x964xbf16, #tpu.memory_space<vmem>>, vector<8x900xbf16>,
    %cst = arith.constant 0.000000e+00 : f32
    %3 = vector.broadcast %cst : f32 to vector<16x900xf32>
    %c0_3 = arith.constant 0 : index
    %c1 = arith.constant 1 : index
    %4 = vector.load %arg13[%c0_3, %c1] : memref<8x964xbf16, #tpu.memory_space<vmem>>, vector<8x900xbf16>
    %c0_4 = arith.constant 0 : index
    %c0_5 = arith.constant 0 : index
    %c0_6 = arith.constant 0 : index
    %5 = vector.load %arg2[%c0_4, %c0_5, %c0_6] : memref<9x16x8xbf16, #tpu.memory_space<vmem>>, vector<1x16x8xbf16>
    %6 = vector.shape_cast %5 : vector<1x16x8xbf16> to vector<16x8xbf16>
    %cst_7 = arith.constant dense<0.000000e+00> : vector<16x900xf32>
    %7 = tpu.matmul %6, %4, %cst_7 {dimension_numbers = #tpu.dot_dimension_numbers<[1], [0], [0], [1], [0, 0, 1, 1], [], []>} : vector<16x8xbf16>, vector<8x900xbf16>, vector<16x900xf32> -> vector<16x900xf32>
    %8 = arith.addf %3, %7 : vector<16x900xf32>
    %c0_8 = arith.constant 0 : index
    %c2 = arith.constant 2 : index
    %9 = vector.load %arg13[%c0_8, %c2] : memref<8x964xbf16, #tpu.memory_space<vmem>>, vector<8x900xbf16>
    %c1_9 = arith.constant 1 : index
    %c0_10 = arith.constant 0 : index
    %c0_11 = arith.constant 0 : index
    %10 = vector.load %arg2[%c1_9, %c0_10, %c0_11] : memref<9x16x8xbf16, #tpu.memory_space<vmem>>, vector<1x16x8xbf16>
    %11 = vector.shape_cast %10 : vector<1x16x8xbf16> to vector<16x8xbf16>
    %cst_12 = arith.constant dense<0.000000e+00> : vector<16x900xf32>
    %12 = tpu.matmul %11, %9, %cst_12 {dimension_numbers = #tpu.dot_dimension_numbers<[1], [0], [0], [1], [0, 0, 1, 1], [], []>} : vector<16x8xbf16>, vector<8x900xbf16>, vector<16x900xf32> -> vector<16x900xf32>
    %13 = arith.addf %8, %12 : vector<16x900xf32>
    %c0_13 = arith.constant 0 : index
    %c3 = arith.constant 3 : index
    %14 = vector.load %arg13[%c0_13, %c3] : memref<8x964xbf16, #tpu.memory_space<vmem>>, vector<8x900xbf16>
    %c2_14 = arith.constant 2 : index
    %c0_15 = arith.constant 0 : index
    %c0_16 = arith.constant 0 : index
    %15 = vector.load %arg2[%c2_14, %c0_15, %c0_16] : memref<9x16x8xbf16, #tpu.memory_space<vmem>>, vector<1x16x8xbf16>
    %16 = vector.shape_cast %15 : vector<1x16x8xbf16> to vector<16x8xbf16>
    %cst_17 = arith.constant dense<0.000000e+00> : vector<16x900xf32>
    %17 = tpu.matmul %16, %14, %cst_17 {dimension_numbers = #tpu.dot_dimension_numbers<[1], [0], [0], [1], [0, 0, 1, 1], [], []>} : vector<16x8xbf16>, vector<8x900xbf16>, vector<16x900xf32> -> vector<16x900xf32>
    %18 = arith.addf %13, %17 : vector<16x900xf32>
    %c0_18 = arith.constant 0 : index
    %c31 = arith.constant 31 : index
    %19 = vector.load %arg13[%c0_18, %c31] : memref<8x964xbf16, #tpu.memory_space<vmem>>, vector<8x900xbf16>
    %c3_19 = arith.constant 3 : index
    %c0_20 = arith.constant 0 : index
    %c0_21 = arith.constant 0 : index
    %20 = vector.load %arg2[%c3_19, %c0_20, %c0_21] : memref<9x16x8xbf16, #tpu.memory_space<vmem>>, vector<1x16x8xbf16>
    %21 = vector.shape_cast %20 : vector<1x16x8xbf16> to vector<16x8xbf16>
    %cst_22 = arith.constant dense<0.000000e+00> : vector<16x900xf32>
    %22 = tpu.matmul %21, %19, %cst_22 {dimension_numbers = #tpu.dot_dimension_numbers<[1], [0], [0], [1], [0, 0, 1, 1], [], []>} : vector<16x8xbf16>, vector<8x900xbf16>, vector<16x900xf32> -> vector<16x900xf32>
    %23 = arith.addf %18, %22 : vector<16x900xf32>
    %c0_23 = arith.constant 0 : index
    %c32_24 = arith.constant 32 : index
    %24 = vector.load %arg13[%c0_23, %c32_24] : memref<8x964xbf16, #tpu.memory_space<vmem>>, vector<8x900xbf16>
    %c4 = arith.constant 4 : index
    %c0_25 = arith.constant 0 : index
    %c0_26 = arith.constant 0 : index
    %25 = vector.load %arg2[%c4, %c0_25, %c0_26] : memref<9x16x8xbf16, #tpu.memory_space<vmem>>, vector<1x16x8xbf16>
    %26 = vector.shape_cast %25 : vector<1x16x8xbf16> to vector<16x8xbf16>
    %cst_27 = arith.constant dense<0.000000e+00> : vector<16x900xf32>
    %27 = tpu.matmul %26, %24, %cst_27 {dimension_numbers = #tpu.dot_dimension_numbers<[1], [0], [0], [1], [0, 0, 1, 1], [], []>} : vector<16x8xbf16>, vector<8x900xbf16>, vector<16x900xf32> -> vector<16x900xf32>
    %28 = arith.addf %23, %27 : vector<16x900xf32>
    %c0_28 = arith.constant 0 : index
    %c33 = arith.constant 33 : index
    %29 = vector.load %arg13[%c0_28, %c33] : memref<8x964xbf16, #tpu.memory_space<vmem>>, vector<8x900xbf16>
    %c5 = arith.constant 5 : index
    %c0_29 = arith.constant 0 : index
    %c0_30 = arith.constant 0 : index
    %30 = vector.load %arg2[%c5, %c0_29, %c0_30] : memref<9x16x8xbf16, #tpu.memory_space<vmem>>, vector<1x16x8xbf16>
    %31 = vector.shape_cast %30 : vector<1x16x8xbf16> to vector<16x8xbf16>
    %cst_31 = arith.constant dense<0.000000e+00> : vector<16x900xf32>
    %32 = tpu.matmul %31, %29, %cst_31 {dimension_numbers = #tpu.dot_dimension_numbers<[1], [0], [0], [1], [0, 0, 1, 1], [], []>} : vector<16x8xbf16>, vector<8x900xbf16>, vector<16x900xf32> -> vector<16x900xf32>
    %33 = arith.addf %28, %32 : vector<16x900xf32>
    %c0_32 = arith.constant 0 : index
    %c61 = arith.constant 61 : index
    %34 = vector.load %arg13[%c0_32, %c61] : memref<8x964xbf16, #tpu.memory_space<vmem>>, vector<8x900xbf16>
    %c6 = arith.constant 6 : index
    %c0_33 = arith.constant 0 : index
    %c0_34 = arith.constant 0 : index
    %35 = vector.load %arg2[%c6, %c0_33, %c0_34] : memref<9x16x8xbf16, #tpu.memory_space<vmem>>, vector<1x16x8xbf16>
    %36 = vector.shape_cast %35 : vector<1x16x8xbf16> to vector<16x8xbf16>
    %cst_35 = arith.constant dense<0.000000e+00> : vector<16x900xf32>
    %37 = tpu.matmul %36, %34, %cst_35 {dimension_numbers = #tpu.dot_dimension_numbers<[1], [0], [0], [1], [0, 0, 1, 1], [], []>} : vector<16x8xbf16>, vector<8x900xbf16>, vector<16x900xf32> -> vector<16x900xf32>
    %38 = arith.addf %33, %37 : vector<16x900xf32>
    %c0_36 = arith.constant 0 : index
    %c62 = arith.constant 62 : index
    %39 = vector.load %arg13[%c0_36, %c62] : memref<8x964xbf16, #tpu.memory_space<vmem>>, vector<8x900xbf16>
    %c7 = arith.constant 7 : index
    %c0_37 = arith.constant 0 : index
    %c0_38 = arith.constant 0 : index
    %40 = vector.load %arg2[%c7, %c0_37, %c0_38] : memref<9x16x8xbf16, #tpu.memory_space<vmem>>, vector<1x16x8xbf16>
    %41 = vector.shape_cast %40 : vector<1x16x8xbf16> to vector<16x8xbf16>
    %cst_39 = arith.constant dense<0.000000e+00> : vector<16x900xf32>
    %42 = tpu.matmul %41, %39, %cst_39 {dimension_numbers = #tpu.dot_dimension_numbers<[1], [0], [0], [1], [0, 0, 1, 1], [], []>} : vector<16x8xbf16>, vector<8x900xbf16>, vector<16x900xf32> -> vector<16x900xf32>
    %43 = arith.addf %38, %42 : vector<16x900xf32>
    %c0_40 = arith.constant 0 : index
    %c63 = arith.constant 63 : index
    %44 = vector.load %arg13[%c0_40, %c63] : memref<8x964xbf16, #tpu.memory_space<vmem>>, vector<8x900xbf16>
    %c8 = arith.constant 8 : index
    %c0_41 = arith.constant 0 : index
    %c0_42 = arith.constant 0 : index
    %45 = vector.load %arg2[%c8, %c0_41, %c0_42] : memref<9x16x8xbf16, #tpu.memory_space<vmem>>, vector<1x16x8xbf16>
    %46 = vector.shape_cast %45 : vector<1x16x8xbf16> to vector<16x8xbf16>
    %cst_43 = arith.constant dense<0.000000e+00> : vector<16x900xf32>
    %47 = tpu.matmul %46, %44, %cst_43 {dimension_numbers = #tpu.dot_dimension_numbers<[1], [0], [0], [1], [0, 0, 1, 1], [], []>} : vector<16x8xbf16>, vector<8x900xbf16>, vector<16x900xf32> -> vector<16x900xf32>
    %48 = arith.addf %43, %47 : vector<16x900xf32>
    %c0_44 = arith.constant 0 : index
    %c0_45 = arith.constant 0 : index
    %49 = vector.load %arg3[%c0_44, %c0_45] : memref<16x1xf32, #tpu.memory_space<vmem>>, vector<16x1xf32>
    %50 = vector.broadcast %49 : vector<16x1xf32> to vector<16x900xf32>
    %51 = arith.addf %48, %50 : vector<16x900xf32>
    %52 = math.tanh %51 : vector<16x900xf32>
    %c0_46 = arith.constant 0 : index
    %c0_47 = arith.constant 0 : index
    %53 = vector.load %arg10[%c0_46, %c0_47] : memref<1x900xf32, #tpu.memory_space<vmem>>, vector<1x900xf32>
    %cst_48 = arith.constant 5.000000e-01 : f32
    %54 = vector.broadcast %cst_48 : f32 to vector<1x900xf32>
    %55 = arith.cmpf ogt, %53, %54 : vector<1x900xf32>
    %cst_49 = arith.constant 0.000000e+00 : f32
    %56 = vector.shape_cast %55 : vector<1x900xi1> to vector<1x900xi1>
    %57 = vector.broadcast %56 : vector<1x900xi1> to vector<16x900xi1>
    %58 = vector.broadcast %cst_49 : f32 to vector<16x900xf32>
    %59 = arith.select %57, %52, %58 : vector<16x900xi1>, vector<16x900xf32>
    %60 = arith.truncf %59 : vector<16x900xf32> to vector<16x900xbf16>
    %c0_50 = arith.constant 0 : index
    %c32_51 = arith.constant 32 : index
    %61 = vector.load %arg14[%c0_50, %c32_51] : memref<16x964xbf16, #tpu.memory_space<vmem>>, vector<16x900xbf16>
    tpu.vector_store %arg14[%c0_50, %c32_51], %60 {strides = array<i32>} : memref<16x964xbf16, #tpu.memory_space<vmem>>, vector<16x900xbf16>,
    %cst_52 = arith.constant 0.000000e+00 : f32
    %62 = vector.broadcast %cst_52 : f32 to vector<32x900xf32>
    %c0_53 = arith.constant 0 : index
    %c1_54 = arith.constant 1 : index
    %63 = vector.load %arg14[%c0_53, %c1_54] : memref<16x964xbf16, #tpu.memory_space<vmem>>, vector<16x900xbf16>
    %c0_55 = arith.constant 0 : index
    %c0_56 = arith.constant 0 : index
    %c0_57 = arith.constant 0 : index
    %64 = vector.load %arg4[%c0_55, %c0_56, %c0_57] : memref<9x32x16xbf16, #tpu.memory_space<vmem>>, vector<1x32x16xbf16>
    %65 = vector.shape_cast %64 : vector<1x32x16xbf16> to vector<32x16xbf16>
    %cst_58 = arith.constant dense<0.000000e+00> : vector<32x900xf32>
    %66 = tpu.matmul %65, %63, %cst_58 {dimension_numbers = #tpu.dot_dimension_numbers<[1], [0], [0], [1], [0, 0, 1, 1], [], []>} : vector<32x16xbf16>, vector<16x900xbf16>, vector<32x900xf32> -> vector<32x900xf32>
    %67 = arith.addf %62, %66 : vector<32x900xf32>
    %c0_59 = arith.constant 0 : index
    %c2_60 = arith.constant 2 : index
    %68 = vector.load %arg14[%c0_59, %c2_60] : memref<16x964xbf16, #tpu.memory_space<vmem>>, vector<16x900xbf16>
    %c1_61 = arith.constant 1 : index
    %c0_62 = arith.constant 0 : index
    %c0_63 = arith.constant 0 : index
    %69 = vector.load %arg4[%c1_61, %c0_62, %c0_63] : memref<9x32x16xbf16, #tpu.memory_space<vmem>>, vector<1x32x16xbf16>
    %70 = vector.shape_cast %69 : vector<1x32x16xbf16> to vector<32x16xbf16>
    %cst_64 = arith.constant dense<0.000000e+00> : vector<32x900xf32>
    %71 = tpu.matmul %70, %68, %cst_64 {dimension_numbers = #tpu.dot_dimension_numbers<[1], [0], [0], [1], [0, 0, 1, 1], [], []>} : vector<32x16xbf16>, vector<16x900xbf16>, vector<32x900xf32> -> vector<32x900xf32>
    %72 = arith.addf %67, %71 : vector<32x900xf32>
    %c0_65 = arith.constant 0 : index
    %c3_66 = arith.constant 3 : index
    %73 = vector.load %arg14[%c0_65, %c3_66] : memref<16x964xbf16, #tpu.memory_space<vmem>>, vector<16x900xbf16>
    %c2_67 = arith.constant 2 : index
    %c0_68 = arith.constant 0 : index
    %c0_69 = arith.constant 0 : index
    %74 = vector.load %arg4[%c2_67, %c0_68, %c0_69] : memref<9x32x16xbf16, #tpu.memory_space<vmem>>, vector<1x32x16xbf16>
    %75 = vector.shape_cast %74 : vector<1x32x16xbf16> to vector<32x16xbf16>
    %cst_70 = arith.constant dense<0.000000e+00> : vector<32x900xf32>
    %76 = tpu.matmul %75, %73, %cst_70 {dimension_numbers = #tpu.dot_dimension_numbers<[1], [0], [0], [1], [0, 0, 1, 1], [], []>} : vector<32x16xbf16>, vector<16x900xbf16>, vector<32x900xf32> -> vector<32x900xf32>
    %77 = arith.addf %72, %76 : vector<32x900xf32>
    %c0_71 = arith.constant 0 : index
    %c31_72 = arith.constant 31 : index
    %78 = vector.load %arg14[%c0_71, %c31_72] : memref<16x964xbf16, #tpu.memory_space<vmem>>, vector<16x900xbf16>
    %c3_73 = arith.constant 3 : index
    %c0_74 = arith.constant 0 : index
    %c0_75 = arith.constant 0 : index
    %79 = vector.load %arg4[%c3_73, %c0_74, %c0_75] : memref<9x32x16xbf16, #tpu.memory_space<vmem>>, vector<1x32x16xbf16>
    %80 = vector.shape_cast %79 : vector<1x32x16xbf16> to vector<32x16xbf16>
    %cst_76 = arith.constant dense<0.000000e+00> : vector<32x900xf32>
    %81 = tpu.matmul %80, %78, %cst_76 {dimension_numbers = #tpu.dot_dimension_numbers<[1], [0], [0], [1], [0, 0, 1, 1], [], []>} : vector<32x16xbf16>, vector<16x900xbf16>, vector<32x900xf32> -> vector<32x900xf32>
    %82 = arith.addf %77, %81 : vector<32x900xf32>
    %c0_77 = arith.constant 0 : index
    %c32_78 = arith.constant 32 : index
    %83 = vector.load %arg14[%c0_77, %c32_78] : memref<16x964xbf16, #tpu.memory_space<vmem>>, vector<16x900xbf16>
    %c4_79 = arith.constant 4 : index
    %c0_80 = arith.constant 0 : index
    %c0_81 = arith.constant 0 : index
    %84 = vector.load %arg4[%c4_79, %c0_80, %c0_81] : memref<9x32x16xbf16, #tpu.memory_space<vmem>>, vector<1x32x16xbf16>
    %85 = vector.shape_cast %84 : vector<1x32x16xbf16> to vector<32x16xbf16>
    %cst_82 = arith.constant dense<0.000000e+00> : vector<32x900xf32>
    %86 = tpu.matmul %85, %83, %cst_82 {dimension_numbers = #tpu.dot_dimension_numbers<[1], [0], [0], [1], [0, 0, 1, 1], [], []>} : vector<32x16xbf16>, vector<16x900xbf16>, vector<32x900xf32> -> vector<32x900xf32>
    %87 = arith.addf %82, %86 : vector<32x900xf32>
    %c0_83 = arith.constant 0 : index
    %c33_84 = arith.constant 33 : index
    %88 = vector.load %arg14[%c0_83, %c33_84] : memref<16x964xbf16, #tpu.memory_space<vmem>>, vector<16x900xbf16>
    %c5_85 = arith.constant 5 : index
    %c0_86 = arith.constant 0 : index
    %c0_87 = arith.constant 0 : index
    %89 = vector.load %arg4[%c5_85, %c0_86, %c0_87] : memref<9x32x16xbf16, #tpu.memory_space<vmem>>, vector<1x32x16xbf16>
    %90 = vector.shape_cast %89 : vector<1x32x16xbf16> to vector<32x16xbf16>
    %cst_88 = arith.constant dense<0.000000e+00> : vector<32x900xf32>
    %91 = tpu.matmul %90, %88, %cst_88 {dimension_numbers = #tpu.dot_dimension_numbers<[1], [0], [0], [1], [0, 0, 1, 1], [], []>} : vector<32x16xbf16>, vector<16x900xbf16>, vector<32x900xf32> -> vector<32x900xf32>
    %92 = arith.addf %87, %91 : vector<32x900xf32>
    %c0_89 = arith.constant 0 : index
    %c61_90 = arith.constant 61 : index
    %93 = vector.load %arg14[%c0_89, %c61_90] : memref<16x964xbf16, #tpu.memory_space<vmem>>, vector<16x900xbf16>
    %c6_91 = arith.constant 6 : index
    %c0_92 = arith.constant 0 : index
    %c0_93 = arith.constant 0 : index
    %94 = vector.load %arg4[%c6_91, %c0_92, %c0_93] : memref<9x32x16xbf16, #tpu.memory_space<vmem>>, vector<1x32x16xbf16>
    %95 = vector.shape_cast %94 : vector<1x32x16xbf16> to vector<32x16xbf16>
    %cst_94 = arith.constant dense<0.000000e+00> : vector<32x900xf32>
    %96 = tpu.matmul %95, %93, %cst_94 {dimension_numbers = #tpu.dot_dimension_numbers<[1], [0], [0], [1], [0, 0, 1, 1], [], []>} : vector<32x16xbf16>, vector<16x900xbf16>, vector<32x900xf32> -> vector<32x900xf32>
    %97 = arith.addf %92, %96 : vector<32x900xf32>
    %c0_95 = arith.constant 0 : index
    %c62_96 = arith.constant 62 : index
    %98 = vector.load %arg14[%c0_95, %c62_96] : memref<16x964xbf16, #tpu.memory_space<vmem>>, vector<16x900xbf16>
    %c7_97 = arith.constant 7 : index
    %c0_98 = arith.constant 0 : index
    %c0_99 = arith.constant 0 : index
    %99 = vector.load %arg4[%c7_97, %c0_98, %c0_99] : memref<9x32x16xbf16, #tpu.memory_space<vmem>>, vector<1x32x16xbf16>
    %100 = vector.shape_cast %99 : vector<1x32x16xbf16> to vector<32x16xbf16>
    %cst_100 = arith.constant dense<0.000000e+00> : vector<32x900xf32>
    %101 = tpu.matmul %100, %98, %cst_100 {dimension_numbers = #tpu.dot_dimension_numbers<[1], [0], [0], [1], [0, 0, 1, 1], [], []>} : vector<32x16xbf16>, vector<16x900xbf16>, vector<32x900xf32> -> vector<32x900xf32>
    %102 = arith.addf %97, %101 : vector<32x900xf32>
    %c0_101 = arith.constant 0 : index
    %c63_102 = arith.constant 63 : index
    %103 = vector.load %arg14[%c0_101, %c63_102] : memref<16x964xbf16, #tpu.memory_space<vmem>>, vector<16x900xbf16>
    %c8_103 = arith.constant 8 : index
    %c0_104 = arith.constant 0 : index
    %c0_105 = arith.constant 0 : index
    %104 = vector.load %arg4[%c8_103, %c0_104, %c0_105] : memref<9x32x16xbf16, #tpu.memory_space<vmem>>, vector<1x32x16xbf16>
    %105 = vector.shape_cast %104 : vector<1x32x16xbf16> to vector<32x16xbf16>
    %cst_106 = arith.constant dense<0.000000e+00> : vector<32x900xf32>
    %106 = tpu.matmul %105, %103, %cst_106 {dimension_numbers = #tpu.dot_dimension_numbers<[1], [0], [0], [1], [0, 0, 1, 1], [], []>} : vector<32x16xbf16>, vector<16x900xbf16>, vector<32x900xf32> -> vector<32x900xf32>
    %107 = arith.addf %102, %106 : vector<32x900xf32>
    %c0_107 = arith.constant 0 : index
    %c0_108 = arith.constant 0 : index
    %108 = vector.load %arg5[%c0_107, %c0_108] : memref<32x1xf32, #tpu.memory_space<vmem>>, vector<32x1xf32>
    %109 = vector.broadcast %108 : vector<32x1xf32> to vector<32x900xf32>
    %110 = arith.addf %107, %109 : vector<32x900xf32>
    %111 = math.tanh %110 : vector<32x900xf32>
    %c0_109 = arith.constant 0 : index
    %c0_110 = arith.constant 0 : index
    %112 = vector.load %arg10[%c0_109, %c0_110] : memref<1x900xf32, #tpu.memory_space<vmem>>, vector<1x900xf32>
    %cst_111 = arith.constant 5.000000e-01 : f32
    %113 = vector.broadcast %cst_111 : f32 to vector<1x900xf32>
    %114 = arith.cmpf ogt, %112, %113 : vector<1x900xf32>
    %cst_112 = arith.constant 0.000000e+00 : f32
    %115 = vector.shape_cast %114 : vector<1x900xi1> to vector<1x900xi1>
    %116 = vector.broadcast %115 : vector<1x900xi1> to vector<32x900xi1>
    %117 = vector.broadcast %cst_112 : f32 to vector<32x900xf32>
    %118 = arith.select %116, %111, %117 : vector<32x900xi1>, vector<32x900xf32>
    %119 = arith.truncf %118 : vector<32x900xf32> to vector<32x900xbf16>
    %c0_113 = arith.constant 0 : index
    %c0_114 = arith.constant 0 : index
    %120 = vector.load %arg8[%c0_113, %c0_114] : memref<900x256xbf16, #tpu.memory_space<vmem>>, vector<900x256xbf16>
    %cst_115 = arith.constant dense<0.000000e+00> : vector<32x256xf32>
    %121 = tpu.matmul %119, %120, %cst_115 {dimension_numbers = #tpu.dot_dimension_numbers<[1], [0], [0], [1], [0, 0, 1, 1], [], []>} : vector<32x900xbf16>, vector<900x256xbf16>, vector<32x256xf32> -> vector<32x256xf32>
    %122 = arith.truncf %121 : vector<32x256xf32> to vector<32x256xbf16>
    %c0_116 = arith.constant 0 : index
    %c32_117 = arith.constant 32 : index
    %123 = vector.load %arg15[%c0_116, %c32_117] : memref<32x320xbf16, #tpu.memory_space<vmem>>, vector<32x256xbf16>
    tpu.vector_store %arg15[%c0_116, %c32_117], %122 {strides = array<i32>} : memref<32x320xbf16, #tpu.memory_space<vmem>>, vector<32x256xbf16>,
    %cst_118 = arith.constant 0.000000e+00 : f32
    %124 = vector.broadcast %cst_118 : f32 to vector<64x256xf32>
    %c0_119 = arith.constant 0 : index
    %c15 = arith.constant 15 : index
    %125 = vector.load %arg15[%c0_119, %c15] : memref<32x320xbf16, #tpu.memory_space<vmem>>, vector<32x256xbf16>
    %c0_120 = arith.constant 0 : index
    %c0_121 = arith.constant 0 : index
    %c0_122 = arith.constant 0 : index
    %126 = vector.load %arg6[%c0_120, %c0_121, %c0_122] : memref<9x64x32xbf16, #tpu.memory_space<vmem>>, vector<1x64x32xbf16>
    %127 = vector.shape_cast %126 : vector<1x64x32xbf16> to vector<64x32xbf16>
    %cst_123 = arith.constant dense<0.000000e+00> : vector<64x256xf32>
    %128 = tpu.matmul %127, %125, %cst_123 {dimension_numbers = #tpu.dot_dimension_numbers<[1], [0], [0], [1], [0, 0, 1, 1], [], []>} : vector<64x32xbf16>, vector<32x256xbf16>, vector<64x256xf32> -> vector<64x256xf32>
    %129 = arith.addf %124, %128 : vector<64x256xf32>
    %c0_124 = arith.constant 0 : index
    %c16 = arith.constant 16 : index
    %130 = vector.load %arg15[%c0_124, %c16] : memref<32x320xbf16, #tpu.memory_space<vmem>>, vector<32x256xbf16>
    %c1_125 = arith.constant 1 : index
    %c0_126 = arith.constant 0 : index
    %c0_127 = arith.constant 0 : index
    %131 = vector.load %arg6[%c1_125, %c0_126, %c0_127] : memref<9x64x32xbf16, #tpu.memory_space<vmem>>, vector<1x64x32xbf16>
    %132 = vector.shape_cast %131 : vector<1x64x32xbf16> to vector<64x32xbf16>
    %cst_128 = arith.constant dense<0.000000e+00> : vector<64x256xf32>
    %133 = tpu.matmul %132, %130, %cst_128 {dimension_numbers = #tpu.dot_dimension_numbers<[1], [0], [0], [1], [0, 0, 1, 1], [], []>} : vector<64x32xbf16>, vector<32x256xbf16>, vector<64x256xf32> -> vector<64x256xf32>
    %134 = arith.addf %129, %133 : vector<64x256xf32>
    %c0_129 = arith.constant 0 : index
    %c17 = arith.constant 17 : index
    %135 = vector.load %arg15[%c0_129, %c17] : memref<32x320xbf16, #tpu.memory_space<vmem>>, vector<32x256xbf16>
    %c2_130 = arith.constant 2 : index
    %c0_131 = arith.constant 0 : index
    %c0_132 = arith.constant 0 : index
    %136 = vector.load %arg6[%c2_130, %c0_131, %c0_132] : memref<9x64x32xbf16, #tpu.memory_space<vmem>>, vector<1x64x32xbf16>
    %137 = vector.shape_cast %136 : vector<1x64x32xbf16> to vector<64x32xbf16>
    %cst_133 = arith.constant dense<0.000000e+00> : vector<64x256xf32>
    %138 = tpu.matmul %137, %135, %cst_133 {dimension_numbers = #tpu.dot_dimension_numbers<[1], [0], [0], [1], [0, 0, 1, 1], [], []>} : vector<64x32xbf16>, vector<32x256xbf16>, vector<64x256xf32> -> vector<64x256xf32>
    %139 = arith.addf %134, %138 : vector<64x256xf32>
    %c0_134 = arith.constant 0 : index
    %c31_135 = arith.constant 31 : index
    %140 = vector.load %arg15[%c0_134, %c31_135] : memref<32x320xbf16, #tpu.memory_space<vmem>>, vector<32x256xbf16>
    %c3_136 = arith.constant 3 : index
    %c0_137 = arith.constant 0 : index
    %c0_138 = arith.constant 0 : index
    %141 = vector.load %arg6[%c3_136, %c0_137, %c0_138] : memref<9x64x32xbf16, #tpu.memory_space<vmem>>, vector<1x64x32xbf16>
    %142 = vector.shape_cast %141 : vector<1x64x32xbf16> to vector<64x32xbf16>
    %cst_139 = arith.constant dense<0.000000e+00> : vector<64x256xf32>
    %143 = tpu.matmul %142, %140, %cst_139 {dimension_numbers = #tpu.dot_dimension_numbers<[1], [0], [0], [1], [0, 0, 1, 1], [], []>} : vector<64x32xbf16>, vector<32x256xbf16>, vector<64x256xf32> -> vector<64x256xf32>
    %144 = arith.addf %139, %143 : vector<64x256xf32>
    %c0_140 = arith.constant 0 : index
    %c32_141 = arith.constant 32 : index
    %145 = vector.load %arg15[%c0_140, %c32_141] : memref<32x320xbf16, #tpu.memory_space<vmem>>, vector<32x256xbf16>
    %c4_142 = arith.constant 4 : index
    %c0_143 = arith.constant 0 : index
    %c0_144 = arith.constant 0 : index
    %146 = vector.load %arg6[%c4_142, %c0_143, %c0_144] : memref<9x64x32xbf16, #tpu.memory_space<vmem>>, vector<1x64x32xbf16>
    %147 = vector.shape_cast %146 : vector<1x64x32xbf16> to vector<64x32xbf16>
    %cst_145 = arith.constant dense<0.000000e+00> : vector<64x256xf32>
    %148 = tpu.matmul %147, %145, %cst_145 {dimension_numbers = #tpu.dot_dimension_numbers<[1], [0], [0], [1], [0, 0, 1, 1], [], []>} : vector<64x32xbf16>, vector<32x256xbf16>, vector<64x256xf32> -> vector<64x256xf32>
    %149 = arith.addf %144, %148 : vector<64x256xf32>
    %c0_146 = arith.constant 0 : index
    %c33_147 = arith.constant 33 : index
    %150 = vector.load %arg15[%c0_146, %c33_147] : memref<32x320xbf16, #tpu.memory_space<vmem>>, vector<32x256xbf16>
    %c5_148 = arith.constant 5 : index
    %c0_149 = arith.constant 0 : index
    %c0_150 = arith.constant 0 : index
    %151 = vector.load %arg6[%c5_148, %c0_149, %c0_150] : memref<9x64x32xbf16, #tpu.memory_space<vmem>>, vector<1x64x32xbf16>
    %152 = vector.shape_cast %151 : vector<1x64x32xbf16> to vector<64x32xbf16>
    %cst_151 = arith.constant dense<0.000000e+00> : vector<64x256xf32>
    %153 = tpu.matmul %152, %150, %cst_151 {dimension_numbers = #tpu.dot_dimension_numbers<[1], [0], [0], [1], [0, 0, 1, 1], [], []>} : vector<64x32xbf16>, vector<32x256xbf16>, vector<64x256xf32> -> vector<64x256xf32>
    %154 = arith.addf %149, %153 : vector<64x256xf32>
    %c0_152 = arith.constant 0 : index
    %c47 = arith.constant 47 : index
    %155 = vector.load %arg15[%c0_152, %c47] : memref<32x320xbf16, #tpu.memory_space<vmem>>, vector<32x256xbf16>
    %c6_153 = arith.constant 6 : index
    %c0_154 = arith.constant 0 : index
    %c0_155 = arith.constant 0 : index
    %156 = vector.load %arg6[%c6_153, %c0_154, %c0_155] : memref<9x64x32xbf16, #tpu.memory_space<vmem>>, vector<1x64x32xbf16>
    %157 = vector.shape_cast %156 : vector<1x64x32xbf16> to vector<64x32xbf16>
    %cst_156 = arith.constant dense<0.000000e+00> : vector<64x256xf32>
    %158 = tpu.matmul %157, %155, %cst_156 {dimension_numbers = #tpu.dot_dimension_numbers<[1], [0], [0], [1], [0, 0, 1, 1], [], []>} : vector<64x32xbf16>, vector<32x256xbf16>, vector<64x256xf32> -> vector<64x256xf32>
    %159 = arith.addf %154, %158 : vector<64x256xf32>
    %c0_157 = arith.constant 0 : index
    %c48 = arith.constant 48 : index
    %160 = vector.load %arg15[%c0_157, %c48] : memref<32x320xbf16, #tpu.memory_space<vmem>>, vector<32x256xbf16>
    %c7_158 = arith.constant 7 : index
    %c0_159 = arith.constant 0 : index
    %c0_160 = arith.constant 0 : index
    %161 = vector.load %arg6[%c7_158, %c0_159, %c0_160] : memref<9x64x32xbf16, #tpu.memory_space<vmem>>, vector<1x64x32xbf16>
    %162 = vector.shape_cast %161 : vector<1x64x32xbf16> to vector<64x32xbf16>
    %cst_161 = arith.constant dense<0.000000e+00> : vector<64x256xf32>
    %163 = tpu.matmul %162, %160, %cst_161 {dimension_numbers = #tpu.dot_dimension_numbers<[1], [0], [0], [1], [0, 0, 1, 1], [], []>} : vector<64x32xbf16>, vector<32x256xbf16>, vector<64x256xf32> -> vector<64x256xf32>
    %164 = arith.addf %159, %163 : vector<64x256xf32>
    %c0_162 = arith.constant 0 : index
    %c49 = arith.constant 49 : index
    %165 = vector.load %arg15[%c0_162, %c49] : memref<32x320xbf16, #tpu.memory_space<vmem>>, vector<32x256xbf16>
    %c8_163 = arith.constant 8 : index
    %c0_164 = arith.constant 0 : index
    %c0_165 = arith.constant 0 : index
    %166 = vector.load %arg6[%c8_163, %c0_164, %c0_165] : memref<9x64x32xbf16, #tpu.memory_space<vmem>>, vector<1x64x32xbf16>
    %167 = vector.shape_cast %166 : vector<1x64x32xbf16> to vector<64x32xbf16>
    %cst_166 = arith.constant dense<0.000000e+00> : vector<64x256xf32>
    %168 = tpu.matmul %167, %165, %cst_166 {dimension_numbers = #tpu.dot_dimension_numbers<[1], [0], [0], [1], [0, 0, 1, 1], [], []>} : vector<64x32xbf16>, vector<32x256xbf16>, vector<64x256xf32> -> vector<64x256xf32>
    %169 = arith.addf %164, %168 : vector<64x256xf32>
    %c0_167 = arith.constant 0 : index
    %c0_168 = arith.constant 0 : index
    %170 = vector.load %arg7[%c0_167, %c0_168] : memref<64x1xf32, #tpu.memory_space<vmem>>, vector<64x1xf32>
    %171 = vector.broadcast %170 : vector<64x1xf32> to vector<64x256xf32>
    %172 = arith.addf %169, %171 : vector<64x256xf32>
    %173 = math.tanh %172 : vector<64x256xf32>
    %c0_169 = arith.constant 0 : index
    %c0_170 = arith.constant 0 : index
    %174 = vector.load %arg11[%c0_169, %c0_170] : memref<1x256xf32, #tpu.memory_space<vmem>>, vector<1x256xf32>
    %cst_171 = arith.constant 5.000000e-01 : f32
    %175 = vector.broadcast %cst_171 : f32 to vector<1x256xf32>
    %176 = arith.cmpf ogt, %174, %175 : vector<1x256xf32>
    %cst_172 = arith.constant 0.000000e+00 : f32
    %177 = vector.shape_cast %176 : vector<1x256xi1> to vector<1x256xi1>
    %178 = vector.broadcast %177 : vector<1x256xi1> to vector<64x256xi1>
    %179 = vector.broadcast %cst_172 : f32 to vector<64x256xf32>
    %180 = arith.select %178, %173, %179 : vector<64x256xi1>, vector<64x256xf32>
    %181 = arith.truncf %180 : vector<64x256xf32> to vector<64x256xbf16>
    %c0_173 = arith.constant 0 : index
    %c0_174 = arith.constant 0 : index
    %182 = vector.load %arg9[%c0_173, %c0_174] : memref<256x49xbf16, #tpu.memory_space<vmem>>, vector<256x49xbf16>
    %cst_175 = arith.constant dense<0.000000e+00> : vector<64x49xf32>
    %183 = tpu.matmul %181, %182, %cst_175 {dimension_numbers = #tpu.dot_dimension_numbers<[1], [0], [0], [1], [0, 0, 1, 1], [], []>} : vector<64x256xbf16>, vector<256x49xbf16>, vector<64x49xf32> -> vector<64x49xf32>
    %184 = arith.truncf %183 : vector<64x49xf32> to vector<64x49xbf16>
    %c0_176 = arith.constant 0 : index
    %c0_177 = arith.constant 0 : index
    %c0_178 = arith.constant 0 : index
    %185 = vector.load %arg12[%c0_176, %c0_177, %c0_178] : memref<1x64x49xbf16, #tpu.memory_space<vmem>>, vector<1x64x49xbf16>
    %186 = vector.shape_cast %185 : vector<1x64x49xbf16> to vector<64x49xbf16>
    %187 = vector.shape_cast %184 : vector<64x49xbf16> to vector<1x64x49xbf16>
    tpu.vector_store %arg12[%c0_176, %c0_177, %c0_178], %187 {strides = array<i32>} : memref<1x64x49xbf16, #tpu.memory_space<vmem>>, vector<1x64x49xbf16>,
    return
  }
  func.func @transform_0(%arg0: i32) -> (i32, i32, i32) {
    %c0_i32 = arith.constant 0 : i32
    %c0_i32_0 = arith.constant 0 : i32
    %c0_i32_1 = arith.constant 0 : i32
    return %arg0, %c0_i32, %c0_i32_0 : i32, i32, i32
  }
  func.func @transform_1(%arg0: i32) -> (i32, i32, i32) {
    %c0_i32 = arith.constant 0 : i32
    %c0_i32_0 = arith.constant 0 : i32
    %c0_i32_1 = arith.constant 0 : i32
    %c0_i32_2 = arith.constant 0 : i32
    return %c0_i32, %c0_i32_0, %c0_i32_1 : i32, i32, i32
  }
  func.func @transform_2(%arg0: i32) -> (i32, i32) {
    %c0_i32 = arith.constant 0 : i32
    %c0_i32_0 = arith.constant 0 : i32
    %c0_i32_1 = arith.constant 0 : i32
    return %c0_i32, %c0_i32_0 : i32, i32
  }
  func.func @transform_3(%arg0: i32) -> (i32, i32, i32) {
    %c0_i32 = arith.constant 0 : i32
    %c0_i32_0 = arith.constant 0 : i32
    %c0_i32_1 = arith.constant 0 : i32
    %c0_i32_2 = arith.constant 0 : i32
    return %c0_i32, %c0_i32_0, %c0_i32_1 : i32, i32, i32
  }
  func.func @transform_4(%arg0: i32) -> (i32, i32) {
    %c0_i32 = arith.constant 0 : i32
    %c0_i32_0 = arith.constant 0 : i32
    %c0_i32_1 = arith.constant 0 : i32
    return %c0_i32, %c0_i32_0 : i32, i32
  }
  func.func @transform_5(%arg0: i32) -> (i32, i32, i32) {
    %c0_i32 = arith.constant 0 : i32
    %c0_i32_0 = arith.constant 0 : i32
    %c0_i32_1 = arith.constant 0 : i32
    %c0_i32_2 = arith.constant 0 : i32
    return %c0_i32, %c0_i32_0, %c0_i32_1 : i32, i32, i32
  }
  func.func @transform_6(%arg0: i32) -> (i32, i32) {
    %c0_i32 = arith.constant 0 : i32
    %c0_i32_0 = arith.constant 0 : i32
    %c0_i32_1 = arith.constant 0 : i32
    return %c0_i32, %c0_i32_0 : i32, i32
  }
  func.func @transform_7(%arg0: i32) -> (i32, i32) {
    %c0_i32 = arith.constant 0 : i32
    %c0_i32_0 = arith.constant 0 : i32
    %c0_i32_1 = arith.constant 0 : i32
    return %c0_i32, %c0_i32_0 : i32, i32
  }
  func.func @transform_8(%arg0: i32) -> (i32, i32) {
    %c0_i32 = arith.constant 0 : i32
    %c0_i32_0 = arith.constant 0 : i32
    %c0_i32_1 = arith.constant 0 : i32
    return %c0_i32, %c0_i32_0 : i32, i32
  }
  func.func @transform_9(%arg0: i32) -> (i32, i32) {
    %c0_i32 = arith.constant 0 : i32
    %c0_i32_0 = arith.constant 0 : i32
    %c0_i32_1 = arith.constant 0 : i32
    return %c0_i32, %c0_i32_0 : i32, i32
  }
  func.func @transform_10(%arg0: i32) -> (i32, i32) {
    %c0_i32 = arith.constant 0 : i32
    %c0_i32_0 = arith.constant 0 : i32
    %c0_i32_1 = arith.constant 0 : i32
    return %c0_i32, %c0_i32_0 : i32, i32
  }
  func.func @transform_11(%arg0: i32) -> (i32, i32, i32) {
    %c0_i32 = arith.constant 0 : i32
    %c0_i32_0 = arith.constant 0 : i32
    %c0_i32_1 = arith.constant 0 : i32
    return %arg0, %c0_i32, %c0_i32_0 : i32, i32, i32
  }
}

module attributes {stable_mosaic.version = 11 : i64} {
  func.func @_fc_fused_kernel(%arg0: memref<2x3136xbf16, #tpu.memory_space<vmem>>, %arg1: memref<3136x128xbf16, #tpu.memory_space<vmem>>, %arg2: memref<1x128xf32, #tpu.memory_space<vmem>>, %arg3: memref<128x8xbf16, #tpu.memory_space<vmem>>, %arg4: memref<1x8xf32, #tpu.memory_space<vmem>>, %arg5: memref<2x8xf32, #tpu.memory_space<vmem>>) attributes {dimension_semantics = [], scalar_prefetch = 0 : i64, scratch_operands = 0 : i64, tpu.core_type = #tpu.core_type<tc>} {
    %c0 = arith.constant 0 : index
    %c0_0 = arith.constant 0 : index
    %0 = vector.load %arg0[%c0, %c0_0] : memref<2x3136xbf16, #tpu.memory_space<vmem>>, vector<2x3136xbf16>
    %c0_1 = arith.constant 0 : index
    %c0_2 = arith.constant 0 : index
    %1 = vector.load %arg1[%c0_1, %c0_2] : memref<3136x128xbf16, #tpu.memory_space<vmem>>, vector<3136x128xbf16>
    %cst = arith.constant dense<0.000000e+00> : vector<2x128xf32>
    %2 = tpu.matmul %0, %1, %cst {dimension_numbers = #tpu.dot_dimension_numbers<[1], [0], [0], [1], [0, 0, 1, 1], [], []>} : vector<2x3136xbf16>, vector<3136x128xbf16>, vector<2x128xf32> -> vector<2x128xf32>
    %c0_3 = arith.constant 0 : index
    %c0_4 = arith.constant 0 : index
    %3 = vector.load %arg2[%c0_3, %c0_4] : memref<1x128xf32, #tpu.memory_space<vmem>>, vector<1x128xf32>
    %4 = vector.broadcast %3 : vector<1x128xf32> to vector<2x128xf32>
    %5 = arith.addf %2, %4 : vector<2x128xf32>
    %6 = math.tanh %5 : vector<2x128xf32>
    %7 = arith.truncf %6 : vector<2x128xf32> to vector<2x128xbf16>
    %c0_5 = arith.constant 0 : index
    %c0_6 = arith.constant 0 : index
    %8 = vector.load %arg3[%c0_5, %c0_6] : memref<128x8xbf16, #tpu.memory_space<vmem>>, vector<128x8xbf16>
    %cst_7 = arith.constant dense<0.000000e+00> : vector<2x8xf32>
    %9 = tpu.matmul %7, %8, %cst_7 {dimension_numbers = #tpu.dot_dimension_numbers<[1], [0], [0], [1], [0, 0, 1, 1], [], []>} : vector<2x128xbf16>, vector<128x8xbf16>, vector<2x8xf32> -> vector<2x8xf32>
    %c0_8 = arith.constant 0 : index
    %c0_9 = arith.constant 0 : index
    %10 = vector.load %arg4[%c0_8, %c0_9] : memref<1x8xf32, #tpu.memory_space<vmem>>, vector<1x8xf32>
    %11 = vector.broadcast %10 : vector<1x8xf32> to vector<2x8xf32>
    %12 = arith.addf %9, %11 : vector<2x8xf32>
    %c0_10 = arith.constant 0 : index
    %c0_11 = arith.constant 0 : index
    %13 = vector.load %arg5[%c0_10, %c0_11] : memref<2x8xf32, #tpu.memory_space<vmem>>, vector<2x8xf32>
    tpu.vector_store %arg5[%c0_10, %c0_11], %12 {strides = array<i32>} : memref<2x8xf32, #tpu.memory_space<vmem>>, vector<2x8xf32>,
    return
  }
}

</mosaic_0001>

<bundles_post_ra>
// kernel: pallas_forward.3
= control target key start
LH: loop header
LB: loop body
LE: loop exit
PB: predicated region body
PF: predicated region fallthrough
CT: control target
= control target key end

     0   :  { %v433_v27 = vlaneseq  ;;  %v3198_v35 = vmov 1966171168   ;;  %s3924_s0 = inlined_call_operand.vmem [shape: bf16[2,3136], index: 0, kind: input, shape index: {}]   ;;  %s3925_s1 = inlined_call_operand.vmem [shape: bf16[3136,128], index: 1, kind: input, shape index: {}]   ;;  %s3926_s2 = inlined_call_operand.vmem [shape: f32[1,128], index: 2, kind: input, shape index: {}]   ;;  %s3927_s3 = inlined_call_operand.vmem [shape: bf16[128,8], index: 3, kind: input, shape index: {}]   ;;  %s3928_s4 = inlined_call_operand.vmem [shape: f32[1,8], index: 4, kind: input, shape index: {}]   ;;  %s3929_s5 = inlined_call_operand.hbm [shape: f32[2,8], index: 5, kind: output, shape index: {}]  }
   0x1   :  { %v2965_v0 = vld [vmem:[%s3925_s1 + $0x40] sm:$0xff]   ;;  %v2969_v4 = vld [vmem:[%s3925_s1 + $0x48] sm:$0xff]   ;;  %v2973_v8 = vld [vmem:[%s3925_s1 + $0x50] sm:$0xff]   ;;  %v431_v36 = vunpack.c.l.s4 %v3198_v35 }
   0x2   :  { %v2966_v1 = vld [vmem:[%s3925_s1] sm:$0xff]   ;;  %2651 = vmatprep.subr.bf16.mxu0 %v2965_v0  ;;  %v2970_v5 = vld [vmem:[%s3925_s1 + $0x8] sm:$0xff]   ;;  %v2974_v9 = vld [vmem:[%s3925_s1 + $0x10] sm:$0xff]   ;;  %v434_v32 = vshrl.u32 %v433_v27, 7 }
   0x3   :  { %v2967_v2 = vld [vmem:[%s3925_s1 + $0xc0] sm:$0xff]   ;;  %2652 = vmatpush3.bf16.msra.mxu0 %v2966_v1  ;;  %v2971_v6 = vld [vmem:[%s3925_s1 + $0xc8] sm:$0xff]   ;;  %v2975_v10 = vld [vmem:[%s3925_s1 + $0xd0] sm:$0xff]   ;;  %v432_v39 = vunpack.c.0.s8 %v431_v36 }
   0x4   :  { %v2968_v3 = vld [vmem:[%s3925_s1 + $0x80] sm:$0xff]   ;;  %2673 = vmatprep.subr.bf16.mxu1 %v2967_v2  ;;  %2653 = vmatprep.subr.bf16.mxu0 %v2969_v4  ;;  %v2972_v7 = vld [vmem:[%s3925_s1 + $0x88] sm:$0xff]   ;;  %v2976_v11 = vld [vmem:[%s3925_s1 + $0x90] sm:$0xff]  }
   0x5   :  { %2674 = vmatpush3.bf16.msra.mxu1 %v2968_v3  ;;  %v2977_v12 = vld [vmem:[%s3925_s1 + $0x58] sm:$0xff]   ;;  %v2981_v16 = vld [vmem:[%s3925_s1 + $0x60] sm:$0xff]   ;;  %v2985_v20 = vld [vmem:[%s3925_s1 + $0x68] sm:$0xff]   ;;  %v3337_v41 = vsub.s32 %v432_v39, %v434_v32 }
   0x6   :  { %2675 = vmatprep.subr.bf16.mxu1 %v2971_v6  ;;  %v2978_v13 = vld [vmem:[%s3925_s1 + $0x18] sm:$0xff]   ;;  %v2982_v17 = vld [vmem:[%s3925_s1 + $0x20] sm:$0xff]   ;;  %v2986_v21 = vld [vmem:[%s3925_s1 + $0x28] sm:$0xff]  }
   0x7   :  { %2654 = vmatpush3.bf16.msra.mxu0 %v2970_v5  ;;  %v2979_v14 = vld [vmem:[%s3925_s1 + $0xd8] sm:$0xff]   ;;  %v2983_v18 = vld [vmem:[%s3925_s1 + $0xe0] sm:$0xff]   ;;  %v2987_v22 = vld [vmem:[%s3925_s1 + $0xe8] sm:$0xff]  }
   0x8   :  { %2655 = vmatprep.subr.bf16.mxu0 %v2973_v8  ;;  %v2980_v15 = vld [vmem:[%s3925_s1 + $0x98] sm:$0xff]   ;;  %v2984_v19 = vld [vmem:[%s3925_s1 + $0xa0] sm:$0xff]   ;;  %v2988_v23 = vld [vmem:[%s3925_s1 + $0xa8] sm:$0xff]  }
   0x9   :  { %2676 = vmatpush3.bf16.msra.mxu1 %v2972_v7  ;;  %v2989_v24 = vld [vmem:[%s3925_s1 + $0x70] sm:$0xff]   ;;  %v2993_v29 = vld [vmem:[%s3925_s1 + $0x78] sm:$0xff]   ;;  %v22_v33 = vld [vmem:[%s3924_s0] sm:$0xff] }
   0xa   :  { %2677 = vmatprep.subr.bf16.mxu1 %v2975_v10  ;;  %v2990_v25 = vld [vmem:[%s3925_s1 + $0x30] sm:$0xff]   ;;  %v2994_v30 = vld [vmem:[%s3925_s1 + $0x38] sm:$0xff]   ;;  %v2998_v37 = vld [vmem:[%s3925_s1 + $0x140] sm:$0xff]   ;;  %v429_v38 = vcombine.high %v22_v33, %v22_v33  ;;  %v436_v42 = vrot.slane %v22_v33, %v3337_v41 }
   0xb   :  { %2656 = vmatpush3.bf16.msra.mxu0 %v2974_v9  ;;  %v2991_v26 = vld [vmem:[%s3925_s1 + $0xf0] sm:$0xff]   ;;  %v2995_v31 = vld [vmem:[%s3925_s1 + $0xf8] sm:$0xff]   ;;  %v3000_v40 = vld [vmem:[%s3925_s1 + $0x1c0] sm:$0xff]  }
   0xc   :  { %2657 = vmatprep.subr.bf16.mxu0 %v2977_v12  ;;  %v2992_v28 = vld [vmem:[%s3925_s1 + $0xb0] sm:$0xff]   ;;  %v2997_v34 = vld [vmem:[%s3925_s1 + $0xb8] sm:$0xff]   ;;  %v3341_v43 = vrot.slane %v429_v38, %v3337_v41  ;;  %v444_v44 = vcombine.high %v436_v42, %v436_v42  ;;  %v452_v45 = vrot.slane %v436_v42, %v3337_v41  ;;  %v2999_v48 = vld [vmem:[%s3925_s1 + $0x100] sm:$0xff]  }
   0xd   :  { %2678 = vmatpush3.bf16.msra.mxu1 %v2976_v11  ;;  %v3002_v51 = vld [vmem:[%s3925_s1 + $0x148] sm:$0xff]   ;;  %v3001_v53 = vld [vmem:[%s3925_s1 + $0x180] sm:$0xff]   ;;  %v3006_v57 = vld [vmem:[%s3925_s1 + $0x150] sm:$0xff]  }
   0xe   :  { %2679 = vmatprep.subr.bf16.mxu1 %v2979_v14  ;;  %v445_v46 = vcombine.high %v3341_v43, %v3341_v43  ;;  %v466_v47 = vrot.slane %v444_v44, %v3337_v41  ;;  %v474_v50 = vcombine.high %v452_v45, %v452_v45  ;;  %v3004_v54 = vld [vmem:[%s3925_s1 + $0x1c8] sm:$0xff]   ;;  %v3008_v59 = vld [vmem:[%s3925_s1 + $0x1d0] sm:$0xff]   ;;  %v3010_v61 = vld [vmem:[%s3925_s1 + $0x158] sm:$0xff]  }
   0xf   :  { %2658 = vmatpush3.bf16.msra.mxu0 %v2978_v13  ;;  %v3003_v56 = vld [vmem:[%s3925_s1 + $0x108] sm:$0xff]   ;;  %v3007_v60 = vld [vmem:[%s3925_s1 + $0x110] sm:$0xff]   ;;  %v3012_v63 = vld [vmem:[%s3925_s1 + $0x1d8] sm:$0xff]  }
  0x10   :  { %2659 = vmatprep.subr.bf16.mxu0 %v2981_v16  ;;  %v473_v49 = vrot.slane %v445_v46, %v3337_v41  ;;  %1826 = vmatprep.mubr.bf16.mxu0 %v466_v47  ;;  %v476_v52 = vcombine.high %v466_v47, %v466_v47  ;;  %v3005_v58 = vld [vmem:[%s3925_s1 + $0x188] sm:$0xff]   ;;  %v3009_v62 = vld [vmem:[%s3925_s1 + $0x190] sm:$0xff]   ;;  %v3011_v0 = vld [vmem:[%s3925_s1 + $0x118] sm:$0xff]  }
  0x11   :  { %2680 = vmatpush3.bf16.msra.mxu1 %v2980_v15  ;;  %v3014_v1 = vld [vmem:[%s3925_s1 + $0x160] sm:$0xff]   ;;  %v3013_v2 = vld [vmem:[%s3925_s1 + $0x198] sm:$0xff]   ;;  %v3018_v5 = vld [vmem:[%s3925_s1 + $0x168] sm:$0xff]  }
  0x12   :  { %2681 = vmatprep.subr.bf16.mxu1 %v2983_v18  ;;  %v477_v55 = vcombine.high %v473_v49, %v473_v49  ;;  %1866 = vmatprep.mubr.bf16.mxu1 %v476_v52  ;;  %v3016_v3 = vld [vmem:[%s3925_s1 + $0x1e0] sm:$0xff]   ;;  %v3020_v7 = vld [vmem:[%s3925_s1 + $0x1e8] sm:$0xff]   ;;  %v3022_v9 = vld [vmem:[%s3925_s1 + $0x170] sm:$0xff]  }
  0x13   :  { %2660 = vmatpush3.bf16.msra.mxu0 %v2982_v17  ;;  %v3015_v4 = vld [vmem:[%s3925_s1 + $0x120] sm:$0xff]   ;;  %v3019_v8 = vld [vmem:[%s3925_s1 + $0x128] sm:$0xff]   ;;  %v3024_v11 = vld [vmem:[%s3925_s1 + $0x1f0] sm:$0xff]   ;;  %v459_v17 = vrot.slane %v3341_v43, %v3337_v41 }
  0x14   :  { %2661 = vmatprep.subr.bf16.mxu0 %v2985_v20  ;;  %v3017_v6 = vld [vmem:[%s3925_s1 + $0x1a0] sm:$0xff]   ;;  %v3021_v10 = vld [vmem:[%s3925_s1 + $0x1a8] sm:$0xff]   ;;  %v3023_v12 = vld [vmem:[%s3925_s1 + $0x130] sm:$0xff]  }
  0x15   :  { %2682 = vmatpush3.bf16.msra.mxu1 %v2984_v19  ;;  %v3026_v13 = vld [vmem:[%s3925_s1 + $0x178] sm:$0xff]   ;;  %v3025_v14 = vld [vmem:[%s3925_s1 + $0x1b0] sm:$0xff]   ;;  %v3030_v18 = vld [vmem:[%s3925_s1 + $0x240] sm:$0xff]  }
  0x16   :  { %2683 = vmatprep.subr.bf16.mxu1 %v2987_v22  ;;  %v3028_v15 = vld [vmem:[%s3925_s1 + $0x1f8] sm:$0xff]   ;;  %v3032_v20 = vld [vmem:[%s3925_s1 + $0x2c0] sm:$0xff]   ;;  %v475_v22 = vcombine.high %v459_v17, %v459_v17  ;;  %v3038_v27 = vld [vmem:[%s3925_s1 + $0x250] sm:$0xff]  }
  0x17   :  { %2662 = vmatpush3.bf16.msra.mxu0 %v2986_v21  ;;  %v3027_v16 = vld [vmem:[%s3925_s1 + $0x138] sm:$0xff]   ;;  %v3031_v21 = vld [vmem:[%s3925_s1 + $0x200] sm:$0xff]   ;;  %v3041_v32 = vld [vmem:[%s3925_s1 + $0x290] sm:$0xff]  }
  0x18   :  { %2663 = vmatprep.subr.bf16.mxu0 %v2989_v24  ;;  %v3029_v19 = vld [vmem:[%s3925_s1 + $0x1b8] sm:$0xff]   ;;  %v3033_v24 = vld [vmem:[%s3925_s1 + $0x280] sm:$0xff]   ;;  %v3050_v39 = vld [vmem:[%s3925_s1 + $0x268] sm:$0xff]  }
  0x19   :  { %2684 = vmatpush3.bf16.msra.mxu1 %v2988_v23  ;;  %v3034_v23 = vld [vmem:[%s3925_s1 + $0x248] sm:$0xff]   ;;  %v3044_v33 = vld [vmem:[%s3925_s1 + $0x2d8] sm:$0xff]   ;;  %v3046_v35 = vld [vmem:[%s3925_s1 + $0x260] sm:$0xff]  }
  0x1a   :  { %2685 = vmatprep.subr.bf16.mxu1 %v2991_v26  ;;  %v3035_v26 = vld [vmem:[%s3925_s1 + $0x208] sm:$0xff]   ;;  %v3045_v36 = vld [vmem:[%s3925_s1 + $0x298] sm:$0xff]   ;;  %v3047_v38 = vld [vmem:[%s3925_s1 + $0x220] sm:$0xff]  }
  0x1b   :  { %2664 = vmatpush3.bf16.msra.mxu0 %v2990_v25  ;;  %v3036_v25 = vld [vmem:[%s3925_s1 + $0x2c8] sm:$0xff]   ;;  %v3054_v44 = vld [vmem:[%s3925_s1 + $0x270] sm:$0xff]  }
  0x1c   :  { %2665 = vmatprep.subr.bf16.mxu0 %v2993_v29  ;;  %v3040_v29 = vld [vmem:[%s3925_s1 + $0x2d0] sm:$0xff]   ;;  %v3052_v42 = vld [vmem:[%s3925_s1 + $0x2e8] sm:$0xff]  }
  0x1d   :  { %2686 = vmatpush3.bf16.msra.mxu1 %v2992_v28  ;;  %v3037_v28 = vld [vmem:[%s3925_s1 + $0x288] sm:$0xff]  }
  0x1e   :  { %2687 = vmatprep.subr.bf16.mxu1 %v2995_v31  ;;  %v3042_v31 = vld [vmem:[%s3925_s1 + $0x258] sm:$0xff]   ;;  %v3051_v43 = vld [vmem:[%s3925_s1 + $0x228] sm:$0xff]  }
  0x1f   :  { %2666 = vmatpush3.bf16.msra.mxu0 %v2994_v30  ;;  %v3039_v30 = vld [vmem:[%s3925_s1 + $0x210] sm:$0xff]   ;;  %v3053_v46 = vld [vmem:[%s3925_s1 + $0x2a8] sm:$0xff]  }
  0x20   :  { %2695 = vmatprep.subr.bf16.mxu0 %v2998_v37  ;;  %v3048_v37 = vld [vmem:[%s3925_s1 + $0x2e0] sm:$0xff]  }
  0x21   :  { %2688 = vmatpush3.bf16.msra.mxu1 %v2997_v34  ;;  %v3043_v34 = vld [vmem:[%s3925_s1 + $0x218] sm:$0xff]  }
  0x22   :  { %2717 = vmatprep.subr.bf16.mxu1 %v3000_v40  ;;  %1827 = vmatmul.mubr.bf16.vlgmr.msra.gmra.mrb[0].mxu0 %v452_v45  ;;  %v3049_v40 = vld [vmem:[%s3925_s1 + $0x2a0] sm:$0xff]   ;;  %v23_v45 = vld [vmem:[%s3924_s0 + $0x8] sm:$0xff] }
  0x23   :  { %2696 = vmatpush3.bf16.msra.mxu0 %v2999_v48  ;;  %1906 = vmatprep.mubr.bf16.mxu0 %v473_v49  ;;  %v485_v47 = vrot.slane %v23_v45, %v3337_v41  ;;  %v478_v48 = vcombine.high %v23_v45, %v23_v45  ;;  %v3056_v49 = vld [vmem:[%s3925_s1 + $0x2f0] sm:$0xff]  }
  0x24   :  { %1867 = vmatmul.mubr.bf16.vlgmr.msra.gmra.mrb[0].mxu1 %v474_v50  ;;  %2697 = vmatprep.subr.bf16.mxu0 %v3002_v51  ;;  %v3055_v50 = vld [vmem:[%s3925_s1 + $0x230] sm:$0xff]  }
  0x25   :  { %2718 = vmatpush3.bf16.msra.mxu1 %v3001_v53  ;;  %1946 = vmatprep.mubr.bf16.mxu1 %v477_v55  ;;  %v493_v51 = vcombine.high %v485_v47, %v485_v47  ;;  %v3526_v52 = vrot.slane %v478_v48, %v3337_v41  ;;  %v3058_v53 = vld [vmem:[%s3925_s1 + $0x278] sm:$0xff]   ;;  %v3105_v45 = vld [vmem:[%s3925_s1 + $0x4d0] sm:$0xff]  }
  0x26   :  { %2719 = vmatprep.subr.bf16.mxu1 %v3004_v54  ;;  %v3057_v54 = vld [vmem:[%s3925_s1 + $0x2b0] sm:$0xff]  }
  0x27   :  { %2698 = vmatpush3.bf16.msra.mxu0 %v3003_v56  ;;  %v515_v55 = vrot.slane %v493_v51, %v3337_v41  ;;  %v494_v56 = vcombine.high %v3526_v52, %v3526_v52  ;;  %v3106_v48 = vld [vmem:[%s3925_s1 + $0x490] sm:$0xff]   ;;  %v3111_v51 = vld [vmem:[%s3925_s1 + $0x460] sm:$0xff]  }
  0x28   :  { %2699 = vmatprep.subr.bf16.mxu0 %v3006_v57  ;;  %v3060_v57 = vld [vmem:[%s3925_s1 + $0x2f8] sm:$0xff]  }
  0x29   :  { %2720 = vmatpush3.bf16.msra.mxu1 %v3005_v58  ;;  %v3059_v58 = vld [vmem:[%s3925_s1 + $0x238] sm:$0xff]  }
  0x2a   :  { %2721 = vmatprep.subr.bf16.mxu1 %v3008_v59  ;;  %v525_v59 = vcombine.high %v515_v55, %v515_v55 }
  0x2b   :  { %2700 = vmatpush3.bf16.msra.mxu0 %v3007_v60  ;;  %v501_v60 = vrot.slane %v485_v47, %v3337_v41  ;;  %v3107_v47 = vld [vmem:[%s3925_s1 + $0x458] sm:$0xff]  }
  0x2c   :  { %2701 = vmatprep.subr.bf16.mxu0 %v3010_v61  ;;  %v3062_v61 = vld [vmem:[%s3925_s1 + $0x340] sm:$0xff]  }
  0x2d   :  { %2722 = vmatpush3.bf16.msra.mxu1 %v3009_v62  ;;  %v3061_v62 = vld [vmem:[%s3925_s1 + $0x2b8] sm:$0xff]  }
  0x2e   :  { %2723 = vmatprep.subr.bf16.mxu1 %v3012_v63  ;;  %v522_v63 = vrot.slane %v494_v56, %v3337_v41  ;;  %v3114_v56 = vld [vmem:[%s3925_s1 + $0x4a0] sm:$0xff]  }
  0x2f   :  { %2702 = vmatpush3.bf16.msra.mxu0 %v3011_v0  ;;  %v3064_v0 = vld [vmem:[%s3925_s1 + $0x3c0] sm:$0xff]  }
  0x30   :  { %2703 = vmatprep.subr.bf16.mxu0 %v3014_v1  ;;  %v3063_v1 = vld [vmem:[%s3925_s1 + $0x300] sm:$0xff]  }
  0x31   :  { %2724 = vmatpush3.bf16.msra.mxu1 %v3013_v2  ;;  %v523_v2 = vcombine.high %v501_v60, %v501_v60 }
  0x32   :  { %2725 = vmatprep.subr.bf16.mxu1 %v3016_v3  ;;  %v3066_v3 = vld [vmem:[%s3925_s1 + $0x348] sm:$0xff]  }
  0x33   :  { %2704 = vmatpush3.bf16.msra.mxu0 %v3015_v4  ;;  %v3065_v4 = vld [vmem:[%s3925_s1 + $0x380] sm:$0xff]  }
  0x34   :  { %2705 = vmatprep.subr.bf16.mxu0 %v3018_v5  ;;  %v526_v5 = vcombine.high %v522_v63, %v522_v63 }
  0x35   :  { %2726 = vmatpush3.bf16.msra.mxu1 %v3017_v6  ;;  %v3068_v6 = vld [vmem:[%s3925_s1 + $0x3c8] sm:$0xff]  }
  0x36   :  { %2727 = vmatprep.subr.bf16.mxu1 %v3020_v7  ;;  %v3067_v7 = vld [vmem:[%s3925_s1 + $0x308] sm:$0xff]  }
  0x37   :  { %2706 = vmatpush3.bf16.msra.mxu0 %v3019_v8  ;;  %v3070_v8 = vld [vmem:[%s3925_s1 + $0x350] sm:$0xff]  }
  0x38   :  { %2707 = vmatprep.subr.bf16.mxu0 %v3022_v9  ;;  %v3069_v9 = vld [vmem:[%s3925_s1 + $0x388] sm:$0xff]  }
  0x39   :  { %2728 = vmatpush3.bf16.msra.mxu1 %v3021_v10  ;;  %v3072_v10 = vld [vmem:[%s3925_s1 + $0x3d0] sm:$0xff]  }
  0x3a   :  { %2729 = vmatprep.subr.bf16.mxu1 %v3024_v11  ;;  %v3071_v11 = vld [vmem:[%s3925_s1 + $0x310] sm:$0xff]  }
  0x3b   :  { %2708 = vmatpush3.bf16.msra.mxu0 %v3023_v12  ;;  %v3074_v12 = vld [vmem:[%s3925_s1 + $0x358] sm:$0xff]  }
  0x3c   :  { %2709 = vmatprep.subr.bf16.mxu0 %v3026_v13  ;;  %v3073_v13 = vld [vmem:[%s3925_s1 + $0x390] sm:$0xff]  }
  0x3d   :  { %2730 = vmatpush3.bf16.msra.mxu1 %v3025_v14  ;;  %v3076_v14 = vld [vmem:[%s3925_s1 + $0x3d8] sm:$0xff]  }
  0x3e   :  { %2731 = vmatprep.subr.bf16.mxu1 %v3028_v15  ;;  %v3075_v15 = vld [vmem:[%s3925_s1 + $0x318] sm:$0xff]  }
  0x3f   :  { %2710 = vmatpush3.bf16.msra.mxu0 %v3027_v16  ;;  %v3078_v16 = vld [vmem:[%s3925_s1 + $0x360] sm:$0xff]  }
  0x40   :  { %2739 = vmatprep.subr.bf16.mxu0 %v3030_v18  ;;  %v3080_v18 = vld [vmem:[%s3925_s1 + $0x3e0] sm:$0xff]  }
  0x41   :  { %2732 = vmatpush3.bf16.msra.mxu1 %v3029_v19  ;;  %v3079_v19 = vld [vmem:[%s3925_s1 + $0x320] sm:$0xff]  }
  0x42   :  { %1907 = vmatmul.mubr.bf16.vlgmr.msra.gmra.mrb[4].mxu0 %v459_v17  ;;  %2761 = vmatprep.subr.bf16.mxu1 %v3032_v20  ;;  %v3077_v17 = vld [vmem:[%s3925_s1 + $0x398] sm:$0xff]   ;;  %v3082_v20 = vld [vmem:[%s3925_s1 + $0x368] sm:$0xff]  }
  0x43   :  { %2740 = vmatpush3.bf16.msra.mxu0 %v3031_v21  ;;  %1986 = vmatprep.mubr.bf16.mxu0 %v515_v55  ;;  %v3081_v21 = vld [vmem:[%s3925_s1 + $0x3a0] sm:$0xff]   ;;  %v3115_v55 = vld [vmem:[%s3925_s1 + $0x468] sm:$0xff]  }
  0x44   :  { %1947 = vmatmul.mubr.bf16.vlgmr.msra.gmra.mrb[4].mxu1 %v475_v22  ;;  %2741 = vmatprep.subr.bf16.mxu0 %v3034_v23  ;;  %v3084_v22 = vld [vmem:[%s3925_s1 + $0x3e8] sm:$0xff]  }
  0x45   :  { %2762 = vmatpush3.bf16.msra.mxu1 %v3033_v24  ;;  %2026 = vmatprep.mubr.bf16.mxu1 %v525_v59  ;;  %v3083_v23 = vld [vmem:[%s3925_s1 + $0x328] sm:$0xff]   ;;  %v3086_v24 = vld [vmem:[%s3925_s1 + $0x370] sm:$0xff]  }
  0x46   :  { %2763 = vmatprep.subr.bf16.mxu1 %v3036_v25  ;;  %v3085_v25 = vld [vmem:[%s3925_s1 + $0x3a8] sm:$0xff]   ;;  %v3119_v59 = vld [vmem:[%s3925_s1 + $0x470] sm:$0xff]  }
  0x47   :  { %2742 = vmatpush3.bf16.msra.mxu0 %v3035_v26  ;;  %v3088_v26 = vld [vmem:[%s3925_s1 + $0x3f0] sm:$0xff]  }
  0x48   :  { %2743 = vmatprep.subr.bf16.mxu0 %v3038_v27  ;;  %v3087_v27 = vld [vmem:[%s3925_s1 + $0x330] sm:$0xff]  }
  0x49   :  { %2764 = vmatpush3.bf16.msra.mxu1 %v3037_v28  ;;  %v3090_v28 = vld [vmem:[%s3925_s1 + $0x378] sm:$0xff]  }
  0x4a   :  { %2765 = vmatprep.subr.bf16.mxu1 %v3040_v29  ;;  %v3089_v29 = vld [vmem:[%s3925_s1 + $0x3b0] sm:$0xff]  }
  0x4b   :  { %2744 = vmatpush3.bf16.msra.mxu0 %v3039_v30  ;;  %v3092_v30 = vld [vmem:[%s3925_s1 + $0x3f8] sm:$0xff]  }
  0x4c   :  { %2745 = vmatprep.subr.bf16.mxu0 %v3042_v31  ;;  %v3091_v31 = vld [vmem:[%s3925_s1 + $0x338] sm:$0xff]  }
  0x4d   :  { %2766 = vmatpush3.bf16.msra.mxu1 %v3041_v32  ;;  %v508_v32 = vrot.slane %v3526_v52, %v3337_v41  ;;  %v3110_v52 = vld [vmem:[%s3925_s1 + $0x498] sm:$0xff]  }
  0x4e   :  { %2767 = vmatprep.subr.bf16.mxu1 %v3044_v33  ;;  %v3095_v33 = vld [vmem:[%s3925_s1 + $0x440] sm:$0xff]  }
  0x4f   :  { %2746 = vmatpush3.bf16.msra.mxu0 %v3043_v34  ;;  %v3094_v34 = vld [vmem:[%s3925_s1 + $0x3b8] sm:$0xff]  }
  0x50   :  { %2747 = vmatprep.subr.bf16.mxu0 %v3046_v35  ;;  %v3097_v35 = vld [vmem:[%s3925_s1 + $0x4c0] sm:$0xff]  }
  0x51   :  { %2768 = vmatpush3.bf16.msra.mxu1 %v3045_v36  ;;  %v3096_v36 = vld [vmem:[%s3925_s1 + $0x400] sm:$0xff]  }
  0x52   :  { %2769 = vmatprep.subr.bf16.mxu1 %v3048_v37  ;;  %v524_v37 = vcombine.high %v508_v32, %v508_v32 }
  0x53   :  { %2748 = vmatpush3.bf16.msra.mxu0 %v3047_v38  ;;  %v3099_v38 = vld [vmem:[%s3925_s1 + $0x448] sm:$0xff]  }
  0x54   :  { %2749 = vmatprep.subr.bf16.mxu0 %v3050_v39  ;;  %v3098_v39 = vld [vmem:[%s3925_s1 + $0x480] sm:$0xff]  }
  0x55   :  { %2770 = vmatpush3.bf16.msra.mxu1 %v3049_v40  ;;  %v3101_v40 = vld [vmem:[%s3925_s1 + $0x4c8] sm:$0xff]  }
  0x56   :  { %2771 = vmatprep.subr.bf16.mxu1 %v3052_v42  ;;  %v3100_v42 = vld [vmem:[%s3925_s1 + $0x408] sm:$0xff]  }
  0x57   :  { %2750 = vmatpush3.bf16.msra.mxu0 %v3051_v43  ;;  %v3103_v43 = vld [vmem:[%s3925_s1 + $0x450] sm:$0xff]  }
  0x58   :  { %2751 = vmatprep.subr.bf16.mxu0 %v3054_v44  ;;  %v3102_v44 = vld [vmem:[%s3925_s1 + $0x488] sm:$0xff]  }
  0x59   :  { %2772 = vmatpush3.bf16.msra.mxu1 %v3053_v46  ;;  %v3104_v46 = vld [vmem:[%s3925_s1 + $0x410] sm:$0xff]  }
  0x5a   :  { %2773 = vmatprep.subr.bf16.mxu1 %v3056_v49  ;;  %v3109_v49 = vld [vmem:[%s3925_s1 + $0x4d8] sm:$0xff]  }
  0x5b   :  { %2752 = vmatpush3.bf16.msra.mxu0 %v3055_v50  ;;  %v3108_v50 = vld [vmem:[%s3925_s1 + $0x418] sm:$0xff]  }
  0x5c   :  { %2753 = vmatprep.subr.bf16.mxu0 %v3058_v53  ;;  %v3113_v53 = vld [vmem:[%s3925_s1 + $0x4e0] sm:$0xff]  }
  0x5d   :  { %2774 = vmatpush3.bf16.msra.mxu1 %v3057_v54  ;;  %v3112_v54 = vld [vmem:[%s3925_s1 + $0x420] sm:$0xff]  }
  0x5e   :  { %2775 = vmatprep.subr.bf16.mxu1 %v3060_v57  ;;  %v3117_v57 = vld [vmem:[%s3925_s1 + $0x4e8] sm:$0xff]  }
  0x5f   :  { %2754 = vmatpush3.bf16.msra.mxu0 %v3059_v58  ;;  %v3116_v58 = vld [vmem:[%s3925_s1 + $0x428] sm:$0xff]  }
  0x60   :  { %2783 = vmatprep.subr.bf16.mxu0 %v3062_v61  ;;  %v3118_v61 = vld [vmem:[%s3925_s1 + $0x4a8] sm:$0xff]  }
  0x61   :  { %2776 = vmatpush3.bf16.msra.mxu1 %v3061_v62 }
  0x62   :  { %1987 = vmatmul.mubr.bf16.vlgmr.msra.gmra.mrb[8].mxu0 %v501_v60  ;;  %2805 = vmatprep.subr.bf16.mxu1 %v3064_v0  ;;  %v24_v60 = vld [vmem:[%s3924_s0 + $0x10] sm:$0xff] }
  0x63   :  { %2784 = vmatpush3.bf16.msra.mxu0 %v3063_v1  ;;  %2066 = vmatprep.mubr.bf16.mxu0 %v522_v63  ;;  %v534_v62 = vrot.slane %v24_v60, %v3337_v41  ;;  %v527_v63 = vcombine.high %v24_v60, %v24_v60  ;;  %v3121_v0 = vld [vmem:[%s3925_s1 + $0x4f0] sm:$0xff]  }
  0x64   :  { %2027 = vmatmul.mubr.bf16.vlgmr.msra.gmra.mrb[8].mxu1 %v523_v2  ;;  %2785 = vmatprep.subr.bf16.mxu0 %v3066_v3  ;;  %v3120_v1 = vld [vmem:[%s3925_s1 + $0x430] sm:$0xff]  }
  0x65   :  { %2806 = vmatpush3.bf16.msra.mxu1 %v3065_v4  ;;  %2106 = vmatprep.mubr.bf16.mxu1 %v526_v5  ;;  %v542_v2 = vcombine.high %v534_v62, %v534_v62  ;;  %v3732_v3 = vrot.slane %v527_v63, %v3337_v41  ;;  %v3123_v4 = vld [vmem:[%s3925_s1 + $0x478] sm:$0xff]   ;;  %v3122_v5 = vld [vmem:[%s3925_s1 + $0x4b0] sm:$0xff]  }
  0x66   :  { %2807 = vmatprep.subr.bf16.mxu1 %v3068_v6 }
  0x67   :  { %2786 = vmatpush3.bf16.msra.mxu0 %v3067_v7  ;;  %v564_v6 = vrot.slane %v542_v2, %v3337_v41  ;;  %v543_v7 = vcombine.high %v3732_v3, %v3732_v3 }
  0x68   :  { %2787 = vmatprep.subr.bf16.mxu0 %v3070_v8  ;;  %v3125_v8 = vld [vmem:[%s3925_s1 + $0x4f8] sm:$0xff]  }
  0x69   :  { %2808 = vmatpush3.bf16.msra.mxu1 %v3069_v9  ;;  %v3124_v9 = vld [vmem:[%s3925_s1 + $0x438] sm:$0xff]  }
  0x6a   :  { %2809 = vmatprep.subr.bf16.mxu1 %v3072_v10  ;;  %v574_v10 = vcombine.high %v564_v6, %v564_v6 }
  0x6b   :  { %2788 = vmatpush3.bf16.msra.mxu0 %v3071_v11  ;;  %v550_v11 = vrot.slane %v534_v62, %v3337_v41 }
  0x6c   :  { %2789 = vmatprep.subr.bf16.mxu0 %v3074_v12  ;;  %v3127_v12 = vld [vmem:[%s3925_s1 + $0x540] sm:$0xff]  }
  0x6d   :  { %2810 = vmatpush3.bf16.msra.mxu1 %v3073_v13  ;;  %v3126_v13 = vld [vmem:[%s3925_s1 + $0x4b8] sm:$0xff]  }
  0x6e   :  { %2811 = vmatprep.subr.bf16.mxu1 %v3076_v14  ;;  %v571_v14 = vrot.slane %v543_v7, %v3337_v41 }
  0x6f   :  { %2790 = vmatpush3.bf16.msra.mxu0 %v3075_v15  ;;  %v3129_v15 = vld [vmem:[%s3925_s1 + $0x5c0] sm:$0xff]  }
  0x70   :  { %2791 = vmatprep.subr.bf16.mxu0 %v3078_v16  ;;  %v3128_v16 = vld [vmem:[%s3925_s1 + $0x500] sm:$0xff]  }
  0x71   :  { %2812 = vmatpush3.bf16.msra.mxu1 %v3077_v17  ;;  %v572_v17 = vcombine.high %v550_v11, %v550_v11 }
  0x72   :  { %2813 = vmatprep.subr.bf16.mxu1 %v3080_v18  ;;  %v3131_v18 = vld [vmem:[%s3925_s1 + $0x548] sm:$0xff]  }
  0x73   :  { %2792 = vmatpush3.bf16.msra.mxu0 %v3079_v19  ;;  %v3130_v19 = vld [vmem:[%s3925_s1 + $0x580] sm:$0xff]  }
  0x74   :  { %2793 = vmatprep.subr.bf16.mxu0 %v3082_v20  ;;  %v575_v20 = vcombine.high %v571_v14, %v571_v14 }
  0x75   :  { %2814 = vmatpush3.bf16.msra.mxu1 %v3081_v21  ;;  %v3133_v21 = vld [vmem:[%s3925_s1 + $0x5c8] sm:$0xff]  }
  0x76   :  { %2815 = vmatprep.subr.bf16.mxu1 %v3084_v22  ;;  %v3132_v22 = vld [vmem:[%s3925_s1 + $0x508] sm:$0xff]  }
  0x77   :  { %2794 = vmatpush3.bf16.msra.mxu0 %v3083_v23  ;;  %v3135_v23 = vld [vmem:[%s3925_s1 + $0x550] sm:$0xff]  }
  0x78   :  { %2795 = vmatprep.subr.bf16.mxu0 %v3086_v24  ;;  %v3134_v24 = vld [vmem:[%s3925_s1 + $0x588] sm:$0xff]  }
  0x79   :  { %2816 = vmatpush3.bf16.msra.mxu1 %v3085_v25  ;;  %v3137_v25 = vld [vmem:[%s3925_s1 + $0x5d0] sm:$0xff]  }
  0x7a   :  { %2817 = vmatprep.subr.bf16.mxu1 %v3088_v26  ;;  %v3136_v26 = vld [vmem:[%s3925_s1 + $0x510] sm:$0xff]  }
  0x7b   :  { %2796 = vmatpush3.bf16.msra.mxu0 %v3087_v27  ;;  %v3139_v27 = vld [vmem:[%s3925_s1 + $0x558] sm:$0xff]  }
  0x7c   :  { %2797 = vmatprep.subr.bf16.mxu0 %v3090_v28  ;;  %v3138_v28 = vld [vmem:[%s3925_s1 + $0x590] sm:$0xff]  }
  0x7d   :  { %2818 = vmatpush3.bf16.msra.mxu1 %v3089_v29  ;;  %v3141_v29 = vld [vmem:[%s3925_s1 + $0x5d8] sm:$0xff]  }
  0x7e   :  { %2819 = vmatprep.subr.bf16.mxu1 %v3092_v30  ;;  %v3140_v30 = vld [vmem:[%s3925_s1 + $0x518] sm:$0xff]  }
  0x7f   :  { %2798 = vmatpush3.bf16.msra.mxu0 %v3091_v31  ;;  %v3143_v31 = vld [vmem:[%s3925_s1 + $0x560] sm:$0xff]  }
  0x80   :  { %2827 = vmatprep.subr.bf16.mxu0 %v3095_v33  ;;  %v3145_v33 = vld [vmem:[%s3925_s1 + $0x5e0] sm:$0xff]  }
  0x81   :  { %2820 = vmatpush3.bf16.msra.mxu1 %v3094_v34  ;;  %v3144_v34 = vld [vmem:[%s3925_s1 + $0x520] sm:$0xff]  }
  0x82   :  { %2067 = vmatmul.mubr.bf16.vlgmr.msra.gmra.mrb[12].mxu0 %v508_v32  ;;  %2849 = vmatprep.subr.bf16.mxu1 %v3097_v35  ;;  %v3142_v32 = vld [vmem:[%s3925_s1 + $0x598] sm:$0xff]   ;;  %v3147_v35 = vld [vmem:[%s3925_s1 + $0x568] sm:$0xff]  }
  0x83   :  { %2828 = vmatpush3.bf16.msra.mxu0 %v3096_v36  ;;  %2146 = vmatprep.mubr.bf16.mxu0 %v564_v6  ;;  %v3146_v36 = vld [vmem:[%s3925_s1 + $0x5a0] sm:$0xff]  }
  0x84   :  { %2107 = vmatmul.mubr.bf16.vlgmr.msra.gmra.mrb[12].mxu1 %v524_v37  ;;  %2829 = vmatprep.subr.bf16.mxu0 %v3099_v38  ;;  %v3149_v37 = vld [vmem:[%s3925_s1 + $0x5e8] sm:$0xff]  }
  0x85   :  { %2850 = vmatpush3.bf16.msra.mxu1 %v3098_v39  ;;  %2186 = vmatprep.mubr.bf16.mxu1 %v574_v10  ;;  %v3148_v38 = vld [vmem:[%s3925_s1 + $0x528] sm:$0xff]   ;;  %v3151_v39 = vld [vmem:[%s3925_s1 + $0x570] sm:$0xff]  }
  0x86   :  { %2851 = vmatprep.subr.bf16.mxu1 %v3101_v40  ;;  %v3150_v40 = vld [vmem:[%s3925_s1 + $0x5a8] sm:$0xff]  }
  0x87   :  { %2830 = vmatpush3.bf16.msra.mxu0 %v3100_v42  ;;  %v3153_v42 = vld [vmem:[%s3925_s1 + $0x5f0] sm:$0xff]  }
  0x88   :  { %2831 = vmatprep.subr.bf16.mxu0 %v3103_v43  ;;  %v3152_v43 = vld [vmem:[%s3925_s1 + $0x530] sm:$0xff]  }
  0x89   :  { %2852 = vmatpush3.bf16.msra.mxu1 %v3102_v44  ;;  %v3155_v44 = vld [vmem:[%s3925_s1 + $0x578] sm:$0xff]  }
  0x8a   :  { %2853 = vmatprep.subr.bf16.mxu1 %v3105_v45  ;;  %v3154_v45 = vld [vmem:[%s3925_s1 + $0x5b0] sm:$0xff]  }
  0x8b   :  { %2832 = vmatpush3.bf16.msra.mxu0 %v3104_v46  ;;  %v3156_v46 = vld [vmem:[%s3925_s1 + $0x538] sm:$0xff]  }
  0x8c   :  { %2833 = vmatprep.subr.bf16.mxu0 %v3107_v47  ;;  %v3157_v47 = vld [vmem:[%s3925_s1 + $0x5f8] sm:$0xff]  }
  0x8d   :  { %2854 = vmatpush3.bf16.msra.mxu1 %v3106_v48  ;;  %v3159_v48 = vld [vmem:[%s3925_s1 + $0x5b8] sm:$0xff]  }
  0x8e   :  { %2855 = vmatprep.subr.bf16.mxu1 %v3109_v49  ;;  %v557_v49 = vrot.slane %v3732_v3, %v3337_v41 }
  0x8f   :  { %2834 = vmatpush3.bf16.msra.mxu0 %v3108_v50  ;;  %v3160_v50 = vld [vmem:[%s3925_s1 + $0x600] sm:$0xff]  }
  0x90   :  { %2835 = vmatprep.subr.bf16.mxu0 %v3111_v51  ;;  %v3199_v51 = vmov 0.0  }
  0x91   :  { %2856 = vmatpush3.bf16.msra.mxu1 %v3110_v52  ;;  %v573_v52 = vcombine.high %v557_v49, %v557_v49 }
  0x92   :  { %2857 = vmatprep.subr.bf16.mxu1 %v3113_v53 }
  0x93   :  { %2836 = vmatpush3.bf16.msra.mxu0 %v3112_v54 }
  0x94   :  { %2837 = vmatprep.subr.bf16.mxu0 %v3115_v55 }
  0x95   :  { %2858 = vmatpush3.bf16.msra.mxu1 %v3114_v56 }
  0x96   :  { %2859 = vmatprep.subr.bf16.mxu1 %v3117_v57 }
  0x97   :  { %2838 = vmatpush3.bf16.msra.mxu0 %v3116_v58 }
  0x98   :  { %2839 = vmatprep.subr.bf16.mxu0 %v3119_v59 }
  0x99   :  { %2860 = vmatpush3.bf16.msra.mxu1 %v3118_v61 }
  0x9a   :  { %2861 = vmatprep.subr.bf16.mxu1 %v3121_v0 }
  0x9b   :  { %2840 = vmatpush3.bf16.msra.mxu0 %v3120_v1 }
  0x9c   :  { %2841 = vmatprep.subr.bf16.mxu0 %v3123_v4 }
  0x9d   :  { %2862 = vmatpush3.bf16.msra.mxu1 %v3122_v5 }
  0x9e   :  { %2863 = vmatprep.subr.bf16.mxu1 %v3125_v8 }
  0x9f   :  { %2842 = vmatpush3.bf16.msra.mxu0 %v3124_v9 }
  0xa0   :  { %2871 = vmatprep.subr.bf16.mxu0 %v3127_v12 }
  0xa1   :  { %2864 = vmatpush3.bf16.msra.mxu1 %v3126_v13 }
  0xa2   :  { %2147 = vmatmul.mubr.bf16.vlgmr.msra.gmra.mrb[16].mxu0 %v550_v11  ;;  %2893 = vmatprep.subr.bf16.mxu1 %v3129_v15 }
  0xa3   :  { %2872 = vmatpush3.bf16.msra.mxu0 %v3128_v16  ;;  %2226 = vmatprep.mubr.bf16.mxu0 %v571_v14 }
  0xa4   :  { %2187 = vmatmul.mubr.bf16.vlgmr.msra.gmra.mrb[16].mxu1 %v572_v17  ;;  %2873 = vmatprep.subr.bf16.mxu0 %v3131_v18 }
  0xa5   :  { %2894 = vmatpush3.bf16.msra.mxu1 %v3130_v19  ;;  %2266 = vmatprep.mubr.bf16.mxu1 %v575_v20 }
  0xa6   :  { %2895 = vmatprep.subr.bf16.mxu1 %v3133_v21 }
  0xa7   :  { %2874 = vmatpush3.bf16.msra.mxu0 %v3132_v22 }
  0xa8   :  { %2875 = vmatprep.subr.bf16.mxu0 %v3135_v23 }
  0xa9   :  { %2896 = vmatpush3.bf16.msra.mxu1 %v3134_v24 }
  0xaa   :  { %2897 = vmatprep.subr.bf16.mxu1 %v3137_v25 }
  0xab   :  { %2876 = vmatpush3.bf16.msra.mxu0 %v3136_v26 }
  0xac   :  { %2877 = vmatprep.subr.bf16.mxu0 %v3139_v27 }
  0xad   :  { %2898 = vmatpush3.bf16.msra.mxu1 %v3138_v28 }
  0xae   :  { %2899 = vmatprep.subr.bf16.mxu1 %v3141_v29 }
  0xaf   :  { %2878 = vmatpush3.bf16.msra.mxu0 %v3140_v30 }
  0xb0   :  { %2879 = vmatprep.subr.bf16.mxu0 %v3143_v31 }
  0xb1   :  { %2900 = vmatpush3.bf16.msra.mxu1 %v3142_v32 }
  0xb2   :  { %2901 = vmatprep.subr.bf16.mxu1 %v3145_v33 }
  0xb3   :  { %2880 = vmatpush3.bf16.msra.mxu0 %v3144_v34 }
  0xb4   :  { %2881 = vmatprep.subr.bf16.mxu0 %v3147_v35 }
  0xb5   :  { %2902 = vmatpush3.bf16.msra.mxu1 %v3146_v36 }
  0xb6   :  { %2903 = vmatprep.subr.bf16.mxu1 %v3149_v37 }
  0xb7   :  { %2882 = vmatpush3.bf16.msra.mxu0 %v3148_v38 }
  0xb8   :  { %2883 = vmatprep.subr.bf16.mxu0 %v3151_v39 }
  0xb9   :  { %2904 = vmatpush3.bf16.msra.mxu1 %v3150_v40 }
  0xba   :  { %2905 = vmatprep.subr.bf16.mxu1 %v3153_v42 }
  0xbb   :  { %2884 = vmatpush3.bf16.msra.mxu0 %v3152_v43 }
  0xbc   :  { %2885 = vmatprep.subr.bf16.mxu0 %v3155_v44 }
  0xbd   :  { %2906 = vmatpush3.bf16.msra.mxu1 %v3154_v45 }
  0xbe   :  { %2907 = vmatprep.subr.bf16.mxu1 %v3157_v47 }
  0xbf   :  { %2886 = vmatpush3.bf16.msra.mxu0 %v3156_v46 }
  0xc0   :  { %2929 = vmatprep.subr.bf16.mxu0 %v3199_v51 }
  0xc1   :  { %10 = vsyncpa [#allocation3], 0  ;;  %2908 = vmatpush3.bf16.msra.mxu1 %v3159_v48  ;;  %v3161_v53 = vld [vmem:[%s3925_s1 + $0x608] sm:$0xff]   ;;  %vm3200_vm0 = vmmov 0   ;;  %v3162_v54 = vld [vmem:[%s3925_s1 + $0x610] sm:$0xff]   ;;  %vm1790_vm1 = vcmask 523264  }
  0xc2   :  { %2227 = vmatmul.mubr.bf16.vlgmr.msra.gmra.mrb[20].mxu0 %v557_v49  ;;  %2941 = vmatprep.subr.bf16.mxu1 %v3199_v51  ;;  %v3163_v55 = vld [vmem:[%s3925_s1 + $0x618] sm:$0xff]   ;;  %v2443_v59 = vld [vmem:[%s3926_s2] ss:$0 sm:$0xff]  ;;  %v3165_v14 = vld [vmem:[%s3927_s3 + $0x8] sm:$0xff]   ;;  %s3201_s9 = smov [#allocation2]   ;;  %vm2427_vm2 = vcmask 58368  }
  0xc3   :  { %2930 = vmatpush3.bf16.msra.mxu0 %v3160_v50  ;;  %2937 = vmatprep.mubr.msk.bf16.mxu0 %vm3200_vm0, %v3199_v51  ;;  %v2444_v56 = vld.sshfl [vmem:[%s3924_s0 + $0x18] sm:$0x1 pattern:$0x75316420]  ;;  %v3166_v19 = vld [vmem:[%s3927_s3 + $0x10] sm:$0xff]   ;;  %v3168_v22 = vld [vmem:[%s3927_s3 + $0x20] sm:$0xff]  }
  0xc4   :  { %2267 = vmatmul.mubr.bf16.vlgmr.msra.gmra.mrb[20].mxu1 %v573_v52  ;;  %2931 = vmatprep.subr.bf16.mxu0 %v3199_v51  ;;  %v589_v57 = vrot.slane %v2444_v56, %v3337_v41  ;;  %v3164_v41 = vld [vmem:[%s3927_s3] sm:$0xff]   ;;  %v3167_v21 = vld [vmem:[%s3927_s3 + $0x18] sm:$0xff]   ;;  %v3169_v23 = vld [vmem:[%s3927_s3 + $0x28] sm:$0xff]   ;;  %s2435_s10 = sshll.u32 %s3201_s9, 4  ;;  %s2436_s10 = int_to_ptr.vmem [resolvable:$true] %s2435_s10 }
  0xc5   :  { %2957 = vmatprep.mubr.msk.bf16.mxu1 %vm3200_vm0, %v3199_v51  ;;  %2942 = vmatpush3.bf16.msra.mxu1 %v3164_v41  ;;  %v3170_v24 = vld [vmem:[%s3927_s3 + $0x30] sm:$0xff]   ;;  %v3171_v25 = vld [vmem:[%s3927_s3 + $0x38] sm:$0xff]   ;;  %s3174_s11 = scalar_lea.vmem %s2436_s10, 32  ;;  %p3179_p1 = scmp.lt.s32.totalorder %s2436_s10, %s2436_s10 }
  0xc6   :  { %2943 = vmatprep.subr.bf16.mxu1 %v3199_v51  ;;  %p3175_p0 = scmp.ne.s32.totalorder %s2436_s10, %s3174_s11  ;;  %p3180_p2 = scmp.lt.s32.totalorder %s3174_s11, %s3174_s11 }
  0xc7   :  { %2932 = vmatpush3.bf16.msra.mxu0 %v3161_v53 }
  0xc8   :  { %2933 = vmatprep.subr.bf16.mxu0 %v3199_v51  ;;  %p3181_p3 = por %p3180_p2, %p3179_p1 }
  0xc9   :  { %2944 = vmatpush3.bf16.msra.mxu1 %v3165_v14 }
  0xca   :  { %2945 = vmatprep.subr.bf16.mxu1 %v3199_v51  ;;  %p3182_p4 = pnand %p3181_p3, %p3175_p0 }
  0xcb   :  { %2934 = vmatpush3.bf16.msra.mxu0 %v3162_v54 }
  0xcc   :  { %2935 = vmatprep.subr.bf16.mxu0 %v3199_v51 }
  0xcd   :  { %2946 = vmatpush3.bf16.msra.mxu1 %v3166_v19 }
  0xce   :  { %2947 = vmatprep.subr.bf16.mxu1 %v3199_v51 }
  0xcf   :  { %2936 = vmatpush3.bf16.msra.mxu0 %v3163_v55 }
  0xd1   :  { %2948 = vmatpush3.bf16.msra.mxu1 %v3167_v21 }
  0xd2   :  { %2938 = vmatmul.mubr.msk.bf16.vlgmr.msra.gmra.mrb[24].mxu0 %vm1790_vm1, %v589_v57  ;;  %2949 = vmatprep.subr.bf16.mxu1 %v3199_v51 }
  0xd5   :  { %2950 = vmatpush3.bf16.msra.mxu1 %v3168_v22 }
  0xd6   :  { %2951 = vmatprep.subr.bf16.mxu1 %v3199_v51 }
  0xd9   :  { %2952 = vmatpush3.bf16.msra.mxu1 %v3169_v23 }
  0xda   :  { %2953 = vmatprep.subr.bf16.mxu1 %v3199_v51 }
  0xdd   :  { %2954 = vmatpush3.bf16.msra.mxu1 %v3170_v24 }
  0xde   :  { %2955 = vmatprep.subr.bf16.mxu1 %v3199_v51 }
  0xe1   :  { %2956 = vmatpush3.bf16.msra.mxu1 %v3171_v25 }
  0xf5   :  { %v2667_v58 = vpop.f32.mrb[0].mxu0 }
  0xf6   :  { %v2668_v60 = vpop.f32.mrb[1].mxu0 }
  0xf7   :  { %v2669_v61 = vadd.f32 %v2668_v60, %v2667_v58  ;;  %v2670_v62 = vpop.f32.mrb[2].mxu0  ;;  %v2689_v63 = vpop.f32.mrb[0].mxu1 }
  0xf8   :  { %v2671_v0 = vpop.f32.mrb[3].mxu0  ;;  %v2690_v1 = vpop.f32.mrb[1].mxu1 }
  0xf9   :  { %v1829_v2 = vadd.f32 %v2669_v61, %v2443_v59  ;;  %v2691_v3 = vadd.f32 %v2690_v1, %v2689_v63  ;;  %v2692_v4 = vpop.f32.mrb[2].mxu1 }
  0xfa   :  { %v2693_v5 = vpop.f32.mrb[3].mxu1 }
  0xfb   :  { %v1869_v6 = vadd.f32 %v2691_v3, %v1829_v2 }
 0x115   :  { %v2711_v7 = vpop.f32.mrb[4].mxu0 }
 0x116   :  { %v2712_v8 = vpop.f32.mrb[5].mxu0 }
 0x117   :  { %v2713_v9 = vadd.f32 %v2712_v8, %v2711_v7  ;;  %v2714_v10 = vpop.f32.mrb[6].mxu0  ;;  %v2733_v11 = vpop.f32.mrb[4].mxu1 }
 0x118   :  { %v2715_v12 = vpop.f32.mrb[7].mxu0  ;;  %v2734_v13 = vpop.f32.mrb[5].mxu1 }
 0x119   :  { %v1909_v15 = vadd.f32 %v2713_v9, %v1869_v6  ;;  %v2735_v16 = vadd.f32 %v2734_v13, %v2733_v11  ;;  %v2736_v17 = vpop.f32.mrb[6].mxu1 }
 0x11a   :  { %v2737_v18 = vpop.f32.mrb[7].mxu1  ;;  %v2642_v17 = vld [vmem:[%s3928_s4] ss:$0 sm:$0xff] }
 0x11b   :  { %v1949_v20 = vadd.f32 %v2735_v16, %v1909_v15 }
 0x135   :  { %v2755_v26 = vpop.f32.mrb[8].mxu0 }
 0x136   :  { %v2756_v27 = vpop.f32.mrb[9].mxu0 }
 0x137   :  { %v2757_v28 = vadd.f32 %v2756_v27, %v2755_v26  ;;  %v2758_v29 = vpop.f32.mrb[10].mxu0  ;;  %v2777_v30 = vpop.f32.mrb[8].mxu1 }
 0x138   :  { %v2759_v31 = vpop.f32.mrb[11].mxu0  ;;  %v2778_v32 = vpop.f32.mrb[9].mxu1 }
 0x139   :  { %v1989_v33 = vadd.f32 %v2757_v28, %v1949_v20  ;;  %v2779_v34 = vadd.f32 %v2778_v32, %v2777_v30  ;;  %v2780_v35 = vpop.f32.mrb[10].mxu1 }
 0x13a   :  { %v2781_v36 = vpop.f32.mrb[11].mxu1 }
 0x13b   :  { %v2029_v37 = vadd.f32 %v2779_v34, %v1989_v33 }
 0x155   :  { %v2799_v38 = vpop.f32.mrb[12].mxu0 }
 0x156   :  { %v2800_v39 = vpop.f32.mrb[13].mxu0 }
 0x157   :  { %v2801_v40 = vadd.f32 %v2800_v39, %v2799_v38  ;;  %v2802_v42 = vpop.f32.mrb[14].mxu0  ;;  %v2821_v43 = vpop.f32.mrb[12].mxu1 }
 0x158   :  { %v2803_v44 = vpop.f32.mrb[15].mxu0  ;;  %v2822_v45 = vpop.f32.mrb[13].mxu1 }
 0x159   :  { %v2069_v46 = vadd.f32 %v2801_v40, %v2029_v37  ;;  %v2823_v47 = vadd.f32 %v2822_v45, %v2821_v43  ;;  %v2824_v48 = vpop.f32.mrb[14].mxu1 }
 0x15a   :  { %v2825_v49 = vpop.f32.mrb[15].mxu1 }
 0x15b   :  { %v2109_v50 = vadd.f32 %v2823_v47, %v2069_v46 }
 0x175   :  { %v2843_v51 = vpop.f32.mrb[16].mxu0 }
 0x176   :  { %v2844_v52 = vpop.f32.mrb[17].mxu0 }
 0x177   :  { %v2845_v53 = vadd.f32 %v2844_v52, %v2843_v51  ;;  %v2846_v54 = vpop.f32.mrb[18].mxu0  ;;  %v2865_v55 = vpop.f32.mrb[16].mxu1 }
 0x178   :  { %v2847_v56 = vpop.f32.mrb[19].mxu0  ;;  %v2866_v57 = vpop.f32.mrb[17].mxu1 }
 0x179   :  { %v2149_v58 = vadd.f32 %v2845_v53, %v2109_v50  ;;  %v2867_v59 = vadd.f32 %v2866_v57, %v2865_v55  ;;  %v2868_v60 = vpop.f32.mrb[18].mxu1 }
 0x17a   :  { %v2869_v61 = vpop.f32.mrb[19].mxu1 }
 0x17b   :  { %v2189_v62 = vadd.f32 %v2867_v59, %v2149_v58 }
 0x195   :  { %v2887_v63 = vpop.f32.mrb[20].mxu0 }
 0x196   :  { %v2888_v0 = vpop.f32.mrb[21].mxu0 }
 0x197   :  { %v2889_v1 = vadd.f32 %v2888_v0, %v2887_v63  ;;  %v2890_v2 = vpop.f32.mrb[22].mxu0  ;;  %v2909_v3 = vpop.f32.mrb[20].mxu1 }
 0x198   :  { %v2891_v4 = vpop.f32.mrb[23].mxu0  ;;  %v2910_v5 = vpop.f32.mrb[21].mxu1 }
 0x199   :  { %v2229_v6 = vadd.f32 %v2889_v1, %v2189_v62  ;;  %v2911_v41 = vadd.f32 %v2910_v5, %v2909_v3  ;;  %v2912_v7 = vpop.f32.mrb[22].mxu1 }
 0x19a   :  { %v2913_v8 = vpop.f32.mrb[23].mxu1 }
 0x19b   :  { %v2269_v9 = vadd.f32 %v2911_v41, %v2229_v6 }
 0x1a5   :  { %v2308_v10 = vpop.f32.mrb[24].mxu0 }
 0x1a6   :  { %v2309_v11 = vadd.f32 %v2308_v10, %v2269_v9  ;;  %v2939_v12 = vpop.f32.mrb[25].mxu0 }
 0x1a7   :  { %v2311_v13 = vpop.f32.mrb[26].mxu0 }
 0x1a8   :  { %3172 = vtanh.f32 %v2309_v11  ;;  %v2940_v14 = vpop.f32.mrb[27].mxu0 }
 0x1b2   :  { %v3173_v15 = vpop.eup %3172 }
 0x1b3   :  { %v2315_v16 = vpack.c.bf16 %v3173_v15, %v3173_v15 }
 0x1b5   :  { %2958 = vmatmul.mubr.bf16.vlgmr.msra.gmra.mrb[24].mxu1 %v2315_v16 }
 0x288   :  { %v2421_v18 = vpop.f32.mrb[24].mxu1 }
 0x289   :  { %v2422_v19 = vadd.f32 %v2642_v17, %v2421_v18  ;;  %v2959_v20 = vpop.f32.mrb[25].mxu1 }
 0x28a   :  { %v2424_v21 = vpop.f32.mrb[26].mxu1 }
 0x28b   :  { %v2960_v22 = vpop.f32.mrb[27].mxu1  ;;  %2428 = vst.msk [vmem:[#allocation2] sm:$0x3] %vm2427_vm2, %v2422_v19 }
 0x28c   :  { %3185 = shalt.err (!%p3182_p4)
}
 0x28d   :  { %s3186_s4 = scalar_lea.hbm %s3929_s5, 32 }
 0x28e   :  { %p3187_p5 = scmp.ne.s32.totalorder %s3929_s5, %s3186_s4  ;;  %p3190_p6 = scmp.lt.u32.totalorder %s3186_s4, %s3929_s5 }
 0x290   :  { %p3192_p7 = pnand %p3190_p6, %p3187_p5 }
 0x292   :  { %3195 = shalt.err (!%p3192_p7)
}
 0x293   :  { %2438 = dma.vmem_to_hbm [thread:$0]  %s2436_s10, 32, %s3929_s5, [#allocation3]  }
 0x294   :  { %3196 = dma.done.wait [#allocation3], 32  }
 0x295   :  { %3197 = vsyncadd [#allocation3], 4294967264 }
 0x296   :  { %2442 = vsyncpa [#allocation3], 1 }

// kernel: pallas_forward.2
= control target key start
LH: loop header
LB: loop body
LE: loop exit
PB: predicated region body
PF: predicated region fallthrough
CT: control target
= control target key end

     0   :  { %16 = vsyncpa [#allocation6], 0  ;;  %s12290_s0 = inlined_call_operand.vmem [shape: bf16[2,8,900], index: 0, kind: input, shape index: {}]   ;;  %s12291_s1 = inlined_call_operand.vmem [shape: bf16[9,16,8], index: 1, kind: input, shape index: {}]   ;;  %s12292_s2 = inlined_call_operand.vmem [shape: f32[16,1], index: 2, kind: input, shape index: {}]   ;;  %s12293_s3 = inlined_call_operand.vmem [shape: bf16[9,32,16], index: 3, kind: input, shape index: {}]   ;;  %s12294_s4 = inlined_call_operand.vmem [shape: f32[32,1], index: 4, kind: input, shape index: {}]   ;;  %s12295_s5 = inlined_call_operand.vmem [shape: bf16[9,64,32], index: 5, kind: input, shape index: {}]   ;;  %s12296_s6 = inlined_call_operand.vmem [shape: f32[64,1], index: 6, kind: input, shape index: {}]   ;;  %s12297_s7 = inlined_call_operand.vmem [shape: bf16[900,256], index: 7, kind: input, shape index: {}]   ;;  %s12298_s8 = inlined_call_operand.hbm [shape: bf16[256,49], index: 8, kind: input, shape index: {}]   ;;  %s12299_s9 = inlined_call_operand.hbm [shape: f32[1,900], index: 9, kind: input, shape index: {}]   ;;  %s12300_s10 = inlined_call_operand.hbm [shape: f32[1,256], index: 10, kind: input, shape index: {}]   ;;  %s12301_s11 = inlined_call_operand.vmem [shape: bf16[2,64,49], index: 11, kind: output, shape index: {}]  }
   0x1   :  { %17 = vsyncpa [#allocation8], 0  ;;  %s10144_s17 = smov 0  }
   0x2 LB: > { %s10062_s18 = smov [#allocation7]   ;;  %s10150_s20 = sadd.s32 4294967295, %s10060_s17   ;;  %s10060_s17 = sphi %s10144_s17, %s23_s17  }
   0x3   : > { %s337_s19 = sshll.u32 %s10062_s18, 4  ;;  %p8350_p0 = scmp.ge.s32.totalorder %s10060_s17, 1  ;;  %s338_s19 = int_to_ptr.vmem [resolvable:$true] %s337_s19 }
   0x4   : > { %p290_p1 = scmp.lt.s32.totalorder %s10060_s17, 3  ;;  %p12302_p2 = scmp.eq.s32.totalorder %s10150_s20, 0 }
   0x5   : > { %s10063_s22 = smov [#allocation5]   ;;  %s10064_s25 = smov [#allocation9]  }
   0x6   : > { %p10155_p3 = pnand %p8350_p0, %p290_p1  ;;  %s323_s23 = sshll.u32 %s10063_s22, 4  ;;  %s10167_s23 = int_to_ptr.vmem [resolvable:$true] %s323_s23 }
   0x7   : > { %s348_s26 = sshll.u32 %s10064_s25, 4  ;;  %s9962_s29 = scalar_lea.hbm %s12299_s9, 128  ;;  %s10169_s26 = int_to_ptr.vmem [resolvable:$true] %s348_s26 }
   0x8   : > { %s12309_s21 = scalar_select %p10155_p3, 1, 0 }
   0x9   : > { %p9533_p4 = pneg %p10155_p3  ;;  %p9963_p6 = scmp.ne.s32.totalorder %s12299_s9, %s9962_s29 }
   0xa   : > { %p9969_p10 = scmp.lt.u32.totalorder %s9962_s29, %s12299_s9 }
   0xb   : > { %p10163_p5 = pnand %p12302_p2, %p9533_p4 }
   0xd   : > { %p10179_p7 = pneg %p10163_p5 }
   0xf   : > { %p9965_p8 = pnand %p10179_p7, %p9963_p6 }
  0x11   : > { %p9966_p9 = pneg %p9965_p8 }
  0x13   : > { %p9971_p11 = pnand %p9969_p10, %p9966_p9 }
  0x15   : > { %9974 = shalt.err (!%p9971_p11)
}
  0x16   : > { %s9975_s16 = scalar_lea.vmem %s338_s19, 128  ;;  %p9983_p1 = scmp.lt.s32.totalorder %s338_s19, %s338_s19 }
  0x17   : > { %p9976_p12 = scmp.ne.s32.totalorder %s338_s19, %s9975_s16  ;;  %p9984_p4 = scmp.lt.s32.totalorder %s9975_s16, %s9975_s16 }
  0x19   : > { %p9978_p13 = pnand %p9976_p12, %p10179_p7  ;;  %p9985_p2 = por %p9984_p4, %p9983_p1 }
  0x1b   : > { %p9979_p0 = pneg %p9978_p13 }
  0x1d   : > { %p9986_p3 = pnand %p9985_p2, %p9979_p0 }
  0x1f   : > { %9989 = shalt.err (!%p9986_p3)
}
  0x20   : > { %9539 = dma.hbm_to_vmem [thread:$0]  (!%p10163_p5), %s12299_s9, 128, %s338_s19, [#allocation8]  }
  0x21   : > { %s9990_s28 = scalar_lea.hbm %s12298_s8, 2048 }
  0x22   : > { %p9991_p6 = scmp.ne.s32.totalorder %s12298_s8, %s9990_s28  ;;  %p9997_p2 = scmp.lt.u32.totalorder %s9990_s28, %s12298_s8 }
  0x24   : > { %p9993_p8 = pnand %p9991_p6, %p10179_p7 }
  0x26   : > { %p9994_p9 = pneg %p9993_p8 }
  0x28   : > { %p9999_p3 = pnand %p9997_p2, %p9994_p9 }
  0x2a   : > { %10002 = shalt.err (!%p9999_p3)
}
  0x2b   : > { %s10003_s19 = scalar_lea.vmem %s10167_s23, 2048  ;;  %p10011_p13 = scmp.lt.s32.totalorder %s10167_s23, %s10167_s23 }
  0x2c   : > { %p10004_p10 = scmp.ne.s32.totalorder %s10167_s23, %s10003_s19  ;;  %p10012_p0 = scmp.lt.s32.totalorder %s10003_s19, %s10003_s19 }
  0x2e   : > { %p10006_p11 = pnand %p10004_p10, %p10179_p7  ;;  %p10013_p1 = por %p10012_p0, %p10011_p13 }
  0x30   : > { %p10007_p12 = pneg %p10006_p11 }
  0x32   : > { %p10014_p4 = pnand %p10013_p1, %p10007_p12 }
  0x34   : > { %10017 = shalt.err (!%p10014_p4)
}
  0x35   : > { %s10065_s15 = smov 64   ;;  %s10066_s16 = smov 4  }
  0x36   : > { %9536 = dma.hbm_to_vmem [thread:$0]  (!%p10163_p5), %s12298_s8, 2048, %s10167_s23, [#allocation6], %s10065_s15, %s10065_s15, %s10066_s16  }
  0x37   : > { %s10018_s28 = scalar_lea.hbm %s12300_s10, 32 }
  0x38   : > { %p10019_p6 = scmp.ne.s32.totalorder %s12300_s10, %s10018_s28  ;;  %p10025_p2 = scmp.lt.u32.totalorder %s10018_s28, %s12300_s10 }
  0x3a   : > { %p10021_p8 = pnand %p10019_p6, %p10179_p7 }
  0x3c   : > { %p10022_p9 = pneg %p10021_p8 }
  0x3e   : > { %p10027_p3 = pnand %p10025_p2, %p10022_p9 }
  0x40   : > { %10030 = shalt.err (!%p10027_p3)
}
  0x41   : > { %s10031_s23 = scalar_lea.vmem %s10169_s26, 32  ;;  %p10039_p13 = scmp.lt.s32.totalorder %s10169_s26, %s10169_s26 }
  0x42   : > { %p10032_p10 = scmp.ne.s32.totalorder %s10169_s26, %s10031_s23  ;;  %p10040_p0 = scmp.lt.s32.totalorder %s10031_s23, %s10031_s23 }
  0x44   : > { %p10034_p11 = pnand %p10032_p10, %p10179_p7  ;;  %p10041_p1 = por %p10040_p0, %p10039_p13 }
  0x46   : > { %p10035_p12 = pneg %p10034_p11 }
  0x48   : > { %p10042_p4 = pnand %p10041_p1, %p10035_p12 }
  0x4a   : > { %10045 = shalt.err (!%p10042_p4)
}
  0x4b   : > { %9542 = dma.hbm_to_vmem [thread:$0]  (!%p10163_p5), %s12300_s10, 32, %s10169_s26, [#allocation8]  }
  0x4c   : > { %p12312_p6 = scmp.ne.s32.totalorder %s12309_s21, 0 }
  0x4d   : > { %p12313_p8 = scmp.eq.s32.totalorder (!%p12312_p6), %s10150_s20, 0 }
  0x4e   : > { %369 = sbr.rel (%p12312_p6) target bundleno = 2854 (0xb26), region = 64 }
  0x55   : > { %10051 = dma.done.wait (%p12313_p8), [#allocation6], 2048   ;;  %p12314_p7 = pmov %p12313_p8 }
  0x57   : > { %10053 = vsyncadd (%p12314_p7), [#allocation6], 4294965248  ;;  %p12315_p9 = pmov %p12314_p7 }
  0x58   : > { %p12316_p2 = pmov %p12314_p7 }
  0x59   : > { %10055 = dma.done.wait (%p12315_p9), [#allocation8], 160  }
  0x5a   : > { %10057 = vsyncadd (%p12316_p2), [#allocation8], 4294967136  ;;  %p417_p3 = scmp.lt.s32.totalorder %s10150_s20, 1  ;;  %s10067_s16 = smov 32   ;;  %vm461_vm0 = vcmask 1043712   ;;  %vm462_vm1 = vcmask 1047556  }
  0x5b   : > { %vm448_vm2 = vcmask 261120   ;;  %vm463_vm3 = vmor %vm462_vm1, %vm461_vm0  ;;  %vm468_vm4 = vcmask 293892   ;;  %vm450_vm5 = vcmask 1043456   ;;  %v10068_v19 = vmov 0   ;;  %s10069_s18 = smov 126   ;;  %s10070_s22 = smov 127  }
  0x5c   : > { %s12341_s20 = smov (!%p417_p3, %s10150_s20), 1  ;;  %vm469_vm6 = vmor %vm468_vm4, %vm450_vm5  ;;  %589 = vmatprep.mubr.bf16.mxu0 %v10068_v19  ;;  %718 = vmatprep.mubr.bf16.mxu1 %v10068_v19  ;;  %s10071_s25 = smov 125   ;;  %vm521_vm7 = vcmask 1031168   ;;  %v9585_v37 = vld [vmem:[%s12291_s1 + $0x8] sm:$0xff]   ;;  %vm529_vm8 = vcmask 64512   ;;  %vm750_vm9 = vcmask 1039360  }
  0x5d   : > { %s8935_s21 = sshll.u32 %s12341_s20, 5  ;;  %9579 = vset.pattern.permute.xlu0 %v10068_v19  ;;  %9580 = vset.pattern.permute.xlu1 %v10068_v19  ;;  %s10072_s27 = smov 97   ;;  %v9586_v59 = vld [vmem:[%s12291_s1] sm:$0xff]   ;;  %vm981_vm10 = vcmask 1022976   ;;  %vm1228_vm11 = vcmask 793600   ;;  %vm1475_vm12 = vcmask 785408  }
  0x5e   : > { %s421_s13 = scalar_lea.vmem %s12290_s0, %s8935_s21  ;;  %s10073_s28 = smov 96   ;;  %vm1722_vm13 = vcmask 777216   ;;  %vm1969_vm14 = vcmask 547840   ;;  %vm2216_vm15 = vcmask 539648   ;;  %vm2463_vm0 = vcmask 531456  }
  0x5f   : > { %v428_v0 = vld [vmem:[%s421_s13] sm:$0xff]  ;;  %v430_v1 = vld [vmem:[%s421_s13 + $0x10] sm:$0xff]  ;;  %v429_v2 = vld [vmem:[%s421_s13 + $0x8] sm:$0xff]  ;;  %s10074_s29 = smov 95   ;;  %s10075_s30 = smov 67  }
  0x60   : > { %436 = vrot.lane.b32.xlu0 %v428_v0, %s10067_s16  ;;  %440 = vrot.lane.b32.xlu1 %v430_v1, %s10067_s16  ;;  %v431_v3 = vld [vmem:[%s421_s13 + $0x18] sm:$0xff]  ;;  %s10076_s12 = smov 66   ;;  %s10077_s19 = smov 65   ;;  %v2686_v1 = vld [vmem:[%s12292_s2] sm:$0xff] }
  0x61   : > { %s10078_s13 = smov 112   ;;  %s10080_s14 = smov 111  }
  0x64   : > { %438 = vrot.lane.b32.xlu0 %v429_v2, %s10067_s16  ;;  %442 = vrot.lane.b32.xlu1 %v431_v3, %s10067_s16 }
  0xd2   : > { %v437_v4 = vpop.permute.xlu0 %436  ;;  %v441_v5 = vpop.permute.xlu1 %440 }
  0xd3   : > { %v444_v6 = vrot.slane %v437_v4, 4  ;;  %v446_v8 = vrot.slane %v441_v5, 4 }
  0xd5   : > { %v449_v7 = vsel %vm448_vm2, %v444_v6, %v437_v4  ;;  %v2687_v4 = vld [vmem:[%s12292_s2 + $0x8] sm:$0xff] }
  0xd6   : > { %464 = vst.msk [vmem:[#allocation2] sm:$0xff] %vm463_vm3, %v449_v7  ;;  %v439_v9 = vpop.permute.xlu0 %438  ;;  %v443_v10 = vpop.permute.xlu1 %442 }
  0xd7   : > { %v445_v11 = vrot.slane %v439_v9, 4  ;;  %v447_v12 = vrot.slane %v443_v10, 4 }
  0xd9   : > { %v451_v13 = vsel %vm450_vm5, %v444_v6, %v445_v11  ;;  %v453_v14 = vsel %vm450_vm5, %v445_v11, %v446_v8  ;;  %v455_v15 = vsel %vm450_vm5, %v446_v8, %v447_v12 }
  0xda   : > { %v452_v16 = vsel %vm448_vm2, %v451_v13, %v439_v9  ;;  %v454_v17 = vsel %vm448_vm2, %v453_v14, %v441_v5  ;;  %v456_v18 = vsel %vm448_vm2, %v455_v15, %v443_v10 }
  0xdb   : > { %470 = vst.msk [vmem:[#allocation2 + $0x18] sm:$0xff] %vm469_vm6, %v456_v18  ;;  %v10285_v23 = vcombine.low %v452_v16, %v452_v16  ;;  %v10287_v24 = vcombine.high %v452_v16, %v452_v16  ;;  %v10295_v27 = vcombine.low %v454_v17, %v454_v17  ;;  %v10303_v29 = vcombine.high %v454_v17, %v454_v17  ;;  %v9587_v17 = vld [vmem:[%s12291_s1 + $0x10] sm:$0xff]  }
  0xdd   : > { %v471_v20 = vld [vmem:[#allocation2] sm:$0xff] }
  0xde   : > { %v10277_v21 = vcombine.low %v471_v20, %v471_v20  ;;  %v10279_v22 = vcombine.high %v471_v20, %v471_v20 }
  0xe0   : > { %507 = vrot.lane.b32.xlu1 %v10279_v22, %s10069_s18  ;;  %505 = vrot.lane.b32.xlu0 %v10277_v21, %s10069_s18 }
  0xe2   : > { %v474_v25 = vld [vmem:[#allocation2 + $0x18] sm:$0xff] }
  0xe3   : > { %v10289_v26 = vcombine.low %v474_v25, %v474_v25  ;;  %v10297_v28 = vcombine.high %v474_v25, %v474_v25 }
  0xe4   : > { %511 = vrot.lane.b32.xlu1 %v10287_v24, %s10069_s18  ;;  %509 = vrot.lane.b32.xlu0 %v10285_v23, %s10069_s18 }
  0xe8   : > { %517 = vrot.lane.b32.xlu1 %v10289_v26, %s10069_s18  ;;  %513 = vrot.lane.b32.xlu0 %v10295_v27, %s10069_s18 }
  0xec   : > { %515 = vrot.lane.b32.xlu1 %v10303_v29, %s10069_s18  ;;  %519 = vrot.lane.b32.xlu0 %v10297_v28, %s10069_s18 }
  0xf0   : > { %740 = vrot.lane.b32.xlu1 %v10287_v24, %s10070_s22  ;;  %738 = vrot.lane.b32.xlu0 %v10285_v23, %s10070_s22 }
  0xf4   : > { %734 = vrot.lane.b32.xlu1 %v10277_v21, %s10070_s22  ;;  %742 = vrot.lane.b32.xlu0 %v10295_v27, %s10070_s22 }
  0xf8   : > { %746 = vrot.lane.b32.xlu1 %v10289_v26, %s10070_s22  ;;  %736 = vrot.lane.b32.xlu0 %v10279_v22, %s10070_s22 }
  0xfc   : > { %744 = vrot.lane.b32.xlu1 %v10303_v29, %s10070_s22  ;;  %748 = vrot.lane.b32.xlu0 %v10297_v28, %s10070_s22 }
 0x100   : > { %971 = vrot.lane.b32.xlu1 %v10287_v24, %s10071_s25  ;;  %969 = vrot.lane.b32.xlu0 %v10285_v23, %s10071_s25 }
 0x104   : > { %965 = vrot.lane.b32.xlu1 %v10277_v21, %s10071_s25  ;;  %973 = vrot.lane.b32.xlu0 %v10295_v27, %s10071_s25 }
 0x108   : > { %977 = vrot.lane.b32.xlu1 %v10289_v26, %s10071_s25  ;;  %967 = vrot.lane.b32.xlu0 %v10279_v22, %s10071_s25 }
 0x10c   : > { %975 = vrot.lane.b32.xlu1 %v10303_v29, %s10071_s25  ;;  %979 = vrot.lane.b32.xlu0 %v10297_v28, %s10071_s25 }
 0x110   : > { %1218 = vrot.lane.b32.xlu1 %v10287_v24, %s10072_s27  ;;  %1216 = vrot.lane.b32.xlu0 %v10285_v23, %s10072_s27 }
 0x114   : > { %1212 = vrot.lane.b32.xlu1 %v10277_v21, %s10072_s27  ;;  %1220 = vrot.lane.b32.xlu0 %v10295_v27, %s10072_s27 }
 0x118   : > { %1224 = vrot.lane.b32.xlu1 %v10289_v26, %s10072_s27  ;;  %1214 = vrot.lane.b32.xlu0 %v10279_v22, %s10072_s27 }
 0x11c   : > { %1222 = vrot.lane.b32.xlu1 %v10303_v29, %s10072_s27  ;;  %1226 = vrot.lane.b32.xlu0 %v10297_v28, %s10072_s27 }
 0x120   : > { %1465 = vrot.lane.b32.xlu1 %v10287_v24, %s10073_s28  ;;  %1463 = vrot.lane.b32.xlu0 %v10285_v23, %s10073_s28 }
 0x124   : > { %1459 = vrot.lane.b32.xlu1 %v10277_v21, %s10073_s28  ;;  %1467 = vrot.lane.b32.xlu0 %v10295_v27, %s10073_s28 }
 0x128   : > { %1471 = vrot.lane.b32.xlu1 %v10289_v26, %s10073_s28  ;;  %1461 = vrot.lane.b32.xlu0 %v10279_v22, %s10073_s28 }
 0x12c   : > { %1469 = vrot.lane.b32.xlu1 %v10303_v29, %s10073_s28  ;;  %1473 = vrot.lane.b32.xlu0 %v10297_v28, %s10073_s28 }
 0x130   : > { %1712 = vrot.lane.b32.xlu1 %v10287_v24, %s10074_s29  ;;  %1710 = vrot.lane.b32.xlu0 %v10285_v23, %s10074_s29 }
 0x134   : > { %1706 = vrot.lane.b32.xlu1 %v10277_v21, %s10074_s29  ;;  %1714 = vrot.lane.b32.xlu0 %v10295_v27, %s10074_s29 }
 0x138   : > { %1718 = vrot.lane.b32.xlu1 %v10289_v26, %s10074_s29  ;;  %1708 = vrot.lane.b32.xlu0 %v10279_v22, %s10074_s29 }
 0x13c   : > { %1716 = vrot.lane.b32.xlu1 %v10303_v29, %s10074_s29  ;;  %1720 = vrot.lane.b32.xlu0 %v10297_v28, %s10074_s29 }
 0x140   : > { %1959 = vrot.lane.b32.xlu1 %v10287_v24, %s10075_s30  ;;  %1957 = vrot.lane.b32.xlu0 %v10285_v23, %s10075_s30 }
 0x144   : > { %1953 = vrot.lane.b32.xlu1 %v10277_v21, %s10075_s30  ;;  %1961 = vrot.lane.b32.xlu0 %v10295_v27, %s10075_s30 }
 0x148   : > { %1965 = vrot.lane.b32.xlu1 %v10289_v26, %s10075_s30  ;;  %1955 = vrot.lane.b32.xlu0 %v10279_v22, %s10075_s30 }
 0x14c   : > { %1963 = vrot.lane.b32.xlu1 %v10303_v29, %s10075_s30  ;;  %1967 = vrot.lane.b32.xlu0 %v10297_v28, %s10075_s30 }
 0x150   : > { %2206 = vrot.lane.b32.xlu1 %v10287_v24, %s10076_s12  ;;  %2204 = vrot.lane.b32.xlu0 %v10285_v23, %s10076_s12 }
 0x152   : > { %v508_v30 = vpop.permute.xlu1 %507  ;;  %v506_v31 = vpop.permute.xlu0 %505 }
 0x153   : > { %v522_v34 = vsel %vm521_vm7, %v506_v31, %v508_v30 }
 0x154   : > { %2200 = vrot.lane.b32.xlu1 %v10277_v21, %s10076_s12  ;;  %2208 = vrot.lane.b32.xlu0 %v10295_v27, %s10076_s12  ;;  %v534_v36 = vsel %vm450_vm5, %v522_v34, 0 }
 0x156   : > { %v512_v32 = vpop.permute.xlu1 %511  ;;  %v510_v33 = vpop.permute.xlu0 %509 }
 0x157   : > { %v523_v35 = vsel %vm521_vm7, %v508_v30, %v510_v33  ;;  %v524_v38 = vsel %vm521_vm7, %v510_v33, %v512_v32 }
 0x158   : > { %2212 = vrot.lane.b32.xlu1 %v10289_v26, %s10076_s12  ;;  %2202 = vrot.lane.b32.xlu0 %v10279_v22, %s10076_s12  ;;  %v540_v42 = vsel %vm450_vm5, %v524_v38, 0  ;;  %v9588_v38 = vld [vmem:[%s12291_s1 + $0x18] sm:$0xff]  }
 0x159   : > { %8374 = vmatprep.subr.msk.bf16.mxu0 %vm450_vm5, %v523_v35 }
 0x15a   : > { %558 = vmatpush1.bf16.msra.mxu0 %v534_v36  ;;  %v518_v39 = vpop.permute.xlu1 %517  ;;  %v514_v40 = vpop.permute.xlu0 %513 }
 0x15b   : > { %v525_v41 = vsel %vm521_vm7, %v512_v32, %v514_v40 }
 0x15c   : > { %2210 = vrot.lane.b32.xlu1 %v10303_v29, %s10076_s12  ;;  %2214 = vrot.lane.b32.xlu0 %v10297_v28, %s10076_s12 }
 0x15d   : > { %8375 = vmatmul.mubr.msk.bf16.vlgmr.msra.gmra.mrb[0].mxu0 %vm529_vm8, %v9585_v37  ;;  %8376 = vmatprep.subr.msk.bf16.mxu0 %vm450_vm5, %v525_v41 }
 0x15e   : > { %601 = vmatpush1.bf16.msra.mxu0 %v540_v42  ;;  %v516_v43 = vpop.permute.xlu1 %515  ;;  %v520_v44 = vpop.permute.xlu0 %519  ;;  %632 = vmatprep.mubr.bf16.mxu0 %v10068_v19 }
 0x15f   : > { %8380 = vmatprep.subr.msk.bf16.mxu1 %vm450_vm5, %v520_v44  ;;  %v527_v45 = vsel %vm521_vm7, %v516_v43, %v518_v39  ;;  %v528_v46 = vsel %vm521_vm7, %v518_v39, %v520_v44  ;;  %v526_v48 = vsel %vm521_vm7, %v514_v40, %v516_v43 }
 0x160   : > { %2453 = vrot.lane.b32.xlu1 %v10287_v24, %s10077_s19  ;;  %2451 = vrot.lane.b32.xlu0 %v10285_v23, %s10077_s19  ;;  %v552_v47 = vsel %vm450_vm5, %v528_v46, 0  ;;  %v546_v51 = vsel %vm450_vm5, %v526_v48, 0 }
 0x161   : > { %8378 = vmatprep.subr.msk.bf16.mxu0 %vm450_vm5, %v527_v45  ;;  %687 = vmatpush1.bf16.msra.mxu1 %v552_v47 }
 0x162   : > { %v741_v49 = vpop.permute.xlu1 %740  ;;  %v739_v50 = vpop.permute.xlu0 %738 }
 0x163   : > { %v753_v52 = vsel %vm750_vm9, %v739_v50, %v741_v49 }
 0x164   : > { %2447 = vrot.lane.b32.xlu1 %v10277_v21, %s10077_s19  ;;  %2455 = vrot.lane.b32.xlu0 %v10295_v27, %s10077_s19  ;;  %v768_v56 = vsel %vm450_vm5, %v753_v52, 0 }
 0x165   : > { %8377 = vmatmul.mubr.msk.bf16.vlgmr.msra.gmra.mrb[4].mxu0 %vm529_vm8, %v9585_v37  ;;  %8381 = vmatmul.mubr.msk.bf16.vlgmr.msra.gmra.mrb[0].mxu1 %vm529_vm8, %v9585_v37 }
 0x166   : > { %644 = vmatpush1.bf16.msra.mxu0 %v546_v51  ;;  %v735_v53 = vpop.permute.xlu1 %734  ;;  %v743_v54 = vpop.permute.xlu0 %742  ;;  %675 = vmatprep.mubr.bf16.mxu0 %v10068_v19 }
 0x167   : > { %v754_v55 = vsel %vm750_vm9, %v741_v49, %v743_v54  ;;  %860 = vmatprep.mubr.bf16.mxu1 %v10068_v19 }
 0x168   : > { %2457 = vrot.lane.b32.xlu1 %v10303_v29, %s10077_s19  ;;  %2449 = vrot.lane.b32.xlu0 %v10279_v22, %s10077_s19 }
 0x169   : > { %8385 = vmatprep.subr.msk.bf16.mxu1 %vm450_vm5, %v754_v55 }
 0x16a   : > { %829 = vmatpush1.bf16.msra.mxu1 %v768_v56  ;;  %v747_v57 = vpop.permute.xlu1 %746  ;;  %v737_v58 = vpop.permute.xlu0 %736 }
 0x16b   : > { %v751_v60 = vsel %vm750_vm9, %v735_v53, %v737_v58  ;;  %v752_v61 = vsel %vm750_vm9, %v737_v58, %v739_v50  ;;  %v9589_v58 = vld [vmem:[%s12291_s1 + $0x20] sm:$0xff]  }
 0x16c   : > { %2461 = vrot.lane.b32.xlu1 %v10297_v28, %s10077_s19  ;;  %2459 = vrot.lane.b32.xlu0 %v10289_v26, %s10077_s19  ;;  %v762_v62 = vsel %vm450_vm5, %v751_v60, 0 }
 0x16d   : > { %8379 = vmatmul.mubr.msk.bf16.vlgmr.msra.gmra.mrb[8].mxu0 %vm529_vm8, %v9585_v37  ;;  %8383 = vmatprep.subr.msk.bf16.mxu0 %vm450_vm5, %v752_v61 }
 0x16e   : > { %8386 = vmatmul.mubr.msk.bf16.vlgmr.msra.gmra.mrb[4].mxu1 %vm529_vm8, %v9586_v59  ;;  %786 = vmatpush1.bf16.msra.mxu0 %v762_v62  ;;  %v745_v63 = vpop.permute.xlu1 %744  ;;  %v749_v0 = vpop.permute.xlu0 %748 }
 0x16f   : > { %v757_v2 = vsel %vm750_vm9, %v747_v57, %v749_v0  ;;  %8389 = vmatprep.subr.msk.bf16.mxu1 %vm450_vm5, %v749_v0  ;;  %v756_v3 = vsel %vm750_vm9, %v745_v63, %v747_v57  ;;  %817 = vmatprep.mubr.bf16.mxu0 %v10068_v19  ;;  %v755_v6 = vsel %vm750_vm9, %v743_v54, %v745_v63 }
 0x170   : > { %8387 = vmatprep.subr.msk.bf16.mxu0 %vm450_vm5, %v756_v3  ;;  %v780_v5 = vsel %vm450_vm5, %v757_v2, 0  ;;  %946 = vmatprep.mubr.bf16.mxu1 %v10068_v19  ;;  %v774_v10 = vsel %vm450_vm5, %v755_v6, 0 }
 0x171   : > { %915 = vmatpush1.bf16.msra.mxu1 %v780_v5  ;;  %2690 = vperm.xlu0 %9579, %v2686_v1  }
 0x172   : > { %v972_v7 = vpop.permute.xlu1 %971  ;;  %v970_v8 = vpop.permute.xlu0 %969  ;;  %2695 = vperm.xlu1 %9580, %v2687_v4  }
 0x173   : > { %v984_v9 = vsel %vm981_vm10, %v970_v8, %v972_v7 }
 0x174   : > { %v999_v14 = vsel %vm450_vm5, %v984_v9, 0 }
 0x175   : > { %8384 = vmatmul.mubr.msk.bf16.vlgmr.msra.gmra.mrb[0].mxu0 %vm529_vm8, %v9586_v59 }
 0x176   : > { %872 = vmatpush1.bf16.msra.mxu0 %v774_v10  ;;  %8390 = vmatmul.mubr.msk.bf16.vlgmr.msra.gmra.mrb[0].mxu1 %vm529_vm8, %v9586_v59  ;;  %v966_v11 = vpop.permute.xlu1 %965  ;;  %v974_v12 = vpop.permute.xlu0 %973 }
 0x177   : > { %v985_v13 = vsel %vm981_vm10, %v972_v7, %v974_v12  ;;  %903 = vmatprep.mubr.bf16.mxu0 %v10068_v19  ;;  %1091 = vmatprep.mubr.bf16.mxu1 %v10068_v19 }
 0x178   : > { %8396 = vmatprep.subr.msk.bf16.mxu1 %vm450_vm5, %v985_v13 }
 0x179   : > { %1060 = vmatpush1.bf16.msra.mxu1 %v999_v14  ;;  %v9590_v14 = vld [vmem:[%s12291_s1 + $0x28] sm:$0xff]  }
 0x17a   : > { %v978_v15 = vpop.permute.xlu1 %977  ;;  %v968_v16 = vpop.permute.xlu0 %967 }
 0x17b   : > { %v982_v18 = vsel %vm981_vm10, %v966_v11, %v968_v16  ;;  %v983_v20 = vsel %vm981_vm10, %v968_v16, %v970_v8 }
 0x17c   : > { %8394 = vmatprep.subr.msk.bf16.mxu0 %vm450_vm5, %v983_v20  ;;  %v993_v21 = vsel %vm450_vm5, %v982_v18, 0 }
 0x17d   : > { %8388 = vmatmul.mubr.msk.bf16.vlgmr.msra.gmra.mrb[8].mxu0 %vm529_vm8, %v9586_v59 }
 0x17e   : > { %8397 = vmatmul.mubr.msk.bf16.vlgmr.msra.gmra.mrb[4].mxu1 %vm529_vm8, %v9587_v17  ;;  %1017 = vmatpush1.bf16.msra.mxu0 %v993_v21  ;;  %v976_v22 = vpop.permute.xlu1 %975  ;;  %v980_v23 = vpop.permute.xlu0 %979 }
 0x17f   : > { %v988_v24 = vsel %vm981_vm10, %v978_v15, %v980_v23  ;;  %8400 = vmatprep.subr.msk.bf16.mxu1 %vm450_vm5, %v980_v23  ;;  %v987_v25 = vsel %vm981_vm10, %v976_v22, %v978_v15  ;;  %1048 = vmatprep.mubr.bf16.mxu0 %v10068_v19  ;;  %v986_v27 = vsel %vm981_vm10, %v974_v12, %v976_v22 }
 0x180   : > { %8398 = vmatprep.subr.msk.bf16.mxu0 %vm450_vm5, %v987_v25  ;;  %v1011_v26 = vsel %vm450_vm5, %v988_v24, 0  ;;  %1177 = vmatprep.mubr.bf16.mxu1 %v10068_v19  ;;  %v1005_v31 = vsel %vm450_vm5, %v986_v27, 0 }
 0x181   : > { %1146 = vmatpush1.bf16.msra.mxu1 %v1011_v26 }
 0x182   : > { %v1219_v28 = vpop.permute.xlu1 %1218  ;;  %v1217_v29 = vpop.permute.xlu0 %1216 }
 0x183   : > { %v1231_v30 = vsel %vm1228_vm11, %v1217_v29, %v1219_v28 }
 0x184   : > { %v1246_v35 = vsel %vm450_vm5, %v1231_v30, 0 }
 0x185   : > { %8395 = vmatmul.mubr.msk.bf16.vlgmr.msra.gmra.mrb[0].mxu0 %vm529_vm8, %v9587_v17 }
 0x186   : > { %1103 = vmatpush1.bf16.msra.mxu0 %v1005_v31  ;;  %8401 = vmatmul.mubr.msk.bf16.vlgmr.msra.gmra.mrb[0].mxu1 %vm529_vm8, %v9587_v17  ;;  %v1213_v32 = vpop.permute.xlu1 %1212  ;;  %v1221_v33 = vpop.permute.xlu0 %1220 }
 0x187   : > { %v1232_v34 = vsel %vm1228_vm11, %v1219_v28, %v1221_v33  ;;  %1134 = vmatprep.mubr.bf16.mxu0 %v10068_v19  ;;  %1338 = vmatprep.mubr.bf16.mxu1 %v10068_v19 }
 0x188   : > { %8407 = vmatprep.subr.msk.bf16.mxu1 %vm450_vm5, %v1232_v34 }
 0x189   : > { %1307 = vmatpush1.bf16.msra.mxu1 %v1246_v35  ;;  %v9591_v35 = vld [vmem:[%s12291_s1 + $0x30] sm:$0xff]  }
 0x18a   : > { %v1225_v36 = vpop.permute.xlu1 %1224  ;;  %v1215_v37 = vpop.permute.xlu0 %1214 }
 0x18b   : > { %v1229_v39 = vsel %vm1228_vm11, %v1213_v32, %v1215_v37  ;;  %v1230_v40 = vsel %vm1228_vm11, %v1215_v37, %v1217_v29 }
 0x18c   : > { %8405 = vmatprep.subr.msk.bf16.mxu0 %vm450_vm5, %v1230_v40  ;;  %v1240_v41 = vsel %vm450_vm5, %v1229_v39, 0 }
 0x18d   : > { %8399 = vmatmul.mubr.msk.bf16.vlgmr.msra.gmra.mrb[8].mxu0 %vm529_vm8, %v9587_v17 }
 0x18e   : > { %8408 = vmatmul.mubr.msk.bf16.vlgmr.msra.gmra.mrb[4].mxu1 %vm529_vm8, %v9588_v38  ;;  %1264 = vmatpush1.bf16.msra.mxu0 %v1240_v41  ;;  %v1223_v42 = vpop.permute.xlu1 %1222  ;;  %v1227_v43 = vpop.permute.xlu0 %1226 }
 0x18f   : > { %v1235_v44 = vsel %vm1228_vm11, %v1225_v36, %v1227_v43  ;;  %8411 = vmatprep.subr.msk.bf16.mxu1 %vm450_vm5, %v1227_v43  ;;  %v1234_v45 = vsel %vm1228_vm11, %v1223_v42, %v1225_v36  ;;  %1295 = vmatprep.mubr.bf16.mxu0 %v10068_v19  ;;  %v1233_v47 = vsel %vm1228_vm11, %v1221_v33, %v1223_v42 }
 0x190   : > { %8409 = vmatprep.subr.msk.bf16.mxu0 %vm450_vm5, %v1234_v45  ;;  %v1258_v46 = vsel %vm450_vm5, %v1235_v44, 0  ;;  %1424 = vmatprep.mubr.bf16.mxu1 %v10068_v19  ;;  %v1252_v51 = vsel %vm450_vm5, %v1233_v47, 0 }
 0x191   : > { %1393 = vmatpush1.bf16.msra.mxu1 %v1258_v46 }
 0x192   : > { %v1466_v48 = vpop.permute.xlu1 %1465  ;;  %v1464_v49 = vpop.permute.xlu0 %1463 }
 0x193   : > { %v1478_v50 = vsel %vm1475_vm12, %v1464_v49, %v1466_v48 }
 0x194   : > { %v1493_v55 = vsel %vm450_vm5, %v1478_v50, 0 }
 0x195   : > { %8406 = vmatmul.mubr.msk.bf16.vlgmr.msra.gmra.mrb[0].mxu0 %vm529_vm8, %v9588_v38 }
 0x196   : > { %1350 = vmatpush1.bf16.msra.mxu0 %v1252_v51  ;;  %8412 = vmatmul.mubr.msk.bf16.vlgmr.msra.gmra.mrb[0].mxu1 %vm529_vm8, %v9588_v38  ;;  %v1460_v52 = vpop.permute.xlu1 %1459  ;;  %v1468_v53 = vpop.permute.xlu0 %1467 }
 0x197   : > { %v1479_v54 = vsel %vm1475_vm12, %v1466_v48, %v1468_v53  ;;  %1381 = vmatprep.mubr.bf16.mxu0 %v10068_v19  ;;  %1585 = vmatprep.mubr.bf16.mxu1 %v10068_v19 }
 0x198   : > { %8418 = vmatprep.subr.msk.bf16.mxu1 %vm450_vm5, %v1479_v54 }
 0x199   : > { %1554 = vmatpush1.bf16.msra.mxu1 %v1493_v55  ;;  %v9592_v55 = vld [vmem:[%s12291_s1 + $0x38] sm:$0xff]  }
 0x19a   : > { %v1472_v56 = vpop.permute.xlu1 %1471  ;;  %v1462_v57 = vpop.permute.xlu0 %1461 }
 0x19b   : > { %v1476_v59 = vsel %vm1475_vm12, %v1460_v52, %v1462_v57  ;;  %v1477_v60 = vsel %vm1475_vm12, %v1462_v57, %v1464_v49 }
 0x19c   : > { %8416 = vmatprep.subr.msk.bf16.mxu0 %vm450_vm5, %v1477_v60  ;;  %v1487_v61 = vsel %vm450_vm5, %v1476_v59, 0 }
 0x19d   : > { %8410 = vmatmul.mubr.msk.bf16.vlgmr.msra.gmra.mrb[8].mxu0 %vm529_vm8, %v9588_v38 }
 0x19e   : > { %8419 = vmatmul.mubr.msk.bf16.vlgmr.msra.gmra.mrb[4].mxu1 %vm529_vm8, %v9589_v58  ;;  %1511 = vmatpush1.bf16.msra.mxu0 %v1487_v61  ;;  %v1470_v62 = vpop.permute.xlu1 %1469  ;;  %v1474_v63 = vpop.permute.xlu0 %1473 }
 0x19f   : > { %v1482_v0 = vsel %vm1475_vm12, %v1472_v56, %v1474_v63  ;;  %8422 = vmatprep.subr.msk.bf16.mxu1 %vm450_vm5, %v1474_v63  ;;  %v1481_v1 = vsel %vm1475_vm12, %v1470_v62, %v1472_v56  ;;  %1542 = vmatprep.mubr.bf16.mxu0 %v10068_v19  ;;  %v1480_v3 = vsel %vm1475_vm12, %v1468_v53, %v1470_v62 }
 0x1a0   : > { %8420 = vmatprep.subr.msk.bf16.mxu0 %vm450_vm5, %v1481_v1  ;;  %v1505_v2 = vsel %vm450_vm5, %v1482_v0, 0  ;;  %1671 = vmatprep.mubr.bf16.mxu1 %v10068_v19  ;;  %v1499_v7 = vsel %vm450_vm5, %v1480_v3, 0 }
 0x1a1   : > { %1640 = vmatpush1.bf16.msra.mxu1 %v1505_v2 }
 0x1a2   : > { %v1713_v4 = vpop.permute.xlu1 %1712  ;;  %v1711_v5 = vpop.permute.xlu0 %1710 }
 0x1a3   : > { %v1725_v6 = vsel %vm1722_vm13, %v1711_v5, %v1713_v4 }
 0x1a4   : > { %v1740_v11 = vsel %vm450_vm5, %v1725_v6, 0 }
 0x1a5   : > { %8417 = vmatmul.mubr.msk.bf16.vlgmr.msra.gmra.mrb[0].mxu0 %vm529_vm8, %v9589_v58 }
 0x1a6   : > { %1597 = vmatpush1.bf16.msra.mxu0 %v1499_v7  ;;  %8423 = vmatmul.mubr.msk.bf16.vlgmr.msra.gmra.mrb[0].mxu1 %vm529_vm8, %v9589_v58  ;;  %v1707_v8 = vpop.permute.xlu1 %1706  ;;  %v1715_v9 = vpop.permute.xlu0 %1714 }
 0x1a7   : > { %v1726_v10 = vsel %vm1722_vm13, %v1713_v4, %v1715_v9  ;;  %1628 = vmatprep.mubr.bf16.mxu0 %v10068_v19  ;;  %1832 = vmatprep.mubr.bf16.mxu1 %v10068_v19 }
 0x1a8   : > { %8429 = vmatprep.subr.msk.bf16.mxu1 %vm450_vm5, %v1726_v10 }
 0x1a9   : > { %1801 = vmatpush1.bf16.msra.mxu1 %v1740_v11  ;;  %v9593_v11 = vld [vmem:[%s12291_s1 + $0x40] sm:$0xff]  }
 0x1aa   : > { %v1719_v12 = vpop.permute.xlu1 %1718  ;;  %v1709_v13 = vpop.permute.xlu0 %1708 }
 0x1ab   : > { %v1723_v15 = vsel %vm1722_vm13, %v1707_v8, %v1709_v13  ;;  %v1724_v16 = vsel %vm1722_vm13, %v1709_v13, %v1711_v5 }
 0x1ac   : > { %8427 = vmatprep.subr.msk.bf16.mxu0 %vm450_vm5, %v1724_v16  ;;  %v1734_v17 = vsel %vm450_vm5, %v1723_v15, 0 }
 0x1ad   : > { %8421 = vmatmul.mubr.msk.bf16.vlgmr.msra.gmra.mrb[8].mxu0 %vm529_vm8, %v9589_v58 }
 0x1ae   : > { %8430 = vmatmul.mubr.msk.bf16.vlgmr.msra.gmra.mrb[4].mxu1 %vm529_vm8, %v9590_v14  ;;  %1758 = vmatpush1.bf16.msra.mxu0 %v1734_v17  ;;  %v1717_v18 = vpop.permute.xlu1 %1716  ;;  %v1721_v20 = vpop.permute.xlu0 %1720 }
 0x1af   : > { %v1729_v21 = vsel %vm1722_vm13, %v1719_v12, %v1721_v20  ;;  %8433 = vmatprep.subr.msk.bf16.mxu1 %vm450_vm5, %v1721_v20  ;;  %v1728_v22 = vsel %vm1722_vm13, %v1717_v18, %v1719_v12  ;;  %1789 = vmatprep.mubr.bf16.mxu0 %v10068_v19  ;;  %v1727_v24 = vsel %vm1722_vm13, %v1715_v9, %v1717_v18 }
 0x1b0   : > { %8431 = vmatprep.subr.msk.bf16.mxu0 %vm450_vm5, %v1728_v22  ;;  %v1752_v23 = vsel %vm450_vm5, %v1729_v21, 0  ;;  %1918 = vmatprep.mubr.bf16.mxu1 %v10068_v19  ;;  %v1746_v28 = vsel %vm450_vm5, %v1727_v24, 0 }
 0x1b1   : > { %1887 = vmatpush1.bf16.msra.mxu1 %v1752_v23 }
 0x1b2   : > { %v1960_v25 = vpop.permute.xlu1 %1959  ;;  %v1958_v26 = vpop.permute.xlu0 %1957 }
 0x1b3   : > { %v1972_v27 = vsel %vm1969_vm14, %v1958_v26, %v1960_v25 }
 0x1b4   : > { %v1987_v32 = vsel %vm450_vm5, %v1972_v27, 0  ;;  %v2733_v27 = vlaneseq }
 0x1b5   : > { %8428 = vmatmul.mubr.msk.bf16.vlgmr.msra.gmra.mrb[0].mxu0 %vm529_vm8, %v9590_v14 }
 0x1b6   : > { %1844 = vmatpush1.bf16.msra.mxu0 %v1746_v28  ;;  %8434 = vmatmul.mubr.msk.bf16.vlgmr.msra.gmra.mrb[0].mxu1 %vm529_vm8, %v9590_v14  ;;  %v1954_v29 = vpop.permute.xlu1 %1953  ;;  %v1962_v30 = vpop.permute.xlu0 %1961 }
 0x1b7   : > { %v1973_v31 = vsel %vm1969_vm14, %v1960_v25, %v1962_v30  ;;  %1875 = vmatprep.mubr.bf16.mxu0 %v10068_v19  ;;  %2079 = vmatprep.mubr.bf16.mxu1 %v10068_v19 }
 0x1b8   : > { %8440 = vmatprep.subr.msk.bf16.mxu1 %vm450_vm5, %v1973_v31 }
 0x1b9   : > { %2048 = vmatpush1.bf16.msra.mxu1 %v1987_v32  ;;  %v2730_v32 = vld [vmem:[#allocation7] sm:$0xff] }
 0x1ba   : > { %v1966_v33 = vpop.permute.xlu1 %1965  ;;  %v1956_v34 = vpop.permute.xlu0 %1955  ;;  %vm2731_vm1 = vcmp.gt.f32.partialorder %v2730_v32, 0.5 }
 0x1bb   : > { %v1970_v36 = vsel %vm1969_vm14, %v1954_v29, %v1956_v34  ;;  %v1971_v37 = vsel %vm1969_vm14, %v1956_v34, %v1958_v26 }
 0x1bc   : > { %8438 = vmatprep.subr.msk.bf16.mxu0 %vm450_vm5, %v1971_v37  ;;  %v1981_v38 = vsel %vm450_vm5, %v1970_v36, 0  ;;  %v10679_v36 = vshrl.u32 %v2733_v27, 7 }
 0x1bd   : > { %8432 = vmatmul.mubr.msk.bf16.vlgmr.msra.gmra.mrb[8].mxu0 %vm529_vm8, %v9590_v14 }
 0x1be   : > { %8441 = vmatmul.mubr.msk.bf16.vlgmr.msra.gmra.mrb[4].mxu1 %vm529_vm8, %v9591_v35  ;;  %2005 = vmatpush1.bf16.msra.mxu0 %v1981_v38  ;;  %v1964_v39 = vpop.permute.xlu1 %1963  ;;  %v1968_v40 = vpop.permute.xlu0 %1967  ;;  %v2751_v27 = vsub.s32 4, %v10679_v36 }
 0x1bf   : > { %v1976_v41 = vsel %vm1969_vm14, %v1966_v33, %v1968_v40  ;;  %8444 = vmatprep.subr.msk.bf16.mxu1 %vm450_vm5, %v1968_v40  ;;  %v1975_v42 = vsel %vm1969_vm14, %v1964_v39, %v1966_v33  ;;  %2036 = vmatprep.mubr.bf16.mxu0 %v10068_v19  ;;  %v1974_v44 = vsel %vm1969_vm14, %v1962_v30, %v1964_v39 }
 0x1c0   : > { %8442 = vmatprep.subr.msk.bf16.mxu0 %vm450_vm5, %v1975_v42  ;;  %v1999_v43 = vsel %vm450_vm5, %v1976_v41, 0  ;;  %2165 = vmatprep.mubr.bf16.mxu1 %v10068_v19  ;;  %v1993_v48 = vsel %vm450_vm5, %v1974_v44, 0 }
 0x1c1   : > { %2134 = vmatpush1.bf16.msra.mxu1 %v1999_v43  ;;  %v2743_v43 = vsub.s32 2, %v10679_v36 }
 0x1c2   : > { %v2207_v45 = vpop.permute.xlu1 %2206  ;;  %v2205_v46 = vpop.permute.xlu0 %2204 }
 0x1c3   : > { %v2219_v47 = vsel %vm2216_vm15, %v2205_v46, %v2207_v45 }
 0x1c4   : > { %v2234_v52 = vsel %vm450_vm5, %v2219_v47, 0  ;;  %v2747_v47 = vsub.s32 3, %v10679_v36 }
 0x1c5   : > { %8439 = vmatmul.mubr.msk.bf16.vlgmr.msra.gmra.mrb[0].mxu0 %vm529_vm8, %v9591_v35 }
 0x1c6   : > { %2091 = vmatpush1.bf16.msra.mxu0 %v1993_v48  ;;  %8445 = vmatmul.mubr.msk.bf16.vlgmr.msra.gmra.mrb[0].mxu1 %vm529_vm8, %v9591_v35  ;;  %v2201_v49 = vpop.permute.xlu1 %2200  ;;  %v2209_v50 = vpop.permute.xlu0 %2208 }
 0x1c7   : > { %v2220_v51 = vsel %vm2216_vm15, %v2207_v45, %v2209_v50  ;;  %2122 = vmatprep.mubr.bf16.mxu0 %v10068_v19  ;;  %2326 = vmatprep.mubr.bf16.mxu1 %v10068_v19 }
 0x1c8   : > { %8451 = vmatprep.subr.msk.bf16.mxu1 %vm450_vm5, %v2220_v51 }
 0x1c9   : > { %2295 = vmatpush1.bf16.msra.mxu1 %v2234_v52 }
 0x1ca   : > { %v2213_v53 = vpop.permute.xlu1 %2212  ;;  %v2203_v54 = vpop.permute.xlu0 %2202 }
 0x1cb   : > { %v2217_v56 = vsel %vm2216_vm15, %v2201_v49, %v2203_v54  ;;  %v2218_v57 = vsel %vm2216_vm15, %v2203_v54, %v2205_v46  ;;  %v10685_v46 = vsel %vm2731_vm1, 1, %v10068_v19 }
 0x1cc   : > { %8449 = vmatprep.subr.msk.bf16.mxu0 %vm450_vm5, %v2218_v57  ;;  %v2228_v58 = vsel %vm450_vm5, %v2217_v56, 0 }
 0x1cd   : > { %8443 = vmatmul.mubr.msk.bf16.vlgmr.msra.gmra.mrb[8].mxu0 %vm529_vm8, %v9591_v35 }
 0x1ce   : > { %8452 = vmatmul.mubr.msk.bf16.vlgmr.msra.gmra.mrb[4].mxu1 %vm529_vm8, %v9592_v55  ;;  %2252 = vmatpush1.bf16.msra.mxu0 %v2228_v58  ;;  %v2211_v59 = vpop.permute.xlu1 %2210  ;;  %v2215_v60 = vpop.permute.xlu0 %2214 }
 0x1cf   : > { %v2223_v61 = vsel %vm2216_vm15, %v2213_v53, %v2215_v60  ;;  %8455 = vmatprep.subr.msk.bf16.mxu1 %vm450_vm5, %v2215_v60  ;;  %v2222_v62 = vsel %vm2216_vm15, %v2211_v59, %v2213_v53  ;;  %2283 = vmatprep.mubr.bf16.mxu0 %v10068_v19  ;;  %v2221_v0 = vsel %vm2216_vm15, %v2209_v50, %v2211_v59 }
 0x1d0   : > { %8453 = vmatprep.subr.msk.bf16.mxu0 %vm450_vm5, %v2222_v62  ;;  %v2246_v63 = vsel %vm450_vm5, %v2223_v61, 0  ;;  %2412 = vmatprep.mubr.bf16.mxu1 %v10068_v19  ;;  %v2240_v4 = vsel %vm450_vm5, %v2221_v0, 0  ;;  %v10690_v59 = vrot.slane %v10685_v46, %v2743_v43  ;;  %v10694_v62 = vrot.slane %v10685_v46, %v2747_v47 }
 0x1d1   : > { %2381 = vmatpush1.bf16.msra.mxu1 %v2246_v63  ;;  %v2735_v0 = vsub.s32 0, %v10679_v36 }
 0x1d2   : > { %v2454_v1 = vpop.permute.xlu1 %2453  ;;  %v2452_v2 = vpop.permute.xlu0 %2451  ;;  %vm12304_vm3 = vcmp.eq.s32.totalorder %v10690_v59, 1  ;;  %vm2768_vm4 = vcmp.eq.s32.totalorder %v10694_v62, 1 }
 0x1d3   : > { %v2466_v3 = vsel %vm2463_vm0, %v2452_v2, %v2454_v1 }
 0x1d4   : > { %v2481_v8 = vsel %vm450_vm5, %v2466_v3, 0 }
 0x1d5   : > { %8450 = vmatmul.mubr.msk.bf16.vlgmr.msra.gmra.mrb[0].mxu0 %vm529_vm8, %v9592_v55 }
 0x1d6   : > { %2338 = vmatpush1.bf16.msra.mxu0 %v2240_v4  ;;  %8456 = vmatmul.mubr.msk.bf16.vlgmr.msra.gmra.mrb[0].mxu1 %vm529_vm8, %v9592_v55  ;;  %v2448_v5 = vpop.permute.xlu1 %2447  ;;  %v2456_v6 = vpop.permute.xlu0 %2455 }
 0x1d7   : > { %v2467_v7 = vsel %vm2463_vm0, %v2454_v1, %v2456_v6  ;;  %2369 = vmatprep.mubr.bf16.mxu0 %v10068_v19  ;;  %2573 = vmatprep.mubr.bf16.mxu1 %v10068_v19 }
 0x1d8   : > { %8462 = vmatprep.subr.msk.bf16.mxu1 %vm450_vm5, %v2467_v7 }
 0x1d9   : > { %2542 = vmatpush1.bf16.msra.mxu1 %v2481_v8 }
 0x1da   : > { %v2458_v9 = vpop.permute.xlu1 %2457  ;;  %v2450_v10 = vpop.permute.xlu0 %2449 }
 0x1db   : > { %v2464_v12 = vsel %vm2463_vm0, %v2448_v5, %v2450_v10  ;;  %v2465_v13 = vsel %vm2463_vm0, %v2450_v10, %v2452_v2  ;;  %v2468_v21 = vsel %vm2463_vm0, %v2456_v6, %v2458_v9  ;;  %v2759_v2 = vsub.s32 6, %v10679_v36 }
 0x1dc   : > { %8460 = vmatprep.subr.msk.bf16.mxu0 %vm450_vm5, %v2465_v13  ;;  %v2475_v14 = vsel %vm450_vm5, %v2464_v12, 0  ;;  %v2487_v22 = vsel %vm450_vm5, %v2468_v21, 0  ;;  %v2739_v5 = vsub.s32 1, %v10679_v36  ;;  %v2763_v10 = vsub.s32 7, %v10679_v36 }
 0x1dd   : > { %8454 = vmatmul.mubr.msk.bf16.vlgmr.msra.gmra.mrb[8].mxu0 %vm529_vm8, %v9592_v55 }
 0x1de   : > { %8463 = vmatmul.mubr.msk.bf16.vlgmr.msra.gmra.mrb[4].mxu1 %vm529_vm8, %v9593_v11  ;;  %2499 = vmatpush1.bf16.msra.mxu0 %v2475_v14  ;;  %v2462_v15 = vpop.permute.xlu1 %2461  ;;  %v2460_v16 = vpop.permute.xlu0 %2459 }
 0x1df   : > { %v2470_v17 = vsel %vm2463_vm0, %v2460_v16, %v2462_v15  ;;  %8466 = vmatprep.subr.msk.bf16.mxu1 %vm450_vm5, %v2462_v15  ;;  %v2469_v18 = vsel %vm2463_vm0, %v2458_v9, %v2460_v16  ;;  %2530 = vmatprep.mubr.bf16.mxu0 %v10068_v19  ;;  %v10706_v9 = vrot.slane %v10685_v46, %v2735_v0 }
 0x1e0   : > { %8464 = vmatprep.subr.msk.bf16.mxu0 %vm450_vm5, %v2469_v18  ;;  %v2493_v20 = vsel %vm450_vm5, %v2470_v17, 0  ;;  %2659 = vmatprep.mubr.bf16.mxu1 %v10068_v19  ;;  %v10712_v15 = vrot.slane %v10685_v46, %v2759_v2 }
 0x1e1   : > { %2628 = vmatpush1.bf16.msra.mxu1 %v2493_v20  ;;  %vm2765_vm5 = vcmp.eq.s32.totalorder %v10706_v9, 1 }
 0x1e2   : > { %vm12305_vm6 = vcmp.eq.s32.totalorder %v10712_v15, 1 }
 0x1e5   : > { %8461 = vmatmul.mubr.msk.bf16.vlgmr.msra.gmra.mrb[0].mxu0 %vm529_vm8, %v9593_v11 }
 0x1e6   : > { %2585 = vmatpush1.bf16.msra.mxu0 %v2487_v22  ;;  %8467 = vmatmul.mubr.msk.bf16.vlgmr.msra.gmra.mrb[0].mxu1 %vm529_vm8, %v9593_v11 }
 0x1e7   : > { %2616 = vmatprep.mubr.bf16.mxu0 %v10068_v19  ;;  %3004 = vmatprep.mubr.bf16.mxu1 %v10068_v19 }
 0x1ed   : > { %8465 = vmatmul.mubr.msk.bf16.vlgmr.msra.gmra.mrb[8].mxu0 %vm529_vm8, %v9593_v11 }
 0x1ee   : > { %2951 = vmatprep.mubr.bf16.mxu0 %v10068_v19 }
 0x1f0   : > { %v2691_v29 = vpop.permute.xlu0 %2690 }
 0x1f1   : > { %v10677_v35 = vpop.permute.xlu1 %2695 }
 0x238   : > { %v634_v23 = vpop.f32.mrb[4].mxu0 }
 0x239   : > { %v636_v24 = vpop.f32.mrb[5].mxu0 }
 0x23a   : > { %v638_v25 = vpop.f32.mrb[6].mxu0 }
 0x23b   : > { %v640_v26 = vpop.f32.mrb[7].mxu0 }
 0x2b1   : > { %v2575_v28 = vpop.f32.mrb[4].mxu1 }
 0x2b2   : > { %v8985_v30 = vadd.f32 %v2575_v28, %v634_v23  ;;  %v2577_v31 = vpop.f32.mrb[5].mxu1 }
 0x2b3   : > { %v8986_v33 = vadd.f32 %v2577_v31, %v636_v24  ;;  %v2579_v34 = vpop.f32.mrb[6].mxu1  ;;  %v10730_v31 = vrot.slane %v10685_v46, %v2763_v10 }
 0x2b4   : > { %v8987_v37 = vadd.f32 %v2579_v34, %v638_v25  ;;  %v2581_v38 = vpop.f32.mrb[7].mxu1  ;;  %v2700_v39 = vadd.f32 %v8985_v30, %v2691_v29  ;;  %v2755_v30 = vsub.s32 5, %v10679_v36 }
 0x2b5   : > { %v8988_v40 = vadd.f32 %v2581_v38, %v640_v26  ;;  %v2701_v41 = vadd.f32 %v8986_v33, %v2691_v29  ;;  %v10725_v26 = vrot.slane %v10685_v46, %v2739_v5  ;;  %vm12306_vm1 = vcmp.eq.s32.totalorder %v10730_v31, 1 }
 0x2b6   : > { %v2708_v42 = vadd.f32 %v8987_v37, %v10677_v35  ;;  %9834 = vtanh.f32 %v2700_v39 }
 0x2b7   : > { %v2709_v44 = vadd.f32 %v8988_v40, %v10677_v35  ;;  %9836 = vtanh.f32 %v2701_v41  ;;  %vm2766_vm8 = vcmp.eq.s32.totalorder %v10725_v26, 1  ;;  %v10743_v40 = vrot.slane %v10685_v46, %v2755_v30  ;;  %v9660_v26 = vld [vmem:[%s12297_s7 + $0x100] ss:$8 sps:$4 sm:$0xff]  }
 0x2b8   : > { %v2532_v45 = vpop.f32.mrb[0].mxu0  ;;  %9838 = vtanh.f32 %v2708_v42 }
 0x2b9   : > { %v2698_v48 = vadd.f32 %v2691_v29, %v2532_v45  ;;  %v2661_v49 = vpop.f32.mrb[0].mxu1  ;;  %v2534_v50 = vpop.f32.mrb[1].mxu0  ;;  %9840 = vtanh.f32 %v2709_v44 }
 0x2ba   : > { %v2704_v51 = vadd.f32 %v2691_v29, %v2661_v49  ;;  %v2699_v52 = vadd.f32 %v2691_v29, %v2534_v50  ;;  %v2663_v53 = vpop.f32.mrb[1].mxu1  ;;  %v2536_v54 = vpop.f32.mrb[2].mxu0 }
 0x2bb   : > { %9842 = vtanh.f32 %v2698_v48  ;;  %v2705_v55 = vadd.f32 %v2691_v29, %v2663_v53  ;;  %v2706_v56 = vadd.f32 %v10677_v35, %v2536_v54  ;;  %v2665_v57 = vpop.f32.mrb[2].mxu1  ;;  %v2538_v58 = vpop.f32.mrb[3].mxu0 }
 0x2bc   : > { %9844 = vtanh.f32 %v2704_v51  ;;  %v2712_v60 = vadd.f32 %v10677_v35, %v2665_v57  ;;  %v2667_v61 = vpop.f32.mrb[3].mxu1  ;;  %v2707_v63 = vadd.f32 %v10677_v35, %v2538_v58 }
 0x2bd   : > { %9846 = vtanh.f32 %v2699_v52  ;;  %v2713_v1 = vadd.f32 %v10677_v35, %v2667_v61 }
 0x2be   : > { %9848 = vtanh.f32 %v2705_v55 }
 0x2bf   : > { %9850 = vtanh.f32 %v2706_v56 }
 0x2c0   : > { %v9835_v3 = vpop.eup %9834  ;;  %9852 = vtanh.f32 %v2712_v60  ;;  %v2618_v4 = vpop.f32.mrb[8].mxu0 }
 0x2c1   : > { %v9837_v6 = vpop.eup %9836  ;;  %9854 = vtanh.f32 %v2707_v63  ;;  %v2702_v7 = vadd.f32 %v2691_v29, %v2618_v4  ;;  %v2620_v8 = vpop.f32.mrb[9].mxu0  ;;  %v2775_v14 = vsel %vm12304_vm3, %v9835_v3, 0.0 }
 0x2c2   : > { %v9839_v11 = vpop.eup %9838  ;;  %9856 = vtanh.f32 %v2713_v1  ;;  %v2703_v12 = vadd.f32 %v2691_v29, %v2620_v8  ;;  %v2622_v13 = vpop.f32.mrb[10].mxu0  ;;  %v2776_v21 = vsel %vm2768_vm4, %v9837_v6, 0.0 }
 0x2c3   : > { %v9841_v16 = vpop.eup %9840  ;;  %9858 = vtanh.f32 %v2702_v7  ;;  %v2710_v17 = vadd.f32 %v10677_v35, %v2622_v13  ;;  %v2624_v18 = vpop.f32.mrb[11].mxu0  ;;  %v2783_v20 = vsel %vm12304_vm3, %v9839_v11, 0.0 }
 0x2c4   : > { %9860 = vtanh.f32 %v2703_v12  ;;  %v2711_v22 = vadd.f32 %v10677_v35, %v2624_v18  ;;  %v2791_v23 = vpack.c.bf16 %v2783_v20, %v2775_v14  ;;  %v2784_v24 = vsel %vm2768_vm4, %v9841_v16, 0.0 }
 0x2c5   : > { %v9843_v25 = vpop.eup %9842  ;;  %9862 = vtanh.f32 %v2710_v17  ;;  %v2792_v28 = vpack.c.bf16 %v2784_v24, %v2776_v21  ;;  %v10736_v35 = vrot.slane %v10685_v46, %v2751_v27  ;;  %v10878_v27 = vld [vmem:[%s12293_s3 + $0x10] sm:$0xff]  }
 0x2c6   : > { %v9845_v29 = vpop.eup %9844  ;;  %9864 = vtanh.f32 %v2711_v22  ;;  %v2773_v38 = vsel %vm2765_vm5, %v9843_v25, 0.0 }
 0x2c7   : > { %v9847_v32 = vpop.eup %9846  ;;  %v2779_v43 = vsel %vm12305_vm6, %v9845_v29, 0.0  ;;  %vm12308_vm3 = vcmp.eq.s32.totalorder %v10736_v35, 1 }
 0x2c8   : > { %v9849_v33 = vpop.eup %9848  ;;  %v2774_v47 = vsel %vm2766_vm8, %v9847_v32, 0.0 }
 0x2c9   : > { %v9851_v34 = vpop.eup %9850  ;;  %v2780_v51 = vsel %vm12306_vm1, %v9849_v33, 0.0 }
 0x2ca   : > { %v9853_v37 = vpop.eup %9852  ;;  %v2781_v39 = vsel %vm2765_vm5, %v9851_v34, 0.0 }
 0x2cb   : > { %v9855_v41 = vpop.eup %9854  ;;  %v2789_v42 = vpack.c.bf16 %v2781_v39, %v2773_v38  ;;  %v2787_v44 = vsel %vm12305_vm6, %v9853_v37, 0.0  ;;  %vm2770_vm6 = vcmp.eq.s32.totalorder %v10743_v40, 1  ;;  %v10896_v38 = vld [vmem:[%s12293_s3 + $0x18] sm:$0xff]  }
 0x2cc   : > { %v9857_v45 = vpop.eup %9856  ;;  %v2782_v48 = vsel %vm2766_vm8, %v9855_v41, 0.0  ;;  %v2795_v49 = vpack.c.bf16 %v2787_v44, %v2779_v43 }
 0x2cd   : > { %v9859_v46 = vpop.eup %9858  ;;  %2805 = vrot.lane.b32.xlu1 %v2789_v42, %s10067_s16  ;;  %v2790_v50 = vpack.c.bf16 %v2782_v48, %v2774_v47  ;;  %v2788_v52 = vsel %vm12306_vm1, %v9857_v45, 0.0  ;;  %vm12307_vm1 = vcmask 1047808  }
 0x2ce   : > { %v9861_v53 = vpop.eup %9860  ;;  %v2796_v54 = vpack.c.bf16 %v2788_v52, %v2780_v51  ;;  %v2777_v57 = vsel %vm12308_vm3, %v9859_v46, 0.0  ;;  %v5463_v51 = vld [vmem:[%s12294_s4 + $0x8] sm:$0xff] }
 0x2cf   : > { %v9863_v55 = vpop.eup %9862  ;;  %2807 = vrot.lane.b32.xlu0 %v2790_v50, %s10067_s16  ;;  %v2778_v61 = vsel %vm2770_vm6, %v9861_v53, 0.0  ;;  %v5465_v53 = vld [vmem:[%s12294_s4 + $0x18] sm:$0xff] }
 0x2d0   : > { %v9865_v56 = vpop.eup %9864  ;;  %v2785_v58 = vsel %vm12308_vm3, %v9863_v55, 0.0  ;;  %vm2912_vm3 = vcmask 130048  }
 0x2d1   : > { %2809 = vrot.lane.b32.xlu1 %v2791_v23, %s10067_s16  ;;  %v2793_v60 = vpack.c.bf16 %v2785_v58, %v2777_v57  ;;  %v2786_v63 = vsel %vm2770_vm6, %v9865_v56, 0.0 }
 0x2d2   : > { %v2794_v1 = vpack.c.bf16 %v2786_v63, %v2778_v61 }
 0x2d3   : > { %2813 = vrot.lane.b32.xlu0 %v2793_v60, %s10067_s16  ;;  %v10977_v60 = vld [vmem:[%s12293_s3 + $0x8] sm:$0xff]  }
 0x2d5   : > { %2815 = vrot.lane.b32.xlu1 %v2794_v1, %s10067_s16 }
 0x2d7   : > { %2817 = vrot.lane.b32.xlu0 %v2795_v49, %s10067_s16 }
 0x2d9   : > { %2811 = vrot.lane.b32.xlu1 %v2792_v28, %s10067_s16 }
 0x33f   : > { %v2806_v2 = vpop.permute.xlu1 %2805 }
 0x340   : > { %2837 = vst.msk [vmem:[#allocation3] sm:$0xff] %vm12307_vm1, %v2806_v2  ;;  %vm2844_vm1 = vcmask 293888  }
 0x341   : > { %v2808_v3 = vpop.permute.xlu0 %2807 }
 0x342   : > { %v10777_v4 = vsel %vm448_vm2, %v2806_v2, %v2808_v3 }
 0x343   : > { %v2810_v6 = vpop.permute.xlu1 %2809  ;;  %2883 = vrot.lane.b32.xlu0 %v10777_v4, %s10069_s18 }
 0x344   : > { %v10782_v7 = vsel %vm448_vm2, %v2808_v3, %v2810_v6 }
 0x345   : > { %v2814_v8 = vpop.permute.xlu0 %2813  ;;  %2885 = vrot.lane.b32.xlu1 %v10782_v7, %s10069_s18 }
 0x347   : > { %v2816_v10 = vpop.permute.xlu1 %2815  ;;  %v10786_v11 = vld [vmem:[#allocation3] sm:$0xff] }
 0x348   : > { %v10789_v12 = vsel %vm448_vm2, %v2814_v8, %v2816_v10  ;;  %2881 = vrot.lane.b32.xlu0 %v10786_v11, %s10069_s18 }
 0x349   : > { %v2818_v13 = vpop.permute.xlu0 %2817  ;;  %2819 = vrot.lane.b32.xlu1 %v2796_v54, %s10067_s16  ;;  %v10956_v54 = vld [vmem:[%s12293_s3] sm:$0xff]  }
 0x34a   : > { %v10795_v14 = vsel %vm448_vm2, %v2816_v10, %v2818_v13  ;;  %v11024_v10 = vld [vmem:[%s12293_s3 + $0x28] sm:$0xff]  }
 0x34b   : > { %v2812_v16 = vpop.permute.xlu1 %2811 }
 0x34c   : > { %v10798_v17 = vsel %vm448_vm2, %v2810_v6, %v2812_v16  ;;  %v10801_v18 = vsel %vm448_vm2, %v2812_v16, %v2814_v8  ;;  %2891 = vrot.lane.b32.xlu0 %v10789_v12, %s10069_s18 }
 0x34d   : > { %2893 = vrot.lane.b32.xlu1 %v10795_v14, %s10069_s18 }
 0x350   : > { %2889 = vrot.lane.b32.xlu0 %v10801_v18, %s10069_s18 }
 0x351   : > { %3143 = vrot.lane.b32.xlu1 %v10777_v4, %s10070_s22 }
 0x354   : > { %3145 = vrot.lane.b32.xlu0 %v10782_v7, %s10070_s22 }
 0x355   : > { %3141 = vrot.lane.b32.xlu1 %v10786_v11, %s10070_s22 }
 0x358   : > { %3151 = vrot.lane.b32.xlu0 %v10789_v12, %s10070_s22 }
 0x359   : > { %3153 = vrot.lane.b32.xlu1 %v10795_v14, %s10070_s22 }
 0x35c   : > { %3149 = vrot.lane.b32.xlu0 %v10801_v18, %s10070_s22 }
 0x35d   : > { %2887 = vrot.lane.b32.xlu1 %v10798_v17, %s10069_s18 }
 0x360   : > { %3407 = vrot.lane.b32.xlu0 %v10777_v4, %s10071_s25 }
 0x361   : > { %3409 = vrot.lane.b32.xlu1 %v10782_v7, %s10071_s25 }
 0x364   : > { %3405 = vrot.lane.b32.xlu0 %v10786_v11, %s10071_s25 }
 0x365   : > { %3415 = vrot.lane.b32.xlu1 %v10789_v12, %s10071_s25 }
 0x368   : > { %3417 = vrot.lane.b32.xlu0 %v10795_v14, %s10071_s25 }
 0x36c   : > { %3413 = vrot.lane.b32.xlu0 %v10801_v18, %s10071_s25 }
 0x370   : > { %3703 = vrot.lane.b32.xlu0 %v10777_v4, %s10072_s27 }
 0x374   : > { %3701 = vrot.lane.b32.xlu0 %v10786_v11, %s10072_s27 }
 0x378   : > { %3713 = vrot.lane.b32.xlu0 %v10795_v14, %s10072_s27 }
 0x37c   : > { %3709 = vrot.lane.b32.xlu0 %v10801_v18, %s10072_s27 }
 0x380   : > { %3999 = vrot.lane.b32.xlu0 %v10777_v4, %s10073_s28 }
 0x384   : > { %3997 = vrot.lane.b32.xlu0 %v10786_v11, %s10073_s28 }
 0x388   : > { %4009 = vrot.lane.b32.xlu0 %v10795_v14, %s10073_s28 }
 0x38c   : > { %4005 = vrot.lane.b32.xlu0 %v10801_v18, %s10073_s28 }
 0x390   : > { %4295 = vrot.lane.b32.xlu0 %v10777_v4, %s10074_s29 }
 0x394   : > { %4293 = vrot.lane.b32.xlu0 %v10786_v11, %s10074_s29 }
 0x398   : > { %4305 = vrot.lane.b32.xlu0 %v10795_v14, %s10074_s29 }
 0x39c   : > { %4301 = vrot.lane.b32.xlu0 %v10801_v18, %s10074_s29 }
 0x3a0   : > { %4591 = vrot.lane.b32.xlu0 %v10777_v4, %s10075_s30 }
 0x3a4   : > { %4589 = vrot.lane.b32.xlu0 %v10786_v11, %s10075_s30 }
 0x3a8   : > { %4601 = vrot.lane.b32.xlu0 %v10795_v14, %s10075_s30 }
 0x3ac   : > { %4597 = vrot.lane.b32.xlu0 %v10801_v18, %s10075_s30 }
 0x3b0   : > { %4887 = vrot.lane.b32.xlu0 %v10777_v4, %s10076_s12 }
 0x3b4   : > { %4885 = vrot.lane.b32.xlu0 %v10786_v11, %s10076_s12 }
 0x3b5   : > { %v2884_v20 = vpop.permute.xlu0 %2883 }
 0x3b7   : > { %v2886_v21 = vpop.permute.xlu1 %2885 }
 0x3b8   : > { %4897 = vrot.lane.b32.xlu0 %v10795_v14, %s10076_s12  ;;  %v2898_v22 = vsel %vm521_vm7, %v2884_v20, %v2886_v21 }
 0x3b9   : > { %2919 = vmatprep.subr.bf16.mxu0 %v2898_v22 }
 0x3ba   : > { %v2882_v23 = vpop.permute.xlu0 %2881 }
 0x3bb   : > { %v2897_v24 = vsel %vm521_vm7, %v2882_v23, %v2884_v20  ;;  %v2820_v25 = vpop.permute.xlu1 %2819 }
 0x3bc   : > { %4893 = vrot.lane.b32.xlu0 %v10801_v18, %s10076_s12  ;;  %2920 = vmatpush1.bf16.msra.mxu0 %v2897_v24  ;;  %v2827_v28 = vsel %vm448_vm2, %v2818_v13, %v2820_v25 }
 0x3bd   : > { %2845 = vst.msk [vmem:[#allocation3 + $0x38] sm:$0xff] %vm2844_vm1, %v2827_v28 }
 0x3be   : > { %v2892_v29 = vpop.permute.xlu0 %2891 }
 0x3bf   : > { %8474 = vmatmul.mubr.msk.bf16.vlgmr.msra.gmra.mrb[12].mxu0 %vm2912_vm3, %v10878_v27  ;;  %v10885_v30 = vpop.permute.xlu1 %2893 }
 0x3c0   : > { %5183 = vrot.lane.b32.xlu0 %v10777_v4, %s10077_s19  ;;  %v2902_v32 = vsel %vm521_vm7, %v2892_v29, %v10885_v30  ;;  %2961 = vmatprep.mubr.bf16.mxu0 %v10068_v19  ;;  %v11008_v4 = vld [vmem:[%s12293_s3 + $0x20] sm:$0xff]  }
 0x3c1   : > { %3025 = vmatprep.subr.bf16.mxu0 %v2902_v32 }
 0x3c2   : > { %v2890_v33 = vpop.permute.xlu0 %2889 }
 0x3c3   : > { %v2901_v34 = vsel %vm521_vm7, %v2890_v33, %v2892_v29  ;;  %v3144_v37 = vpop.permute.xlu1 %3143 }
 0x3c4   : > { %5181 = vrot.lane.b32.xlu0 %v10786_v11, %s10077_s19  ;;  %3026 = vmatpush1.bf16.msra.mxu0 %v2901_v34  ;;  %v10900_v39 = vld [vmem:[#allocation3 + $0x38] sm:$0xff]  ;;  %v5462_v11 = vld [vmem:[%s12294_s4] sm:$0xff] }
 0x3c5   : > { %2895 = vrot.lane.b32.xlu1 %v10900_v39, %s10069_s18  ;;  %v11099_v34 = vld [vmem:[%s12293_s3 + $0x38] sm:$0xff]  }
 0x3c6   : > { %v10904_v41 = vpop.permute.xlu0 %3145 }
 0x3c7   : > { %8475 = vmatmul.mubr.msk.bf16.gmra.mrb[16].mxu0 %vm2912_vm3, %v10896_v38  ;;  %v3158_v42 = vsel %vm750_vm9, %v3144_v37, %v10904_v41  ;;  %v3142_v43 = vpop.permute.xlu1 %3141 }
 0x3c8   : > { %4891 = vrot.lane.b32.xlu0 %v10798_v17, %s10076_s12  ;;  %3178 = vmatprep.subr.bf16.mxu0 %v3158_v42  ;;  %v3157_v47 = vsel %vm750_vm9, %v3142_v43, %v3144_v37 }
 0x3c9   : > { %3147 = vrot.lane.b32.xlu1 %v10798_v17, %s10070_s22  ;;  %3057 = vmatprep.mubr.bf16.mxu0 %v10068_v19 }
 0x3ca   : > { %v3152_v45 = vpop.permute.xlu0 %3151 }
 0x3cb   : > { %v10915_v44 = vpop.permute.xlu1 %3153 }
 0x3cc   : > { %5187 = vrot.lane.b32.xlu0 %v10798_v17, %s10077_s19  ;;  %v3162_v49 = vsel %vm750_vm9, %v3152_v45, %v10915_v44 }
 0x3cd   : > { %3705 = vrot.lane.b32.xlu1 %v10782_v7, %s10072_s27 }
 0x3ce   : > { %v10942_v52 = vpop.permute.xlu0 %3149 }
 0x3cf   : > { %8478 = vmatmul.mubr.msk.bf16.vlgmr.msra.gmra.mrb[20].mxu0 %vm2912_vm3, %v10878_v27  ;;  %v2888_v48 = vpop.permute.xlu1 %2887  ;;  %v3161_v57 = vsel %vm750_vm9, %v10942_v52, %v3152_v45 }
 0x3d0   : > { %3179 = vmatpush1.bf16.msra.mxu0 %v3157_v47  ;;  %5191 = vrot.lane.b32.xlu0 %v10789_v12, %s10077_s19  ;;  %v2900_v46 = vsel %vm521_vm7, %v2888_v48, %v2890_v33  ;;  %v2899_v50 = vsel %vm521_vm7, %v2886_v21, %v2888_v48 }
 0x3d1   : > { %3284 = vmatprep.subr.bf16.mxu0 %v3162_v49  ;;  %3711 = vrot.lane.b32.xlu1 %v10789_v12, %s10072_s27 }
 0x3d2   : > { %2972 = vmatprep.subr.bf16.mxu1 %v2900_v46  ;;  %3067 = vmatprep.mubr.bf16.mxu0 %v10068_v19  ;;  %v3408_v55 = vpop.permute.xlu0 %3407 }
 0x3d3   : > { %2973 = vmatpush1.bf16.msra.mxu1 %v2899_v50  ;;  %v10958_v56 = vpop.permute.xlu1 %3409 }
 0x3d4   : > { %5195 = vrot.lane.b32.xlu0 %v10900_v39, %s10077_s19  ;;  %v3422_v58 = vsel %vm981_vm10, %v3408_v55, %v10958_v56 }
 0x3d5   : > { %3155 = vrot.lane.b32.xlu1 %v10900_v39, %s10070_s22 }
 0x3d6   : > { %8476 = vmatmul.mubr.msk.bf16.vlgmr.msra.gmra.mrb[8].mxu1 %vm2912_vm3, %v10878_v27  ;;  %v3406_v61 = vpop.permute.xlu0 %3405 }
 0x3d7   : > { %8479 = vmatmul.mubr.msk.bf16.gmra.mrb[24].mxu0 %vm2912_vm3, %v10896_v38  ;;  %3014 = vmatprep.mubr.bf16.mxu1 %v10068_v19  ;;  %v3421_v1 = vsel %vm981_vm10, %v3406_v61, %v3408_v55  ;;  %v3416_v2 = vpop.permute.xlu1 %3415 }
 0x3d8   : > { %5473 = vperm.xlu0 %9579, %v5463_v51   ;;  %3210 = vmatprep.mubr.bf16.mxu0 %v10068_v19 }
 0x3d9   : > { %3411 = vrot.lane.b32.xlu1 %v10798_v17, %s10071_s25 }
 0x3da   : > { %v10986_v63 = vpop.permute.xlu0 %3417 }
 0x3db   : > { %v3426_v3 = vsel %vm981_vm10, %v3416_v2, %v10986_v63 }
 0x3dc   : > { %5483 = vperm.xlu0 %9579, %v5465_v53  }
 0x3dd   : > { %4001 = vrot.lane.b32.xlu1 %v10782_v7, %s10073_s28 }
 0x3de   : > { %8477 = vmatmul.mubr.msk.bf16.gmra.mrb[12].mxu1 %vm2912_vm3, %v10896_v38  ;;  %v11010_v6 = vpop.permute.xlu0 %3413 }
 0x3df   : > { %8484 = vmatmul.mubr.msk.bf16.vlgmr.msra.gmra.mrb[12].mxu0 %vm2912_vm3, %v10956_v54  ;;  %3110 = vmatprep.mubr.bf16.mxu1 %v10068_v19  ;;  %v3425_v8 = vsel %vm981_vm10, %v11010_v6, %v3416_v2 }
 0x3e0   : > { %3285 = vmatpush1.bf16.msra.mxu0 %v3161_v57  ;;  %3220 = vmatprep.mubr.bf16.mxu0 %v10068_v19  ;;  %v11153_v57 = vld [vmem:[%s12293_s3 + $0x48] sm:$0xff]  }
 0x3e1   : > { %3442 = vmatprep.subr.bf16.mxu0 %v3422_v58  ;;  %4007 = vrot.lane.b32.xlu1 %v10789_v12, %s10073_s28 }
 0x3e5   : > { %3419 = vrot.lane.b32.xlu1 %v10900_v39, %s10071_s25 }
 0x3e7   : > { %8485 = vmatmul.mubr.msk.bf16.gmra.mrb[16].mxu0 %vm2912_vm3, %v10977_v60 }
 0x3e8   : > { %3316 = vmatprep.mubr.bf16.mxu0 %v10068_v19 }
 0x3e9   : > { %3707 = vrot.lane.b32.xlu1 %v10798_v17, %s10072_s27 }
 0x3ed   : > { %4297 = vrot.lane.b32.xlu1 %v10782_v7, %s10074_s29 }
 0x3ef   : > { %8488 = vmatmul.mubr.msk.bf16.vlgmr.msra.gmra.mrb[20].mxu0 %vm2912_vm3, %v10956_v54 }
 0x3f0   : > { %3443 = vmatpush1.bf16.msra.mxu0 %v3421_v1  ;;  %3326 = vmatprep.mubr.bf16.mxu0 %v10068_v19 }
 0x3f1   : > { %3548 = vmatprep.subr.bf16.mxu0 %v3426_v3  ;;  %4303 = vrot.lane.b32.xlu1 %v10789_v12, %s10074_s29 }
 0x3f5   : > { %3715 = vrot.lane.b32.xlu1 %v10900_v39, %s10072_s27 }
 0x3f7   : > { %8489 = vmatmul.mubr.msk.bf16.gmra.mrb[24].mxu0 %vm2912_vm3, %v10977_v60 }
 0x3f8   : > { %3474 = vmatprep.mubr.bf16.mxu0 %v10068_v19 }
 0x3f9   : > { %4003 = vrot.lane.b32.xlu1 %v10798_v17, %s10073_s28 }
 0x3fd   : > { %4593 = vrot.lane.b32.xlu1 %v10782_v7, %s10075_s30 }
 0x3ff   : > { %8498 = vmatmul.mubr.msk.bf16.vlgmr.msra.gmra.mrb[12].mxu0 %vm2912_vm3, %v11008_v4 }
 0x400   : > { %3549 = vmatpush1.bf16.msra.mxu0 %v3425_v8  ;;  %3484 = vmatprep.mubr.bf16.mxu0 %v10068_v19 }
 0x401   : > { %4599 = vrot.lane.b32.xlu1 %v10789_v12, %s10075_s30 }
 0x405   : > { %4011 = vrot.lane.b32.xlu1 %v10900_v39, %s10073_s28 }
 0x407   : > { %8499 = vmatmul.mubr.msk.bf16.gmra.mrb[16].mxu0 %vm2912_vm3, %v11024_v10 }
 0x408   : > { %3580 = vmatprep.mubr.bf16.mxu0 %v10068_v19 }
 0x409   : > { %4299 = vrot.lane.b32.xlu1 %v10798_v17, %s10074_s29 }
 0x40d   : > { %4889 = vrot.lane.b32.xlu1 %v10782_v7, %s10076_s12 }
 0x40f   : > { %8502 = vmatmul.mubr.msk.bf16.vlgmr.msra.gmra.mrb[20].mxu0 %vm2912_vm3, %v11008_v4 }
 0x410   : > { %3590 = vmatprep.mubr.bf16.mxu0 %v10068_v19 }
 0x411   : > { %4895 = vrot.lane.b32.xlu1 %v10789_v12, %s10076_s12  ;;  %v3704_v12 = vpop.permute.xlu0 %3703 }
 0x415   : > { %4307 = vrot.lane.b32.xlu1 %v10900_v39, %s10074_s29  ;;  %v3702_v13 = vpop.permute.xlu0 %3701 }
 0x416   : > { %v3717_v24 = vsel %vm1228_vm11, %v3702_v13, %v3704_v12 }
 0x417   : > { %8503 = vmatmul.mubr.msk.bf16.gmra.mrb[24].mxu0 %vm2912_vm3, %v11024_v10 }
 0x418   : > { %3770 = vmatprep.mubr.bf16.mxu0 %v10068_v19 }
 0x419   : > { %4595 = vrot.lane.b32.xlu1 %v10798_v17, %s10075_s30 }
 0x41d   : > { %5185 = vrot.lane.b32.xlu1 %v10782_v7, %s10077_s19  ;;  %v5464_v7 = vld [vmem:[%s12294_s4 + $0x10] sm:$0xff] }
 0x421   : > { %4603 = vrot.lane.b32.xlu1 %v10900_v39, %s10075_s30  ;;  %s10083_s30 = smov 79  }
 0x425   : > { %4899 = vrot.lane.b32.xlu1 %v10900_v39, %s10076_s12 }
 0x429   : > { %5189 = vrot.lane.b32.xlu1 %v10801_v18, %s10077_s19  ;;  %v11065_v18 = vpop.permute.xlu0 %3713 }
 0x42d   : > { %5193 = vrot.lane.b32.xlu1 %v10795_v14, %s10077_s19  ;;  %v11079_v25 = vpop.permute.xlu0 %3709 }
 0x431   : > { %5468 = vperm.xlu1 %9580, %v5462_v11   ;;  %v4000_v32 = vpop.permute.xlu0 %3999 }
 0x435   : > { %5478 = vperm.xlu1 %9580, %v5464_v7   ;;  %v11187_v7 = vld [vmem:[%s12293_s3 + $0x50] sm:$0xff]  }
 0x437   : > { %v2896_v16 = vpop.permute.xlu1 %2895 }
 0x438   : > { %3078 = vmatprep.subr.bf16.mxu1 %v2896_v16  ;;  %v2903_v17 = vsel %vm521_vm7, %v10885_v30, %v2896_v16  ;;  %vm11542_vm7 = vmpackc.low %vm2766_vm8, %vm2766_vm8  ;;  %vm12332_vm8 = vcmp.eq.s32.totalorder %v10736_v35, 1  ;;  %v9759_v35 = vld [vmem:[%s12297_s7 + $0x310] ss:$8 sps:$4 sm:$0xff]  }
 0x439   : > { %3079 = vmatpush1.bf16.msra.mxu1 %v2903_v17  ;;  %vm8731_vm1 = vmpackc.low %vm12332_vm8, %vm12332_vm8 }
 0x43b   : > { %v3148_v14 = vpop.permute.xlu1 %3147 }
 0x43c   : > { %8480 = vmatmul.mubr.msk.bf16.vlgmr.msra.gmra.mrb[16].mxu1 %vm2912_vm3, %v10878_v27  ;;  %v3160_v20 = vsel %vm750_vm9, %v3148_v14, %v10942_v52  ;;  %v3159_v21 = vsel %vm750_vm9, %v10904_v41, %v3148_v14  ;;  %v11084_v27 = vld [vmem:[%s12293_s3 + $0x30] sm:$0xff]   ;;  %v3998_v41 = vpop.permute.xlu0 %3997  ;;  %v11137_v52 = vld [vmem:[%s12293_s3 + $0x40] sm:$0xff]   ;;  %v11203_v14 = vld [vmem:[%s12293_s3 + $0x58] sm:$0xff]  }
 0x43d   : > { %3231 = vmatprep.subr.bf16.mxu1 %v3160_v20  ;;  %3120 = vmatprep.mubr.bf16.mxu1 %v10068_v19  ;;  %v4013_v48 = vsel %vm1475_vm12, %v3998_v41, %v4000_v32 }
 0x43e   : > { %3232 = vmatpush1.bf16.msra.mxu1 %v3159_v21 }
 0x43f   : > { %v11074_v22 = vpop.permute.xlu1 %3705 }
 0x440   : > { %v3718_v23 = vsel %vm1228_vm11, %v3704_v12, %v11074_v22 }
 0x441   : > { %3738 = vmatprep.subr.bf16.mxu0 %v3718_v23 }
 0x442   : > { %3739 = vmatpush1.bf16.msra.mxu0 %v3717_v24 }
 0x443   : > { %v3712_v28 = vpop.permute.xlu1 %3711 }
 0x444   : > { %8481 = vmatmul.mubr.msk.bf16.gmra.mrb[20].mxu1 %vm2912_vm3, %v10896_v38  ;;  %v3722_v29 = vsel %vm1228_vm11, %v3712_v28, %v11065_v18  ;;  %v3721_v30 = vsel %vm1228_vm11, %v11079_v25, %v3712_v28 }
 0x445   : > { %8512 = vmatmul.mubr.msk.bf16.vlgmr.msra.gmra.mrb[12].mxu0 %vm2912_vm3, %v11084_v27  ;;  %3844 = vmatprep.subr.bf16.mxu0 %v3722_v29 }
 0x446   : > { %3845 = vmatpush1.bf16.msra.mxu0 %v3721_v30  ;;  %3263 = vmatprep.mubr.bf16.mxu1 %v10068_v19 }
 0x447   : > { %v3156_v33 = vpop.permute.xlu1 %3155  ;;  %3780 = vmatprep.mubr.bf16.mxu0 %v10068_v19 }
 0x448   : > { %3337 = vmatprep.subr.bf16.mxu1 %v3156_v33  ;;  %v3163_v38 = vsel %vm750_vm9, %v10915_v44, %v3156_v33  ;;  %v11115_v44 = vpop.permute.xlu0 %4009  ;;  %vm11550_vm9 = vmpackc.low %vm2765_vm5, %vm2765_vm5 }
 0x44b   : > { %v3412_v37 = vpop.permute.xlu1 %3411 }
 0x44c   : > { %8486 = vmatmul.mubr.msk.bf16.vlgmr.msra.gmra.mrb[8].mxu1 %vm2912_vm3, %v10956_v54  ;;  %v3424_v39 = vsel %vm981_vm10, %v3412_v37, %v11010_v6  ;;  %v3423_v46 = vsel %vm981_vm10, %v10958_v56, %v3412_v37  ;;  %v4006_v51 = vpop.permute.xlu0 %4005 }
 0x44d   : > { %3338 = vmatpush1.bf16.msra.mxu1 %v3163_v38  ;;  %8513 = vmatmul.mubr.msk.bf16.gmra.mrb[16].mxu0 %vm2912_vm3, %v11099_v34 }
 0x44e   : > { %3495 = vmatprep.subr.bf16.mxu1 %v3424_v39  ;;  %3273 = vmatprep.mubr.bf16.mxu1 %v10068_v19 }
 0x44f   : > { %v11110_v42 = vpop.permute.xlu1 %4001  ;;  %3876 = vmatprep.mubr.bf16.mxu0 %v10068_v19 }
 0x450   : > { %v4014_v43 = vsel %vm1475_vm12, %v4000_v32, %v11110_v42  ;;  %v11238_v32 = vld [vmem:[%s12293_s3 + $0x60] sm:$0xff]  }
 0x451   : > { %4034 = vmatprep.subr.bf16.mxu0 %v4014_v43 }
 0x453   : > { %v4008_v45 = vpop.permute.xlu1 %4007 }
 0x454   : > { %8487 = vmatmul.mubr.msk.bf16.gmra.mrb[12].mxu1 %vm2912_vm3, %v10977_v60  ;;  %v4018_v47 = vsel %vm1475_vm12, %v4008_v45, %v11115_v44  ;;  %v4017_v55 = vsel %vm1475_vm12, %v4006_v51, %v4008_v45 }
 0x455   : > { %8516 = vmatmul.mubr.msk.bf16.vlgmr.msra.gmra.mrb[20].mxu0 %vm2912_vm3, %v11084_v27  ;;  %3369 = vmatprep.mubr.bf16.mxu1 %v10068_v19 }
 0x456   : > { %4035 = vmatpush1.bf16.msra.mxu0 %v4013_v48  ;;  %3886 = vmatprep.mubr.bf16.mxu0 %v10068_v19 }
 0x457   : > { %4140 = vmatprep.subr.bf16.mxu0 %v4018_v47  ;;  %v3420_v49 = vpop.permute.xlu1 %3419 }
 0x458   : > { %v3427_v58 = vsel %vm981_vm10, %v10986_v63, %v3420_v49  ;;  %vm11700_vm10 = vmpackc.low %vm2768_vm4, %vm2768_vm4 }
 0x45b   : > { %v3708_v50 = vpop.permute.xlu1 %3707 }
 0x45c   : > { %8490 = vmatmul.mubr.msk.bf16.vlgmr.msra.gmra.mrb[16].mxu1 %vm2912_vm3, %v10956_v54  ;;  %v4296_v54 = vpop.permute.xlu0 %4295  ;;  %v3719_v8 = vsel %vm1228_vm11, %v11074_v22, %v3708_v50 }
 0x45d   : > { %3496 = vmatpush1.bf16.msra.mxu1 %v3423_v46  ;;  %8517 = vmatmul.mubr.msk.bf16.gmra.mrb[24].mxu0 %vm2912_vm3, %v11099_v34 }
 0x45e   : > { %3601 = vmatprep.subr.bf16.mxu1 %v3420_v49  ;;  %3379 = vmatprep.mubr.bf16.mxu1 %v10068_v19 }
 0x45f   : > { %4066 = vmatprep.mubr.bf16.mxu0 %v10068_v19  ;;  %v11139_v53 = vpop.permute.xlu1 %4297 }
 0x460   : > { %v4310_v56 = vsel %vm1722_vm13, %v4296_v54, %v11139_v53  ;;  %v4294_v61 = vpop.permute.xlu0 %4293 }
 0x461   : > { %v4309_v2 = vsel %vm1722_vm13, %v4294_v61, %v4296_v54 }
 0x463   : > { %v4304_v1 = vpop.permute.xlu1 %4303 }
 0x464   : > { %8491 = vmatmul.mubr.msk.bf16.gmra.mrb[20].mxu1 %vm2912_vm3, %v10977_v60  ;;  %v3720_v60 = vsel %vm1228_vm11, %v3708_v50, %v11079_v25  ;;  %v11168_v63 = vpop.permute.xlu0 %4305 }
 0x465   : > { %8526 = vmatmul.mubr.msk.bf16.vlgmr.msra.gmra.mrb[12].mxu0 %vm2912_vm3, %v11137_v52  ;;  %3527 = vmatprep.mubr.bf16.mxu1 %v10068_v19  ;;  %v4314_v3 = vsel %vm1722_vm13, %v4304_v1, %v11168_v63 }
 0x466   : > { %4141 = vmatpush1.bf16.msra.mxu0 %v4017_v55  ;;  %4076 = vmatprep.mubr.bf16.mxu0 %v10068_v19 }
 0x467   : > { %4330 = vmatprep.subr.bf16.mxu0 %v4310_v56  ;;  %v3716_v6 = vpop.permute.xlu1 %3715  ;;  %v11292_v56 = vld [vmem:[%s12293_s3 + $0x70] sm:$0xff]  }
 0x468   : > { %v4302_v12 = vpop.permute.xlu0 %4301 }
 0x469   : > { %v4313_v16 = vsel %vm1722_vm13, %v4302_v12, %v4304_v1 }
 0x46b   : > { %v4004_v11 = vpop.permute.xlu1 %4003 }
 0x46c   : > { %8500 = vmatmul.mubr.msk.bf16.vlgmr.msra.gmra.mrb[8].mxu1 %vm2912_vm3, %v11008_v4  ;;  %v4592_v13 = vpop.permute.xlu0 %4591  ;;  %v4016_v20 = vsel %vm1475_vm12, %v4004_v11, %v4006_v51  ;;  %v4015_v28 = vsel %vm1475_vm12, %v11110_v42, %v4004_v11 }
 0x46d   : > { %3602 = vmatpush1.bf16.msra.mxu1 %v3427_v58  ;;  %8527 = vmatmul.mubr.msk.bf16.gmra.mrb[16].mxu0 %vm2912_vm3, %v11153_v57 }
 0x46e   : > { %3791 = vmatprep.subr.bf16.mxu1 %v3720_v60  ;;  %3537 = vmatprep.mubr.bf16.mxu1 %v10068_v19 }
 0x46f   : > { %4172 = vmatprep.mubr.bf16.mxu0 %v10068_v19 }
 0x470   : > { %v4590_v21 = vpop.permute.xlu0 %4589 }
 0x471   : > { %v4605_v23 = vsel %vm1969_vm14, %v4590_v21, %v4592_v13  ;;  %v9617_v21 = vld [vmem:[%s12297_s7 + $0x14] ss:$8 sps:$4 sm:$0xff]  }
 0x474   : > { %8501 = vmatmul.mubr.msk.bf16.gmra.mrb[12].mxu1 %vm2912_vm3, %v11024_v10  ;;  %v11217_v24 = vpop.permute.xlu0 %4601 }
 0x475   : > { %8530 = vmatmul.mubr.msk.bf16.vlgmr.msra.gmra.mrb[20].mxu0 %vm2912_vm3, %v11137_v52  ;;  %3633 = vmatprep.mubr.bf16.mxu1 %v10068_v19 }
 0x476   : > { %4331 = vmatpush1.bf16.msra.mxu0 %v4309_v2  ;;  %4182 = vmatprep.mubr.bf16.mxu0 %v10068_v19 }
 0x477   : > { %4436 = vmatprep.subr.bf16.mxu0 %v4314_v3 }
 0x478   : > { %v11232_v30 = vpop.permute.xlu0 %4597 }
 0x47c   : > { %8504 = vmatmul.mubr.msk.bf16.vlgmr.msra.gmra.mrb[16].mxu1 %vm2912_vm3, %v11008_v4  ;;  %v11189_v4 = vpop.permute.xlu1 %4593 }
 0x47d   : > { %3792 = vmatpush1.bf16.msra.mxu1 %v3719_v8  ;;  %8531 = vmatmul.mubr.msk.bf16.gmra.mrb[24].mxu0 %vm2912_vm3, %v11153_v57  ;;  %v4606_v17 = vsel %vm1969_vm14, %v4592_v13, %v11189_v4 }
 0x47e   : > { %3897 = vmatprep.subr.bf16.mxu1 %v3716_v6  ;;  %3643 = vmatprep.mubr.bf16.mxu1 %v10068_v19 }
 0x47f   : > { %4362 = vmatprep.mubr.bf16.mxu0 %v10068_v19 }
 0x480   : > { %v4600_v22 = vpop.permute.xlu1 %4599 }
 0x481   : > { %v4609_v37 = vsel %vm1969_vm14, %v11232_v30, %v4600_v22 }
 0x484   : > { %8505 = vmatmul.mubr.msk.bf16.gmra.mrb[20].mxu1 %vm2912_vm3, %v11024_v10  ;;  %v3723_v10 = vsel %vm1228_vm11, %v11065_v18, %v3716_v6  ;;  %v4610_v18 = vsel %vm1969_vm14, %v4600_v22, %v11217_v24  ;;  %v4012_v25 = vpop.permute.xlu1 %4011  ;;  %v9615_v22 = vld [vmem:[%s12297_s7 + $0x10] ss:$8 sps:$4 sm:$0xff]  }
 0x485   : > { %8540 = vmatmul.mubr.msk.bf16.vlgmr.msra.gmra.mrb[12].mxu0 %vm2912_vm3, %v11187_v7  ;;  %3823 = vmatprep.mubr.bf16.mxu1 %v10068_v19  ;;  %v4019_v42 = vsel %vm1475_vm12, %v11115_v44, %v4012_v25 }
 0x486   : > { %4437 = vmatpush1.bf16.msra.mxu0 %v4313_v16  ;;  %4372 = vmatprep.mubr.bf16.mxu0 %v10068_v19  ;;  %v11347_v16 = vld [vmem:[%s12293_s3 + $0x80] sm:$0xff]  }
 0x487   : > { %4626 = vmatprep.subr.bf16.mxu0 %v4606_v17  ;;  %v11363_v17 = vld [vmem:[%s12293_s3 + $0x88] sm:$0xff]  }
 0x488   : > { %v4300_v29 = vpop.permute.xlu1 %4299 }
 0x489   : > { %v4312_v43 = vsel %vm1722_vm13, %v4300_v29, %v4302_v12  ;;  %v4311_v51 = vsel %vm1722_vm13, %v11139_v53, %v4300_v29  ;;  %v9626_v29 = vld [vmem:[%s12297_s7 + $0x44] ss:$8 sps:$4 sm:$0xff]  }
 0x48c   : > { %8514 = vmatmul.mubr.msk.bf16.vlgmr.msra.gmra.mrb[8].mxu1 %vm2912_vm3, %v11084_v27  ;;  %v11240_v33 = vpop.permute.xlu1 %4889 }
 0x48d   : > { %3898 = vmatpush1.bf16.msra.mxu1 %v3723_v10  ;;  %8541 = vmatmul.mubr.msk.bf16.gmra.mrb[16].mxu0 %vm2912_vm3, %v11203_v14 }
 0x48e   : > { %4087 = vmatprep.subr.bf16.mxu1 %v4016_v20  ;;  %3833 = vmatprep.mubr.bf16.mxu1 %v10068_v19  ;;  %v9612_v20 = vld [vmem:[%s12297_s7] ss:$8 sps:$4 sm:$0xff]  }
 0x48f   : > { %4468 = vmatprep.mubr.bf16.mxu0 %v10068_v19 }
 0x490   : > { %v4896_v39 = vpop.permute.xlu1 %4895 }
 0x494   : > { %8515 = vmatmul.mubr.msk.bf16.gmra.mrb[12].mxu1 %vm2912_vm3, %v11099_v34  ;;  %v4308_v45 = vpop.permute.xlu1 %4307 }
 0x495   : > { %8544 = vmatmul.mubr.msk.bf16.vlgmr.msra.gmra.mrb[20].mxu0 %vm2912_vm3, %v11187_v7  ;;  %3929 = vmatprep.mubr.bf16.mxu1 %v10068_v19  ;;  %v4315_v1 = vsel %vm1722_vm13, %v11168_v63, %v4308_v45 }
 0x496   : > { %4627 = vmatpush1.bf16.msra.mxu0 %v4605_v23  ;;  %4478 = vmatprep.mubr.bf16.mxu0 %v10068_v19  ;;  %v9620_v23 = vld [vmem:[%s12297_s7 + $0x24] ss:$8 sps:$4 sm:$0xff]  }
 0x497   : > { %4732 = vmatprep.subr.bf16.mxu0 %v4610_v18 }
 0x498   : > { %v4596_v48 = vpop.permute.xlu1 %4595 }
 0x499   : > { %v4608_v3 = vsel %vm1969_vm14, %v4596_v48, %v11232_v30  ;;  %v4607_v13 = vsel %vm1969_vm14, %v11189_v4, %v4596_v48  ;;  %v9614_v4 = vld [vmem:[%s12297_s7 + $0x4] ss:$8 sps:$4 sm:$0xff]   ;;  %v9624_v30 = vld [vmem:[%s12297_s7 + $0x40] ss:$8 sps:$4 sm:$0xff]  }
 0x49a   : > { %v9642_v48 = vld [vmem:[%s12297_s7 + $0xa0] ss:$8 sps:$4 sm:$0xff]  }
 0x49c   : > { %8518 = vmatmul.mubr.msk.bf16.vlgmr.msra.gmra.mrb[16].mxu1 %vm2912_vm3, %v11084_v27  ;;  %v4888_v27 = vpop.permute.xlu0 %4887  ;;  %v11279_v50 = vpop.permute.xlu1 %5185 }
 0x49d   : > { %4088 = vmatpush1.bf16.msra.mxu1 %v4015_v28  ;;  %8545 = vmatmul.mubr.msk.bf16.gmra.mrb[24].mxu0 %vm2912_vm3, %v11203_v14  ;;  %v4902_v38 = vsel %vm2216_vm15, %v4888_v27, %v11240_v33  ;;  %v9621_v28 = vld [vmem:[%s12297_s7 + $0x30] ss:$8 sps:$4 sm:$0xff]  }
 0x49e   : > { %4193 = vmatprep.subr.bf16.mxu1 %v4012_v25  ;;  %3939 = vmatprep.mubr.bf16.mxu1 %v10068_v19  ;;  %v9623_v25 = vld [vmem:[%s12297_s7 + $0x34] ss:$8 sps:$4 sm:$0xff]  }
 0x49f   : > { %4658 = vmatprep.mubr.bf16.mxu0 %v10068_v19 }
 0x4a0   : > { %v4886_v41 = vpop.permute.xlu0 %4885  ;;  %v4604_v55 = vpop.permute.xlu1 %4603 }
 0x4a1   : > { %v4901_v44 = vsel %vm2216_vm15, %v4886_v41, %v4888_v27  ;;  %v9632_v27 = vld [vmem:[%s12297_s7 + $0x64] ss:$8 sps:$4 sm:$0xff]   ;;  %v9633_v41 = vld [vmem:[%s12297_s7 + $0x70] ss:$8 sps:$4 sm:$0xff]  }
 0x4a4   : > { %8519 = vmatmul.mubr.msk.bf16.gmra.mrb[20].mxu1 %vm2912_vm3, %v11099_v34  ;;  %v11255_v34 = vld [vmem:[%s12293_s3 + $0x68] sm:$0xff]   ;;  %v11266_v47 = vpop.permute.xlu0 %4897  ;;  %v11304_v60 = vpop.permute.xlu1 %4899 }
 0x4a5   : > { %8554 = vmatmul.mubr.msk.bf16.vlgmr.msra.gmra.mrb[12].mxu0 %vm2912_vm3, %v11238_v32  ;;  %4119 = vmatprep.mubr.bf16.mxu1 %v10068_v19  ;;  %v4906_v49 = vsel %vm2216_vm15, %v4896_v39, %v11266_v47 }
 0x4a6   : > { %4733 = vmatpush1.bf16.msra.mxu0 %v4609_v37  ;;  %4668 = vmatprep.mubr.bf16.mxu0 %v10068_v19  ;;  %v9630_v37 = vld [vmem:[%s12297_s7 + $0x60] ss:$8 sps:$4 sm:$0xff]  }
 0x4a7   : > { %4922 = vmatprep.subr.bf16.mxu0 %v4902_v38  ;;  %v4907_v38 = vsel %vm2216_vm15, %v11266_v47, %v11304_v60  ;;  %v9639_v47 = vld [vmem:[%s12297_s7 + $0x90] ss:$8 sps:$4 sm:$0xff]  }
 0x4a8   : > { %v11277_v46 = vpop.permute.xlu0 %4893  ;;  %v11315_v2 = vpop.permute.xlu1 %5189 }
 0x4ac   : > { %8528 = vmatmul.mubr.msk.bf16.vlgmr.msra.gmra.mrb[8].mxu1 %vm2912_vm3, %v11137_v52  ;;  %v5184_v54 = vpop.permute.xlu0 %5183  ;;  %v11325_v63 = vpop.permute.xlu1 %5193 }
 0x4ad   : > { %4194 = vmatpush1.bf16.msra.mxu1 %v4019_v42  ;;  %8555 = vmatmul.mubr.msk.bf16.gmra.mrb[16].mxu0 %vm2912_vm3, %v11255_v34  ;;  %v5198_v58 = vsel %vm2463_vm0, %v5184_v54, %v11279_v50  ;;  %v9638_v42 = vld [vmem:[%s12297_s7 + $0x84] ss:$8 sps:$4 sm:$0xff]  }
 0x4ae   : > { %4383 = vmatprep.subr.bf16.mxu1 %v4312_v43  ;;  %4129 = vmatprep.mubr.bf16.mxu1 %v10068_v19  ;;  %v9636_v43 = vld [vmem:[%s12297_s7 + $0x80] ss:$8 sps:$4 sm:$0xff]  }
 0x4af   : > { %4764 = vmatprep.mubr.bf16.mxu0 %v10068_v19 }
 0x4b0   : > { %v5182_v53 = vpop.permute.xlu0 %5181 }
 0x4b1   : > { %v5197_v8 = vsel %vm2463_vm0, %v5182_v53, %v5184_v54  ;;  %v9645_v54 = vld [vmem:[%s12297_s7 + $0xb0] ss:$8 sps:$4 sm:$0xff]   ;;  %v9653_v53 = vld [vmem:[%s12297_s7 + $0xd4] ss:$8 sps:$4 sm:$0xff]  }
 0x4b4   : > { %8529 = vmatmul.mubr.msk.bf16.gmra.mrb[12].mxu1 %vm2912_vm3, %v11153_v57  ;;  %v4892_v61 = vpop.permute.xlu0 %4891 }
 0x4b5   : > { %8558 = vmatmul.mubr.msk.bf16.vlgmr.msra.gmra.mrb[20].mxu0 %vm2912_vm3, %v11238_v32  ;;  %4225 = vmatprep.mubr.bf16.mxu1 %v10068_v19  ;;  %v4904_v10 = vsel %vm2216_vm15, %v4892_v61, %v11277_v46  ;;  %v4903_v18 = vsel %vm2216_vm15, %v11240_v33, %v4892_v61  ;;  %v9627_v33 = vld [vmem:[%s12297_s7 + $0x50] ss:$8 sps:$4 sm:$0xff]   ;;  %v9659_v61 = vld [vmem:[%s12297_s7 + $0xf4] ss:$8 sps:$4 sm:$0xff]  }
 0x4b6   : > { %4923 = vmatpush1.bf16.msra.mxu0 %v4901_v44  ;;  %4774 = vmatprep.mubr.bf16.mxu0 %v10068_v19  ;;  %v9644_v44 = vld [vmem:[%s12297_s7 + $0xa4] ss:$8 sps:$4 sm:$0xff]  }
 0x4b7   : > { %5028 = vmatprep.subr.bf16.mxu0 %v4906_v49 }
 0x4b8   : > { %v11322_v6 = vpop.permute.xlu0 %5187 }
 0x4b9   : > { %v5199_v49 = vsel %vm2463_vm0, %v11279_v50, %v11322_v6  ;;  %v9647_v50 = vld [vmem:[%s12297_s7 + $0xb4] ss:$8 sps:$4 sm:$0xff]  }
 0x4bc   : > { %8532 = vmatmul.mubr.msk.bf16.vlgmr.msra.gmra.mrb[16].mxu1 %vm2912_vm3, %v11137_v52  ;;  %v4905_v52 = vsel %vm2216_vm15, %v11277_v46, %v4896_v39  ;;  %v5192_v11 = vpop.permute.xlu0 %5191  ;;  %v9635_v39 = vld [vmem:[%s12297_s7 + $0x74] ss:$8 sps:$4 sm:$0xff]  }
 0x4bd   : > { %4384 = vmatpush1.bf16.msra.mxu1 %v4311_v51  ;;  %8559 = vmatmul.mubr.msk.bf16.gmra.mrb[24].mxu0 %vm2912_vm3, %v11255_v34  ;;  %v5202_v12 = vsel %vm2463_vm0, %v5192_v11, %v11325_v63 }
 0x4be   : > { %4489 = vmatprep.subr.bf16.mxu1 %v4308_v45  ;;  %4235 = vmatprep.mubr.bf16.mxu1 %v10068_v19  ;;  %v9641_v45 = vld [vmem:[%s12297_s7 + $0x94] ss:$8 sps:$4 sm:$0xff]  }
 0x4bf   : > { %4954 = vmatprep.mubr.bf16.mxu0 %v10068_v19 }
 0x4c0   : > { %v5196_v46 = vpop.permute.xlu0 %5195 }
 0x4c1   : > { %v5203_v51 = vsel %vm2463_vm0, %v11325_v63, %v5196_v46 }
 0x4c4   : > { %8533 = vmatmul.mubr.msk.bf16.gmra.mrb[20].mxu1 %vm2912_vm3, %v11153_v57  ;;  %v11309_v57 = vld [vmem:[%s12293_s3 + $0x78] sm:$0xff]  }
 0x4c5   : > { %8568 = vmatmul.mubr.msk.bf16.vlgmr.msra.gmra.mrb[12].mxu0 %vm2912_vm3, %v11292_v56  ;;  %4415 = vmatprep.mubr.bf16.mxu1 %v10068_v19 }
 0x4c6   : > { %5029 = vmatpush1.bf16.msra.mxu0 %v4905_v52  ;;  %4964 = vmatprep.mubr.bf16.mxu0 %v10068_v19  ;;  %v9651_v52 = vld [vmem:[%s12297_s7 + $0xd0] ss:$8 sps:$4 sm:$0xff]  }
 0x4c7   : > { %5218 = vmatprep.subr.bf16.mxu0 %v5198_v58  ;;  %v9656_v58 = vld [vmem:[%s12297_s7 + $0xe4] ss:$8 sps:$4 sm:$0xff]  }
 0x4cc   : > { %8542 = vmatmul.mubr.msk.bf16.vlgmr.msra.gmra.mrb[8].mxu1 %vm2912_vm3, %v11187_v7 }
 0x4cd   : > { %4490 = vmatpush1.bf16.msra.mxu1 %v4315_v1  ;;  %8569 = vmatmul.mubr.msk.bf16.gmra.mrb[16].mxu0 %vm2912_vm3, %v11309_v57  ;;  %v9662_v1 = vld [vmem:[%s12297_s7 + $0x104] ss:$8 sps:$4 sm:$0xff]  }
 0x4ce   : > { %4679 = vmatprep.subr.bf16.mxu1 %v4608_v3  ;;  %4425 = vmatprep.mubr.bf16.mxu1 %v10068_v19 }
 0x4cf   : > { %5060 = vmatprep.mubr.bf16.mxu0 %v10068_v19 }
 0x4d4   : > { %8543 = vmatmul.mubr.msk.bf16.gmra.mrb[12].mxu1 %vm2912_vm3, %v11203_v14 }
 0x4d5   : > { %8572 = vmatmul.mubr.msk.bf16.vlgmr.msra.gmra.mrb[20].mxu0 %vm2912_vm3, %v11292_v56  ;;  %4521 = vmatprep.mubr.bf16.mxu1 %v10068_v19 }
 0x4d6   : > { %5219 = vmatpush1.bf16.msra.mxu0 %v5197_v8  ;;  %5070 = vmatprep.mubr.bf16.mxu0 %v10068_v19  ;;  %v11526_v8 = vpop.permute.xlu0 %5473 }
 0x4d7   : > { %5324 = vmatprep.subr.bf16.mxu0 %v5202_v12 }
 0x4dc   : > { %8546 = vmatmul.mubr.msk.bf16.vlgmr.msra.gmra.mrb[16].mxu1 %vm2912_vm3, %v11187_v7  ;;  %v5201_v7 = vsel %vm2463_vm0, %v11315_v2, %v5192_v11 }
 0x4dd   : > { %4680 = vmatpush1.bf16.msra.mxu1 %v4607_v13  ;;  %8573 = vmatmul.mubr.msk.bf16.gmra.mrb[24].mxu0 %vm2912_vm3, %v11309_v57 }
 0x4de   : > { %4785 = vmatprep.subr.bf16.mxu1 %v4604_v55  ;;  %4531 = vmatprep.mubr.bf16.mxu1 %v10068_v19 }
 0x4df   : > { %5250 = vmatprep.mubr.bf16.mxu0 %v10068_v19 }
 0x4e4   : > { %8547 = vmatmul.mubr.msk.bf16.gmra.mrb[20].mxu1 %vm2912_vm3, %v11203_v14  ;;  %v4611_v14 = vsel %vm1969_vm14, %v11217_v24, %v4604_v55  ;;  %v9618_v24 = vld [vmem:[%s12297_s7 + $0x20] ss:$8 sps:$4 sm:$0xff]   ;;  %v9650_v55 = vld [vmem:[%s12297_s7 + $0xc4] ss:$8 sps:$4 sm:$0xff]   ;;  %vm12323_vm14 = vcmp.eq.s32.totalorder %v10690_v59, 1 }
 0x4e5   : > { %8582 = vmatmul.mubr.msk.bf16.vlgmr.msra.gmra.mrb[12].mxu0 %vm2912_vm3, %v11347_v16  ;;  %4711 = vmatprep.mubr.bf16.mxu1 %v10068_v19  ;;  %vm11711_vm15 = vmpackc.low %vm12323_vm14, %vm12323_vm14 }
 0x4e6   : > { %5325 = vmatpush1.bf16.msra.mxu0 %v5201_v7  ;;  %5260 = vmatprep.mubr.bf16.mxu0 %v10068_v19 }
 0x4e7   : > { %6333 = vmatprep.subr.bf16.mxu0 %v9614_v4 }
 0x4ec   : > { %8556 = vmatmul.mubr.msk.bf16.vlgmr.msra.gmra.mrb[8].mxu1 %vm2912_vm3, %v11238_v32 }
 0x4ed   : > { %4786 = vmatpush1.bf16.msra.mxu1 %v4611_v14  ;;  %8583 = vmatmul.mubr.msk.bf16.gmra.mrb[16].mxu0 %vm2912_vm3, %v11363_v17 }
 0x4ee   : > { %4975 = vmatprep.subr.bf16.mxu1 %v4904_v10  ;;  %4721 = vmatprep.mubr.bf16.mxu1 %v10068_v19 }
 0x4ef   : > { %5356 = vmatprep.mubr.bf16.mxu0 %v10068_v19 }
 0x4f4   : > { %8557 = vmatmul.mubr.msk.bf16.gmra.mrb[12].mxu1 %vm2912_vm3, %v11255_v34 }
 0x4f5   : > { %8586 = vmatmul.mubr.msk.bf16.vlgmr.msra.gmra.mrb[20].mxu0 %vm2912_vm3, %v11347_v16  ;;  %4817 = vmatprep.mubr.bf16.mxu1 %v10068_v19 }
 0x4f6   : > { %5366 = vmatprep.mubr.bf16.mxu0 %v10068_v19  ;;  %6334 = vmatpush1.bf16.msra.mxu0 %v9612_v20  ;;  %v11534_v20 = vpop.permute.xlu0 %5483 }
 0x4f7   : > { %6335 = vmatprep.subr.bf16.mxu0 %v9617_v21 }
 0x4fa   : > { %6336 = vmatpush1.bf16.msra.mxu0 %v9615_v22 }
 0x4fb   : > { %6337 = vmatprep.subr.bf16.mxu0 %v9620_v23 }
 0x4fc   : > { %8560 = vmatmul.mubr.msk.bf16.vlgmr.msra.gmra.mrb[16].mxu1 %vm2912_vm3, %v11238_v32  ;;  %v9629_v32 = vld [vmem:[%s12297_s7 + $0x54] ss:$8 sps:$4 sm:$0xff]  }
 0x4fd   : > { %4976 = vmatpush1.bf16.msra.mxu1 %v4903_v18  ;;  %8587 = vmatmul.mubr.msk.bf16.gmra.mrb[24].mxu0 %vm2912_vm3, %v11363_v17 }
 0x4fe   : > { %5081 = vmatprep.subr.bf16.mxu1 %v11304_v60  ;;  %4827 = vmatprep.mubr.bf16.mxu1 %v10068_v19  ;;  %v9654_v60 = vld [vmem:[%s12297_s7 + $0xe0] ss:$8 sps:$4 sm:$0xff]  }
 0x4ff   : > { %6338 = vmatpush1.bf16.msra.mxu0 %v9618_v24 }
 0x500   : > { %6339 = vmatprep.subr.bf16.mxu0 %v9623_v25 }
 0x503   : > { %6340 = vmatpush1.bf16.msra.mxu0 %v9621_v28 }
 0x504   : > { %8561 = vmatmul.mubr.msk.bf16.gmra.mrb[20].mxu1 %vm2912_vm3, %v11255_v34  ;;  %6341 = vmatprep.subr.bf16.mxu0 %v9626_v29  ;;  %v5200_v34 = vsel %vm2463_vm0, %v11322_v6, %v11315_v2  ;;  %v11523_v2 = vpop.permute.xlu1 %5468  ;;  %vm11739_vm0 = vmpackc.low %vm2770_vm6, %vm2770_vm6 }
 0x505   : > { %5007 = vmatprep.mubr.bf16.mxu1 %v10068_v19 }
 0x507   : > { %6342 = vmatpush1.bf16.msra.mxu0 %v9624_v30 }
 0x508   : > { %6343 = vmatprep.subr.bf16.mxu0 %v9629_v32  ;;  %v11531_v7 = vpop.permute.xlu1 %5478 }
 0x50b   : > { %6344 = vmatpush1.bf16.msra.mxu0 %v9627_v33 }
 0x50c   : > { %8570 = vmatmul.mubr.msk.bf16.vlgmr.msra.gmra.mrb[8].mxu1 %vm2912_vm3, %v11292_v56  ;;  %6345 = vmatprep.subr.bf16.mxu0 %v9632_v27  ;;  %v9681_v27 = vld [vmem:[%s12297_s7 + $0x170] ss:$8 sps:$4 sm:$0xff]  }
 0x50d   : > { %5082 = vmatpush1.bf16.msra.mxu1 %v4907_v38  ;;  %5017 = vmatprep.mubr.bf16.mxu1 %v10068_v19 }
 0x50e   : > { %5271 = vmatprep.subr.bf16.mxu1 %v5200_v34  ;;  %v9687_v34 = vld [vmem:[%s12297_s7 + $0x190] ss:$8 sps:$4 sm:$0xff]  }
 0x50f   : > { %6346 = vmatpush1.bf16.msra.mxu0 %v9630_v37 }
 0x510   : > { %6347 = vmatprep.subr.bf16.mxu0 %v9635_v39 }
 0x513   : > { %6348 = vmatpush1.bf16.msra.mxu0 %v9633_v41 }
 0x514   : > { %8571 = vmatmul.mubr.msk.bf16.gmra.mrb[12].mxu1 %vm2912_vm3, %v11309_v57  ;;  %6349 = vmatprep.subr.bf16.mxu0 %v9638_v42 }
 0x515   : > { %5113 = vmatprep.mubr.bf16.mxu1 %v10068_v19 }
 0x517   : > { %6350 = vmatpush1.bf16.msra.mxu0 %v9636_v43  ;;  %v9665_v43 = vld [vmem:[%s12297_s7 + $0x114] ss:$8 sps:$4 sm:$0xff]  }
 0x518   : > { %6351 = vmatprep.subr.bf16.mxu0 %v9641_v45 }
 0x51b   : > { %6352 = vmatpush1.bf16.msra.mxu0 %v9639_v47 }
 0x51c   : > { %8574 = vmatmul.mubr.msk.bf16.vlgmr.msra.gmra.mrb[16].mxu1 %vm2912_vm3, %v11292_v56  ;;  %6353 = vmatprep.subr.bf16.mxu0 %v9644_v44  ;;  %v9648_v56 = vld [vmem:[%s12297_s7 + $0xc0] ss:$8 sps:$4 sm:$0xff]  }
 0x51d   : > { %5272 = vmatpush1.bf16.msra.mxu1 %v5199_v49  ;;  %5123 = vmatprep.mubr.bf16.mxu1 %v10068_v19 }
 0x51e   : > { %5377 = vmatprep.subr.bf16.mxu1 %v5196_v46  ;;  %v9668_v46 = vld [vmem:[%s12297_s7 + $0x124] ss:$8 sps:$4 sm:$0xff]  }
 0x51f   : > { %6354 = vmatpush1.bf16.msra.mxu0 %v9642_v48  ;;  %v9663_v48 = vld [vmem:[%s12297_s7 + $0x110] ss:$8 sps:$4 sm:$0xff]  }
 0x520   : > { %6355 = vmatprep.subr.bf16.mxu0 %v9647_v50 }
 0x523   : > { %6356 = vmatpush1.bf16.msra.mxu0 %v9645_v54 }
 0x524   : > { %8575 = vmatmul.mubr.msk.bf16.gmra.mrb[20].mxu1 %vm2912_vm3, %v11309_v57  ;;  %6357 = vmatprep.subr.bf16.mxu0 %v9650_v55  ;;  %v9657_v57 = vld [vmem:[%s12297_s7 + $0xf0] ss:$8 sps:$4 sm:$0xff]  }
 0x525   : > { %5303 = vmatprep.mubr.bf16.mxu1 %v10068_v19 }
 0x527   : > { %6358 = vmatpush1.bf16.msra.mxu0 %v9648_v56 }
 0x528   : > { %6359 = vmatprep.subr.bf16.mxu0 %v9653_v53 }
 0x52b   : > { %6360 = vmatpush1.bf16.msra.mxu0 %v9651_v52 }
 0x52c   : > { %8584 = vmatmul.mubr.msk.bf16.vlgmr.msra.gmra.mrb[8].mxu1 %vm2912_vm3, %v11347_v16  ;;  %6361 = vmatprep.subr.bf16.mxu0 %v9656_v58  ;;  %v9666_v58 = vld [vmem:[%s12297_s7 + $0x120] ss:$8 sps:$4 sm:$0xff]  }
 0x52d   : > { %5378 = vmatpush1.bf16.msra.mxu1 %v5203_v51  ;;  %5313 = vmatprep.mubr.bf16.mxu1 %v10068_v19 }
 0x52f   : > { %6362 = vmatpush1.bf16.msra.mxu0 %v9654_v60 }
 0x530   : > { %6363 = vmatprep.subr.bf16.mxu0 %v9659_v61 }
 0x533   : > { %6364 = vmatpush1.bf16.msra.mxu0 %v9657_v57  ;;  %v9671_v57 = vld [vmem:[%s12297_s7 + $0x134] ss:$8 sps:$4 sm:$0xff]  }
 0x534   : > { %8585 = vmatmul.mubr.msk.bf16.gmra.mrb[12].mxu1 %vm2912_vm3, %v11363_v17  ;;  %6386 = vmatprep.subr.bf16.mxu0 %v9662_v1 }
 0x535   : > { %5409 = vmatprep.mubr.bf16.mxu1 %v10068_v19 }
 0x53c   : > { %8588 = vmatmul.mubr.msk.bf16.vlgmr.msra.gmra.mrb[16].mxu1 %vm2912_vm3, %v11347_v16 }
 0x53d   : > { %5419 = vmatprep.mubr.bf16.mxu1 %v10068_v19 }
 0x544   : > { %8589 = vmatmul.mubr.msk.bf16.gmra.mrb[20].mxu1 %vm2912_vm3, %v11363_v17  ;;  %vm12328_vm3 = vcmp.eq.s32.totalorder %v10730_v31, 1  ;;  %v9734_v31 = vld [vmem:[%s12297_s7 + $0x284] ss:$8 sps:$4 sm:$0xff]  }
 0x545   : > { %6690 = vmatprep.mubr.bf16.mxu1 %v10068_v19  ;;  %vm12329_vm4 = vmmov %vm12328_vm3 }
 0x546   : > { %vm12330_vm5 = vmmov %vm12328_vm3 }
 0x547   : > { %vm12331_vm6 = vmmov %vm12328_vm3 }
 0x5b8   : > { %v5252_v3 = vpop.f32.mrb[12].mxu0 }
 0x5b9   : > { %v5486_v6 = vadd.f32 %v11523_v2, %v5252_v3  ;;  %v5254_v63 = vpop.f32.mrb[13].mxu0 }
 0x5ba   : > { %v5487_v11 = vadd.f32 %v11523_v2, %v5254_v63  ;;  %v5256_v12 = vpop.f32.mrb[14].mxu0 }
 0x5bb   : > { %9866 = vtanh.f32 %v5486_v6  ;;  %v5494_v13 = vadd.f32 %v11526_v8, %v5256_v12  ;;  %v5258_v16 = vpop.f32.mrb[15].mxu0 }
 0x5bc   : > { %9868 = vtanh.f32 %v5487_v11  ;;  %v5495_v4 = vadd.f32 %v11526_v8, %v5258_v16  ;;  %v9669_v11 = vld [vmem:[%s12297_s7 + $0x130] ss:$8 sps:$4 sm:$0xff]  }
 0x5bd   : > { %9870 = vtanh.f32 %v5494_v13  ;;  %v9674_v13 = vld [vmem:[%s12297_s7 + $0x144] ss:$8 sps:$4 sm:$0xff]  }
 0x5be   : > { %9872 = vtanh.f32 %v5495_v4 }
 0x5c0   : > { %v5262_v17 = vpop.f32.mrb[16].mxu0 }
 0x5c1   : > { %v5502_v14 = vadd.f32 %v11531_v7, %v5262_v17  ;;  %v5264_v10 = vpop.f32.mrb[17].mxu0 }
 0x5c2   : > { %v5503_v21 = vadd.f32 %v11531_v7, %v5264_v10  ;;  %v5266_v22 = vpop.f32.mrb[18].mxu0 }
 0x5c3   : > { %9874 = vtanh.f32 %v5502_v14  ;;  %v5510_v23 = vadd.f32 %v11534_v20, %v5266_v22  ;;  %v5268_v24 = vpop.f32.mrb[19].mxu0  ;;  %v9672_v14 = vld [vmem:[%s12297_s7 + $0x140] ss:$8 sps:$4 sm:$0xff]  }
 0x5c4   : > { %9876 = vtanh.f32 %v5503_v21  ;;  %v5511_v18 = vadd.f32 %v11534_v20, %v5268_v24  ;;  %v9677_v21 = vld [vmem:[%s12297_s7 + $0x154] ss:$8 sps:$4 sm:$0xff]  }
 0x5c5   : > { %v9867_v25 = vpop.eup %9866  ;;  %9878 = vtanh.f32 %v5510_v23  ;;  %v9675_v23 = vld [vmem:[%s12297_s7 + $0x150] ss:$8 sps:$4 sm:$0xff]  }
 0x5c6   : > { %v9869_v28 = vpop.eup %9868  ;;  %9880 = vtanh.f32 %v5511_v18  ;;  %v9680_v18 = vld [vmem:[%s12297_s7 + $0x164] ss:$8 sps:$4 sm:$0xff]  }
 0x5c7   : > { %v9871_v29 = vpop.eup %9870 }
 0x5c8   : > { %v9873_v30 = vpop.eup %9872  ;;  %v8708_v32 = vpack.c.bf16 %v9871_v29, %v9867_v25  ;;  %v5358_v33 = vpop.f32.mrb[20].mxu0 }
 0x5c9   : > { %v5490_v37 = vadd.f32 %v11523_v2, %v5358_v33  ;;  %v5360_v38 = vpop.f32.mrb[21].mxu0  ;;  %v8705_v39 = vpack.c.bf16 %v9873_v30, %v9869_v28  ;;  %v9678_v30 = vld [vmem:[%s12297_s7 + $0x160] ss:$8 sps:$4 sm:$0xff]   ;;  %v9683_v33 = vld [vmem:[%s12297_s7 + $0x174] ss:$8 sps:$4 sm:$0xff]  }
 0x5ca   : > { %v5491_v41 = vadd.f32 %v11523_v2, %v5360_v38  ;;  %v5362_v42 = vpop.f32.mrb[22].mxu0  ;;  %v9684_v38 = vld [vmem:[%s12297_s7 + $0x180] ss:$8 sps:$4 sm:$0xff]  }
 0x5cb   : > { %9882 = vtanh.f32 %v5490_v37  ;;  %v5498_v45 = vadd.f32 %v11526_v8, %v5362_v42  ;;  %v5364_v9 = vpop.f32.mrb[23].mxu0  ;;  %8706 = vmatprep.mubr.msk.bf16.mxu0 %vm11542_vm7, %v8705_v39  ;;  %v9686_v37 = vld [vmem:[%s12297_s7 + $0x184] ss:$8 sps:$4 sm:$0xff]   ;;  %v9689_v39 = vld [vmem:[%s12297_s7 + $0x194] ss:$8 sps:$4 sm:$0xff]  }
 0x5cc   : > { %9884 = vtanh.f32 %v5491_v41  ;;  %v5499_v47 = vadd.f32 %v11526_v8, %v5364_v9  ;;  %8709 = vmatmul.mubr.msk.bf16.vlgmr.msra.gmra.mrb[28].mxu0 %vm11550_vm9, %v8708_v32  ;;  %v9690_v41 = vld [vmem:[%s12297_s7 + $0x1a0] ss:$8 sps:$4 sm:$0xff]   ;;  %v9695_v42 = vld [vmem:[%s12297_s7 + $0x1b4] ss:$8 sps:$4 sm:$0xff]  }
 0x5cd   : > { %v9875_v44 = vpop.eup %9874  ;;  %9886 = vtanh.f32 %v5498_v45  ;;  %6387 = vmatpush1.bf16.msra.mxu0 %v9660_v26  ;;  %v9692_v26 = vld [vmem:[%s12297_s7 + $0x1a4] ss:$8 sps:$4 sm:$0xff]   ;;  %v9696_v9 = vld [vmem:[%s12297_s7 + $0x1c0] ss:$8 sps:$4 sm:$0xff]  }
 0x5ce   : > { %v9877_v49 = vpop.eup %9876  ;;  %9888 = vtanh.f32 %v5499_v47  ;;  %6388 = vmatprep.subr.bf16.mxu0 %v9665_v43  ;;  %v9693_v43 = vld [vmem:[%s12297_s7 + $0x1b0] ss:$8 sps:$4 sm:$0xff]   ;;  %v9698_v45 = vld [vmem:[%s12297_s7 + $0x1c4] ss:$8 sps:$4 sm:$0xff]   ;;  %v9701_v47 = vld [vmem:[%s12297_s7 + $0x1d4] ss:$8 sps:$4 sm:$0xff]  }
 0x5cf   : > { %v9879_v51 = vpop.eup %9878 }
 0x5d0   : > { %v9881_v50 = vpop.eup %9880  ;;  %v5368_v54 = vpop.f32.mrb[24].mxu0  ;;  %v8714_v55 = vpack.c.bf16 %v9879_v51, %v9875_v44  ;;  %v9699_v44 = vld [vmem:[%s12297_s7 + $0x1d0] ss:$8 sps:$4 sm:$0xff]  }
 0x5d1   : > { %v5506_v56 = vadd.f32 %v11531_v7, %v5368_v54  ;;  %v5370_v53 = vpop.f32.mrb[25].mxu0  ;;  %v8711_v52 = vpack.c.bf16 %v9881_v50, %v9877_v49  ;;  %6389 = vmatpush1.bf16.msra.mxu0 %v9663_v48  ;;  %v9704_v48 = vld [vmem:[%s12297_s7 + $0x1e4] ss:$8 sps:$4 sm:$0xff]  }
 0x5d2   : > { %v5507_v60 = vadd.f32 %v11531_v7, %v5370_v53  ;;  %v5372_v61 = vpop.f32.mrb[26].mxu0  ;;  %6390 = vmatprep.subr.bf16.mxu0 %v9668_v46 }
 0x5d3   : > { %9890 = vtanh.f32 %v5506_v56  ;;  %v5514_v1 = vadd.f32 %v11534_v20, %v5372_v61  ;;  %v5374_v3 = vpop.f32.mrb[27].mxu0  ;;  %8712 = vmatprep.mubr.msk.bf16.mxu0 %vm11542_vm7, %v8711_v52  ;;  %v9707_v52 = vld [vmem:[%s12297_s7 + $0x1f4] ss:$8 sps:$4 sm:$0xff]   ;;  %v9710_v61 = vld [vmem:[%s12297_s7 + $0x204] ss:$8 sps:$4 sm:$0xff]   ;;  %vm6319_vm7 = vcmask 31744  }
 0x5d4   : > { %9892 = vtanh.f32 %v5507_v60  ;;  %v5515_v6 = vadd.f32 %v11534_v20, %v5374_v3  ;;  %8715 = vmatmul.mubr.msk.bf16.gmra.mrb[32].mxu0 %vm11550_vm9, %v8714_v55  ;;  %v9702_v55 = vld [vmem:[%s12297_s7 + $0x1e0] ss:$8 sps:$4 sm:$0xff]   ;;  %v9705_v60 = vld [vmem:[%s12297_s7 + $0x1f0] ss:$8 sps:$4 sm:$0xff]   ;;  %vm6326_vm9 = vcmask 1041408  }
 0x5d5   : > { %v11587_v63 = vpop.eup %9882  ;;  %9894 = vtanh.f32 %v5514_v1  ;;  %6391 = vmatpush1.bf16.msra.mxu0 %v9666_v58 }
 0x5d6   : > { %v11592_v12 = vpop.eup %9884  ;;  %9896 = vtanh.f32 %v5515_v6  ;;  %6392 = vmatprep.subr.bf16.mxu0 %v9671_v57 }
 0x5d7   : > { %v11597_v16 = vpop.eup %9886 }
 0x5d8   : > { %v11599_v4 = vpop.eup %9888  ;;  %v8732_v17 = vpack.c.bf16 %v11597_v16, %v11587_v63  ;;  %v9762_v63 = vld [vmem:[%s12297_s7 + $0x320] ss:$8 sps:$4 sm:$0xff]   ;;  %v9767_v16 = vld [vmem:[%s12297_s7 + $0x334] ss:$8 sps:$4 sm:$0xff]  }
 0x5d9   : > { %6393 = vmatpush1.bf16.msra.mxu0 %v9669_v11  ;;  %v8729_v10 = vpack.c.bf16 %v11599_v4, %v11592_v12  ;;  %v9720_v4 = vld [vmem:[%s12297_s7 + $0x240] ss:$8 sps:$4 sm:$0xff]  }
 0x5da   : > { %6394 = vmatprep.subr.bf16.mxu0 %v9674_v13 }
 0x5dd   : > { %v11611_v22 = vpop.eup %9890  ;;  %6395 = vmatpush1.bf16.msra.mxu0 %v9672_v14 }
 0x5de   : > { %v11616_v24 = vpop.eup %9892  ;;  %6396 = vmatprep.subr.bf16.mxu0 %v9677_v21 }
 0x5df   : > { %v11621_v25 = vpop.eup %9894 }
 0x5e0   : > { %v11623_v28 = vpop.eup %9896  ;;  %v8738_v29 = vpack.c.bf16 %v11621_v25, %v11611_v22  ;;  %v9768_v22 = vld [vmem:[%s12297_s7 + $0x340] ss:$8 sps:$4 sm:$0xff]   ;;  %v9773_v25 = vld [vmem:[%s12297_s7 + $0x354] ss:$8 sps:$4 sm:$0xff]  }
 0x5e1   : > { %6397 = vmatpush1.bf16.msra.mxu0 %v9675_v23  ;;  %v8735_v32 = vpack.c.bf16 %v11623_v28, %v11616_v24  ;;  %v9770_v24 = vld [vmem:[%s12297_s7 + $0x344] ss:$8 sps:$4 sm:$0xff]   ;;  %v9771_v28 = vld [vmem:[%s12297_s7 + $0x350] ss:$8 sps:$4 sm:$0xff]  }
 0x5e2   : > { %6398 = vmatprep.subr.bf16.mxu0 %v9680_v18 }
 0x5e5   : > { %6399 = vmatpush1.bf16.msra.mxu0 %v9678_v30 }
 0x5e6   : > { %6400 = vmatprep.subr.bf16.mxu0 %v9683_v33 }
 0x5e9   : > { %6401 = vmatpush1.bf16.msra.mxu0 %v9681_v27 }
 0x5ea   : > { %6402 = vmatprep.subr.bf16.mxu0 %v9686_v37 }
 0x5ed   : > { %6403 = vmatpush1.bf16.msra.mxu0 %v9684_v38 }
 0x5ee   : > { %6404 = vmatprep.subr.bf16.mxu0 %v9689_v39 }
 0x5f1   : > { %6405 = vmatpush1.bf16.msra.mxu0 %v9687_v34 }
 0x5f2   : > { %6406 = vmatprep.subr.bf16.mxu0 %v9692_v26 }
 0x5f5   : > { %6407 = vmatpush1.bf16.msra.mxu0 %v9690_v41  ;;  %v9708_v41 = vld [vmem:[%s12297_s7 + $0x200] ss:$8 sps:$4 sm:$0xff]  }
 0x5f6   : > { %6408 = vmatprep.subr.bf16.mxu0 %v9695_v42  ;;  %v9731_v42 = vld [vmem:[%s12297_s7 + $0x274] ss:$8 sps:$4 sm:$0xff]  }
 0x5f9   : > { %6409 = vmatpush1.bf16.msra.mxu0 %v9693_v43 }
 0x5fa   : > { %6410 = vmatprep.subr.bf16.mxu0 %v9698_v45  ;;  %v9713_v45 = vld [vmem:[%s12297_s7 + $0x214] ss:$8 sps:$4 sm:$0xff]  }
 0x5fd   : > { %6411 = vmatpush1.bf16.msra.mxu0 %v9696_v9 }
 0x5fe   : > { %6412 = vmatprep.subr.bf16.mxu0 %v9701_v47 }
 0x5ff   : > { %v5305_v49 = vpop.f32.mrb[8].mxu1 }
 0x600   : > { %v5488_v46 = vadd.f32 %v11523_v2, %v5305_v49  ;;  %v5307_v51 = vpop.f32.mrb[9].mxu1  ;;  %v9716_v49 = vld [vmem:[%s12297_s7 + $0x224] ss:$8 sps:$4 sm:$0xff]  }
 0x601   : > { %v5489_v50 = vadd.f32 %v11523_v2, %v5307_v51  ;;  %v5309_v54 = vpop.f32.mrb[10].mxu1  ;;  %6413 = vmatpush1.bf16.msra.mxu0 %v9699_v44 }
 0x602   : > { %9898 = vtanh.f32 %v5488_v46  ;;  %v5496_v56 = vadd.f32 %v11526_v8, %v5309_v54  ;;  %v5311_v53 = vpop.f32.mrb[11].mxu1  ;;  %6414 = vmatprep.subr.bf16.mxu0 %v9704_v48 }
 0x603   : > { %9900 = vtanh.f32 %v5489_v50  ;;  %v5497_v58 = vadd.f32 %v11526_v8, %v5311_v53  ;;  %v9714_v53 = vld [vmem:[%s12297_s7 + $0x220] ss:$8 sps:$4 sm:$0xff]  }
 0x604   : > { %9902 = vtanh.f32 %v5496_v56 }
 0x605   : > { %9904 = vtanh.f32 %v5497_v58  ;;  %6415 = vmatpush1.bf16.msra.mxu0 %v9702_v55 }
 0x606   : > { %6416 = vmatprep.subr.bf16.mxu0 %v9707_v52 }
 0x607   : > { %v5315_v57 = vpop.f32.mrb[12].mxu1 }
 0x608   : > { %v5504_v1 = vadd.f32 %v11531_v7, %v5315_v57  ;;  %v5317_v3 = vpop.f32.mrb[13].mxu1 }
 0x609   : > { %v5505_v6 = vadd.f32 %v11531_v7, %v5317_v3  ;;  %v5319_v11 = vpop.f32.mrb[14].mxu1  ;;  %6417 = vmatpush1.bf16.msra.mxu0 %v9705_v60  ;;  %v9717_v3 = vld [vmem:[%s12297_s7 + $0x230] ss:$8 sps:$4 sm:$0xff]   ;;  %v9779_v60 = vld [vmem:[%s12297_s7 + $0x374] ss:$8 sps:$4 sm:$0xff]  }
 0x60a   : > { %9906 = vtanh.f32 %v5504_v1  ;;  %v5512_v13 = vadd.f32 %v11534_v20, %v5319_v11  ;;  %v5321_v14 = vpop.f32.mrb[15].mxu1  ;;  %6439 = vmatprep.subr.bf16.mxu0 %v9710_v61  ;;  %v9719_v61 = vld [vmem:[%s12297_s7 + $0x234] ss:$8 sps:$4 sm:$0xff]  }
 0x60b   : > { %9908 = vtanh.f32 %v5505_v6  ;;  %v5513_v21 = vadd.f32 %v11534_v20, %v5321_v14 }
 0x60c   : > { %v9899_v23 = vpop.eup %9898  ;;  %9910 = vtanh.f32 %v5512_v13 }
 0x60d   : > { %v9901_v18 = vpop.eup %9900  ;;  %9912 = vtanh.f32 %v5513_v21  ;;  %v9725_v21 = vld [vmem:[%s12297_s7 + $0x254] ss:$8 sps:$4 sm:$0xff]  }
 0x60e   : > { %v9903_v30 = vpop.eup %9902 }
 0x60f   : > { %v9905_v33 = vpop.eup %9904  ;;  %v8720_v27 = vpack.c.bf16 %v9903_v30, %v9899_v23  ;;  %v5411_v37 = vpop.f32.mrb[16].mxu1  ;;  %v9723_v30 = vld [vmem:[%s12297_s7 + $0x250] ss:$8 sps:$4 sm:$0xff]  }
 0x610   : > { %v5492_v39 = vadd.f32 %v11523_v2, %v5411_v37  ;;  %v5413_v34 = vpop.f32.mrb[17].mxu1  ;;  %v8717_v26 = vpack.c.bf16 %v9905_v33, %v9901_v18 }
 0x611   : > { %v5493_v62 = vadd.f32 %v11523_v2, %v5413_v34  ;;  %v5415_v43 = vpop.f32.mrb[18].mxu1  ;;  %v9711_v2 = vld [vmem:[%s12297_s7 + $0x210] ss:$8 sps:$4 sm:$0xff]   ;;  %v9726_v34 = vld [vmem:[%s12297_s7 + $0x260] ss:$8 sps:$4 sm:$0xff]  }
 0x612   : > { %9914 = vtanh.f32 %v5492_v39  ;;  %v5500_v9 = vadd.f32 %v11526_v8, %v5415_v43  ;;  %v5417_v47 = vpop.f32.mrb[19].mxu1  ;;  %8718 = vmatprep.mubr.msk.bf16.mxu0 %vm11700_vm10, %v8717_v26  ;;  %v9729_v43 = vld [vmem:[%s12297_s7 + $0x270] ss:$8 sps:$4 sm:$0xff]  }
 0x613   : > { %9916 = vtanh.f32 %v5493_v62  ;;  %v5501_v59 = vadd.f32 %v11526_v8, %v5417_v47  ;;  %8721 = vmatmul.mubr.msk.bf16.vlgmr.msra.gmra.mrb[28].mxu0 %vm11711_vm15, %v8720_v27  ;;  %v9728_v27 = vld [vmem:[%s12297_s7 + $0x264] ss:$8 sps:$4 sm:$0xff]   ;;  %v9735_v47 = vld [vmem:[%s12297_s7 + $0x290] ss:$8 sps:$4 sm:$0xff]  }
 0x614   : > { %v9907_v44 = vpop.eup %9906  ;;  %9918 = vtanh.f32 %v5500_v9  ;;  %6440 = vmatpush1.bf16.msra.mxu0 %v9708_v41  ;;  %v9737_v9 = vld [vmem:[%s12297_s7 + $0x294] ss:$8 sps:$4 sm:$0xff]  }
 0x615   : > { %v9909_v48 = vpop.eup %9908  ;;  %9920 = vtanh.f32 %v5501_v59  ;;  %6441 = vmatprep.subr.bf16.mxu0 %v9713_v45  ;;  %v9732_v45 = vld [vmem:[%s12297_s7 + $0x280] ss:$8 sps:$4 sm:$0xff]   ;;  %v9740_v59 = vld [vmem:[%s12297_s7 + $0x2a4] ss:$8 sps:$4 sm:$0xff]  }
 0x616   : > { %v9911_v46 = vpop.eup %9910 }
 0x617   : > { %v9913_v51 = vpop.eup %9912  ;;  %v5421_v8 = vpop.f32.mrb[20].mxu1  ;;  %v8726_v50 = vpack.c.bf16 %v9911_v46, %v9907_v44  ;;  %v9738_v44 = vld [vmem:[%s12297_s7 + $0x2a0] ss:$8 sps:$4 sm:$0xff]  }
 0x618   : > { %v5508_v54 = vadd.f32 %v11531_v7, %v5421_v8  ;;  %6442 = vmatpush1.bf16.msra.mxu0 %v9711_v2  ;;  %v5423_v55 = vpop.f32.mrb[21].mxu1  ;;  %v8723_v56 = vpack.c.bf16 %v9913_v51, %v9909_v48  ;;  %v9743_v2 = vld [vmem:[%s12297_s7 + $0x2b4] ss:$8 sps:$4 sm:$0xff]   ;;  %v9741_v48 = vld [vmem:[%s12297_s7 + $0x2b0] ss:$8 sps:$4 sm:$0xff]  }
 0x619   : > { %v5509_v52 = vadd.f32 %v11531_v7, %v5423_v55  ;;  %v5425_v58 = vpop.f32.mrb[22].mxu1  ;;  %6443 = vmatprep.subr.bf16.mxu0 %v9716_v49  ;;  %v9746_v49 = vld [vmem:[%s12297_s7 + $0x2c4] ss:$8 sps:$4 sm:$0xff]   ;;  %v9744_v46 = vld [vmem:[%s12297_s7 + $0x2c0] ss:$8 sps:$4 sm:$0xff]  }
 0x61a   : > { %9922 = vtanh.f32 %v5508_v54  ;;  %v5516_v57 = vadd.f32 %v11534_v20, %v5425_v58  ;;  %v5427_v1 = vpop.f32.mrb[23].mxu1  ;;  %8724 = vmatprep.mubr.msk.bf16.mxu0 %vm11700_vm10, %v8723_v56  ;;  %v9749_v51 = vld [vmem:[%s12297_s7 + $0x2d4] ss:$8 sps:$4 sm:$0xff]   ;;  %v9747_v8 = vld [vmem:[%s12297_s7 + $0x2d0] ss:$8 sps:$4 sm:$0xff]   ;;  %vm12333_vm10 = vcmp.eq.s32.totalorder %v10712_v15, 1 }
 0x61b   : > { %9924 = vtanh.f32 %v5509_v52  ;;  %v5517_v7 = vadd.f32 %v11534_v20, %v5427_v1  ;;  %8727 = vmatmul.mubr.msk.bf16.gmra.mrb[32].mxu0 %vm11711_vm15, %v8726_v50  ;;  %v9722_v20 = vld [vmem:[%s12297_s7 + $0x244] ss:$8 sps:$4 sm:$0xff]   ;;  %v9750_v54 = vld [vmem:[%s12297_s7 + $0x2e0] ss:$8 sps:$4 sm:$0xff]   ;;  %v9755_v55 = vld [vmem:[%s12297_s7 + $0x2f4] ss:$8 sps:$4 sm:$0xff]  }
 0x61c   : > { %v11752_v40 = vpop.eup %9914  ;;  %9926 = vtanh.f32 %v5516_v57  ;;  %6444 = vmatpush1.bf16.msra.mxu0 %v9714_v53  ;;  %8730 = vmatprep.mubr.msk.bf16.mxu0 %vm11739_vm0, %v8729_v10  ;;  %v9752_v50 = vld [vmem:[%s12297_s7 + $0x2e4] ss:$8 sps:$4 sm:$0xff]   ;;  %v9753_v56 = vld [vmem:[%s12297_s7 + $0x2f0] ss:$8 sps:$4 sm:$0xff]   ;;  %v9756_v52 = vld [vmem:[%s12297_s7 + $0x300] ss:$8 sps:$4 sm:$0xff]  }
 0x61d   : > { %v9917_v6 = vpop.eup %9916  ;;  %9928 = vtanh.f32 %v5517_v7  ;;  %6445 = vmatprep.subr.bf16.mxu0 %v9719_v61  ;;  %v9758_v53 = vld [vmem:[%s12297_s7 + $0x304] ss:$8 sps:$4 sm:$0xff]   ;;  %v9761_v58 = vld [vmem:[%s12297_s7 + $0x314] ss:$8 sps:$4 sm:$0xff]   ;;  %v9777_v1 = vld [vmem:[%s12297_s7 + $0x370] ss:$8 sps:$4 sm:$0xff]  }
 0x61e   : > { %v11765_v11 = vpop.eup %9918  ;;  %v11774_v10 = vsel %vm12328_vm3, %v9917_v6, 0.0  ;;  %v9764_v61 = vld [vmem:[%s12297_s7 + $0x324] ss:$8 sps:$4 sm:$0xff]   ;;  %vm8742_vm14 = vmpackc.low %vm12333_vm10, %vm12333_vm10  ;;  %vm12334_vm15 = vcmask 1047808   ;;  %vm6637_vm3 = vcmask 916480  }
 0x61f   : > { %v9921_v13 = vpop.eup %9920  ;;  %v8743_v12 = vpack.c.bf16 %v11765_v11, %v11752_v40  ;;  %v5753_v57 = vld [vmem:[%s12297_s7 + $0x380] sm:$0x33] }
 0x620   : > { %6446 = vmatpush1.bf16.msra.mxu0 %v9717_v3  ;;  %v11778_v14 = vsel %vm12329_vm4, %v9921_v13, 0.0  ;;  %v8703_v7 = vcombine.high %v5753_v57, %v5753_v57  ;;  %v8702_v3 = vcombine.low %v5753_v57, %v5753_v57  ;;  %vm6763_vm4 = vcmask 924672   ;;  %v9784_v57 = vld [vmem:[%s12295_s5 + $0x30] sm:$0xff]  }
 0x621   : > { %6447 = vmatprep.subr.bf16.mxu0 %v9722_v20  ;;  %v5632_v23 = vpack.c.bf16 %v11778_v14, %v11774_v10 }
 0x622   : > { %v6328_v6 = vsel %vm6326_vm9, %v8702_v3, 0 }
 0x624   : > { %v11785_v18 = vpop.eup %9922  ;;  %6448 = vmatpush1.bf16.msra.mxu0 %v9720_v4 }
 0x625   : > { %v9925_v33 = vpop.eup %9924  ;;  %6449 = vmatprep.subr.bf16.mxu0 %v9725_v21 }
 0x626   : > { %v11793_v37 = vpop.eup %9926  ;;  %v11802_v26 = vsel %vm12330_vm5, %v9925_v33, 0.0  ;;  %vm6898_vm5 = vcmask 908288  }
 0x627   : > { %v9929_v38 = vpop.eup %9928  ;;  %v8747_v39 = vpack.c.bf16 %v11793_v37, %v11785_v18 }
 0x628   : > { %6450 = vmatpush1.bf16.msra.mxu0 %v9723_v30  ;;  %v11806_v41 = vsel %vm12331_vm6, %v9929_v38, 0.0 }
 0x629   : > { %6451 = vmatprep.subr.bf16.mxu0 %v9728_v27  ;;  %v5640_v62 = vpack.c.bf16 %v11806_v41, %v11802_v26 }
 0x62c   : > { %6452 = vmatpush1.bf16.msra.mxu0 %v9726_v34 }
 0x62d   : > { %6453 = vmatprep.subr.bf16.mxu0 %v9731_v42 }
 0x630   : > { %6454 = vmatpush1.bf16.msra.mxu0 %v9729_v43  ;;  %v7912_v43 = vld [vmem:[%s12296_s6 + $0x8] sm:$0xff] }
 0x631   : > { %6455 = vmatprep.subr.bf16.mxu0 %v9734_v31  ;;  %v7913_v31 = vld [vmem:[%s12296_s6 + $0x10] sm:$0xff] }
 0x634   : > { %6456 = vmatpush1.bf16.msra.mxu0 %v9732_v45  ;;  %v7914_v45 = vld [vmem:[%s12296_s6 + $0x18] sm:$0xff] }
 0x635   : > { %6457 = vmatprep.subr.bf16.mxu0 %v9737_v9 }
 0x638   : > { %6458 = vmatpush1.bf16.msra.mxu0 %v9735_v47  ;;  %v7915_v47 = vld [vmem:[%s12296_s6 + $0x20] sm:$0xff] }
 0x639   : > { %6459 = vmatprep.subr.bf16.mxu0 %v9740_v59  ;;  %v7916_v59 = vld [vmem:[%s12296_s6 + $0x28] sm:$0xff] }
 0x63c   : > { %6460 = vmatpush1.bf16.msra.mxu0 %v9738_v44 }
 0x63d   : > { %6461 = vmatprep.subr.bf16.mxu0 %v9743_v2 }
 0x640   : > { %6462 = vmatpush1.bf16.msra.mxu0 %v9741_v48  ;;  %v7917_v48 = vld [vmem:[%s12296_s6 + $0x30] sm:$0xff] }
 0x641   : > { %6463 = vmatprep.subr.bf16.mxu0 %v9746_v49 }
 0x644   : > { %6464 = vmatpush1.bf16.msra.mxu0 %v9744_v46 }
 0x645   : > { %6465 = vmatprep.subr.bf16.mxu0 %v9749_v51 }
 0x648   : > { %6466 = vmatpush1.bf16.msra.mxu0 %v9747_v8  ;;  %v7918_v8 = vld [vmem:[%s12296_s6 + $0x38] sm:$0xff] }
 0x649   : > { %6467 = vmatprep.subr.bf16.mxu0 %v9752_v50 }
 0x64c   : > { %6468 = vmatpush1.bf16.msra.mxu0 %v9750_v54 }
 0x64d   : > { %6469 = vmatprep.subr.bf16.mxu0 %v9755_v55 }
 0x650   : > { %6470 = vmatpush1.bf16.msra.mxu0 %v9753_v56 }
 0x651   : > { %6492 = vmatprep.subr.bf16.mxu0 %v9758_v53  ;;  %v9782_v53 = vld [vmem:[%s12295_s5 + $0x20] sm:$0xff]  }
 0x653   : > { %8733 = vmatmul.mubr.msk.bf16.vlgmr.msra.gmra.mrb[28].mxu0 %vm8731_vm1, %v8732_v17  ;;  %v9765_v17 = vld [vmem:[%s12297_s7 + $0x330] ss:$8 sps:$4 sm:$0xff]  }
 0x654   : > { %8736 = vmatprep.mubr.msk.bf16.mxu0 %vm11739_vm0, %v8735_v32  ;;  %6493 = vmatpush1.bf16.msra.mxu0 %v9756_v52  ;;  %v9774_v32 = vld [vmem:[%s12297_s7 + $0x360] ss:$8 sps:$4 sm:$0xff]   ;;  %vm12335_vm0 = vmmov %vm12334_vm15 }
 0x655   : > { %6494 = vmatprep.subr.bf16.mxu0 %v9761_v58 }
 0x658   : > { %6495 = vmatpush1.bf16.msra.mxu0 %v9759_v35 }
 0x659   : > { %6496 = vmatprep.subr.bf16.mxu0 %v9764_v61 }
 0x65b   : > { %8739 = vmatmul.mubr.msk.bf16.gmra.mrb[32].mxu0 %vm8731_vm1, %v8738_v29  ;;  %v9776_v29 = vld [vmem:[%s12297_s7 + $0x364] ss:$8 sps:$4 sm:$0xff]  }
 0x65c   : > { %6497 = vmatpush1.bf16.msra.mxu0 %v9762_v63  ;;  %8741 = vmatprep.mubr.msk.bf16.mxu0 %vm6319_vm7, %v5632_v23 }
 0x65d   : > { %6498 = vmatprep.subr.bf16.mxu0 %v9767_v16 }
 0x660   : > { %6499 = vmatpush1.bf16.msra.mxu0 %v9765_v17  ;;  %v9783_v17 = vld [vmem:[%s12295_s5 + $0x28] sm:$0xff]  }
 0x661   : > { %6500 = vmatprep.subr.bf16.mxu0 %v9770_v24 }
 0x664   : > { %6501 = vmatpush1.bf16.msra.mxu0 %v9768_v22 }
 0x665   : > { %6502 = vmatprep.subr.bf16.mxu0 %v9773_v25 }
 0x668   : > { %6503 = vmatpush1.bf16.msra.mxu0 %v9771_v28 }
 0x669   : > { %6504 = vmatprep.subr.bf16.mxu0 %v9776_v29 }
 0x66c   : > { %6505 = vmatpush1.bf16.msra.mxu0 %v9774_v32 }
 0x66d   : > { %6506 = vmatprep.subr.bf16.mxu0 %v9779_v60 }
 0x670   : > { %6507 = vmatpush1.bf16.msra.mxu0 %v9777_v1  ;;  %v9785_v1 = vld [vmem:[%s12295_s5 + $0x38] sm:$0xff]  }
 0x671   : > { %8740 = vmatprep.subr.msk.bf16.mxu0 %vm6326_vm9, %v8703_v7  ;;  %vm8253_vm9 = vcmask 396288  }
 0x674   : > { %6509 = vmatpush1.bf16.msra.mxu0 %v6328_v6 }
 0x677   : > { %8744 = vmatmul.mubr.msk.bf16.vlgmr.msra.gmra.mrb[28].mxu0 %vm8742_vm14, %v8743_v12 }
 0x678   : > { %8745 = vmatprep.mubr.msk.bf16.mxu0 %vm6319_vm7, %v5640_v62  ;;  %v7911_v62 = vld [vmem:[%s12296_s6] sm:$0xff] }
 0x67f   : > { %8748 = vmatmul.mubr.msk.bf16.gmra.mrb[32].mxu0 %vm8742_vm14, %v8747_v39 }
 0x74a   : > { %v6526_v20 = vpop.f32.mrb[28].mxu0 }
 0x74b   : > { %v6528_v13 = vpop.f32.mrb[29].mxu0 }
 0x74c   : > { %v6530_v4 = vpop.f32.mrb[30].mxu0 }
 0x74d   : > { %v6545_v10 = vpack.c.bf16 %v6530_v4, %v6526_v20  ;;  %v6532_v15 = vpop.f32.mrb[31].mxu0 }
 0x74e   : > { %v6546_v14 = vpack.c.bf16 %v6532_v15, %v6528_v13  ;;  %v9786_v13 = vld [vmem:[%s12295_s5] sm:$0xff]  }
 0x74f   : > { %6553 = vrot.lane.b32.xlu1 %v6545_v10, %s10067_s16 }
 0x750   : > { %6555 = vrot.lane.b32.xlu0 %v6546_v14, %s10067_s16 }
 0x752   : > { %v6536_v40 = vpop.f32.mrb[32].mxu0 }
 0x753   : > { %v6538_v11 = vpop.f32.mrb[33].mxu0 }
 0x754   : > { %v6540_v12 = vpop.f32.mrb[34].mxu0 }
 0x755   : > { %v6547_v21 = vpack.c.bf16 %v6540_v12, %v6536_v40  ;;  %v6542_v23 = vpop.f32.mrb[35].mxu0 }
 0x756   : > { %v6548_v30 = vpack.c.bf16 %v6542_v23, %v6538_v11  ;;  %v9787_v11 = vld [vmem:[%s12295_s5 + $0x8] sm:$0xff]   ;;  %v9789_v23 = vld [vmem:[%s12295_s5 + $0x18] sm:$0xff]  }
 0x757   : > { %6557 = vrot.lane.b32.xlu1 %v6547_v21, %s10067_s16  ;;  %v9788_v21 = vld [vmem:[%s12295_s5 + $0x10] sm:$0xff]  }
 0x758   : > { %6559 = vrot.lane.b32.xlu0 %v6548_v30, %s10067_s16  ;;  %s10079_s16 = smov 113  }
 0x7c1   : > { %v6554_v18 = vpop.permute.xlu1 %6553 }
 0x7c2   : > { %6569 = vst.msk [vmem:[#allocation4] sm:$0xff] %vm12334_vm15, %v6554_v18  ;;  %v6556_v33 = vpop.permute.xlu0 %6555 }
 0x7c3   : > { %v11952_v27 = vsel %vm448_vm2, %v6554_v18, %v6556_v33  ;;  %6572 = vst.msk [vmem:[#allocation4 + $0x10] sm:$0xff] %vm448_vm2, %v6556_v33 }
 0x7c9   : > { %v6558_v37 = vpop.permute.xlu1 %6557  ;;  %v11955_v38 = vld [vmem:[#allocation4] sm:$0xff] }
 0x7ca   : > { %6573 = vst.msk [vmem:[#allocation4 + $0x18] sm:$0xff] %vm12335_vm0, %v6558_v37  ;;  %6625 = vrot.lane.b32.xlu1 %v11955_v38, %s10078_s13  ;;  %v6560_v39 = vpop.permute.xlu0 %6559  ;;  %v6578_v34 = vld [vmem:[#allocation4 + $0x10] sm:$0xff] }
 0x7cb   : > { %v6562_v26 = vsel %vm448_vm2, %v6558_v37, %v6560_v39  ;;  %6575 = vst.msk [vmem:[#allocation4 + $0x28] sm:$0xff] %vm448_vm2, %v6560_v39  ;;  %6629 = vrot.lane.b32.xlu0 %v6578_v34, %s10078_s13  ;;  %v9790_v37 = vld [vmem:[%s12295_s5 + $0x40] sm:$0xff]  }
 0x7ce   : > { %6627 = vrot.lane.b32.xlu1 %v11952_v27, %s10078_s13 }
 0x7cf   : > { %6633 = vrot.lane.b32.xlu0 %v6562_v26, %s10078_s13 }
 0x7d1   : > { %v6579_v41 = vld [vmem:[#allocation4 + $0x18] sm:$0xff] }
 0x7d2   : > { %v6581_v42 = vld [vmem:[#allocation4 + $0x28] sm:$0xff] }
 0x7d3   : > { %6635 = vrot.lane.b32.xlu1 %v6581_v42, %s10078_s13  ;;  %6631 = vrot.lane.b32.xlu0 %v6579_v41, %s10078_s13  ;;  %s12269_s13 = scalar_lea.vmem %s12301_s11, %s8935_s21 }
 0x7d7   : > { %6753 = vrot.lane.b32.xlu1 %v11952_v27, %s10079_s16  ;;  %6755 = vrot.lane.b32.xlu0 %v6578_v34, %s10079_s16 }
 0x7db   : > { %6751 = vrot.lane.b32.xlu1 %v11955_v38, %s10079_s16  ;;  %6759 = vrot.lane.b32.xlu0 %v6562_v26, %s10079_s16 }
 0x7df   : > { %6761 = vrot.lane.b32.xlu1 %v6581_v42, %s10079_s16  ;;  %6757 = vrot.lane.b32.xlu0 %v6579_v41, %s10079_s16 }
 0x7e3   : > { %6888 = vrot.lane.b32.xlu1 %v11952_v27, %s10080_s14  ;;  %6890 = vrot.lane.b32.xlu0 %v6578_v34, %s10080_s14 }
 0x7e7   : > { %6886 = vrot.lane.b32.xlu1 %v11955_v38, %s10080_s14  ;;  %6894 = vrot.lane.b32.xlu0 %v6562_v26, %s10080_s14 }
 0x7eb   : > { %6896 = vrot.lane.b32.xlu1 %v6581_v42, %s10080_s14  ;;  %6892 = vrot.lane.b32.xlu0 %v6579_v41, %s10080_s14 }
 0x7ef   : > { %7039 = vrot.lane.b32.xlu1 %v11952_v27, %s10072_s27  ;;  %7041 = vrot.lane.b32.xlu0 %v6578_v34, %s10072_s27 }
 0x7f3   : > { %7037 = vrot.lane.b32.xlu1 %v11955_v38, %s10072_s27  ;;  %7045 = vrot.lane.b32.xlu0 %v6562_v26, %s10072_s27 }
 0x7f7   : > { %7047 = vrot.lane.b32.xlu1 %v6581_v42, %s10072_s27  ;;  %7043 = vrot.lane.b32.xlu0 %v6579_v41, %s10072_s27  ;;  %s10081_s27 = smov 81  }
 0x7fb   : > { %7189 = vrot.lane.b32.xlu1 %v11952_v27, %s10073_s28  ;;  %7191 = vrot.lane.b32.xlu0 %v6578_v34, %s10073_s28 }
 0x7ff   : > { %7187 = vrot.lane.b32.xlu1 %v11955_v38, %s10073_s28  ;;  %7195 = vrot.lane.b32.xlu0 %v6562_v26, %s10073_s28 }
 0x803   : > { %7197 = vrot.lane.b32.xlu1 %v6581_v42, %s10073_s28  ;;  %7193 = vrot.lane.b32.xlu0 %v6579_v41, %s10073_s28  ;;  %s10082_s28 = smov 80  }
 0x807   : > { %7339 = vrot.lane.b32.xlu1 %v11952_v27, %s10074_s29  ;;  %7341 = vrot.lane.b32.xlu0 %v6578_v34, %s10074_s29 }
 0x80b   : > { %7337 = vrot.lane.b32.xlu1 %v11955_v38, %s10074_s29  ;;  %7345 = vrot.lane.b32.xlu0 %v6562_v26, %s10074_s29 }
 0x80f   : > { %7347 = vrot.lane.b32.xlu1 %v6581_v42, %s10074_s29  ;;  %7343 = vrot.lane.b32.xlu0 %v6579_v41, %s10074_s29 }
 0x813   : > { %7489 = vrot.lane.b32.xlu1 %v11952_v27, %s10081_s27  ;;  %7491 = vrot.lane.b32.xlu0 %v6578_v34, %s10081_s27 }
 0x817   : > { %7487 = vrot.lane.b32.xlu1 %v11955_v38, %s10081_s27  ;;  %7495 = vrot.lane.b32.xlu0 %v6562_v26, %s10081_s27 }
 0x81b   : > { %7497 = vrot.lane.b32.xlu1 %v6581_v42, %s10081_s27  ;;  %7493 = vrot.lane.b32.xlu0 %v6579_v41, %s10081_s27 }
 0x81f   : > { %7640 = vrot.lane.b32.xlu1 %v11952_v27, %s10082_s28  ;;  %7642 = vrot.lane.b32.xlu0 %v6578_v34, %s10082_s28 }
 0x823   : > { %7638 = vrot.lane.b32.xlu1 %v11955_v38, %s10082_s28  ;;  %7646 = vrot.lane.b32.xlu0 %v6562_v26, %s10082_s28 }
 0x827   : > { %7648 = vrot.lane.b32.xlu1 %v6581_v42, %s10082_s28  ;;  %7644 = vrot.lane.b32.xlu0 %v6579_v41, %s10082_s28 }
 0x82b   : > { %7791 = vrot.lane.b32.xlu1 %v11952_v27, %s10083_s30  ;;  %7793 = vrot.lane.b32.xlu0 %v6578_v34, %s10083_s30 }
 0x82f   : > { %7789 = vrot.lane.b32.xlu1 %v11955_v38, %s10083_s30  ;;  %7797 = vrot.lane.b32.xlu0 %v6562_v26, %s10083_s30 }
 0x833   : > { %7799 = vrot.lane.b32.xlu1 %v6581_v42, %s10083_s30  ;;  %7795 = vrot.lane.b32.xlu0 %v6579_v41, %s10083_s30  ;;  %v9791_v42 = vld [vmem:[%s12295_s5 + $0x48] sm:$0xff]  }
 0x837   : > { %7921 = vperm.xlu1 %9580, %v7911_v62   ;;  %7926 = vperm.xlu0 %9579, %v7912_v43   ;;  %v9792_v43 = vld [vmem:[%s12295_s5 + $0x50] sm:$0xff]  }
 0x83b   : > { %7931 = vperm.xlu1 %9580, %v7913_v31   ;;  %7936 = vperm.xlu0 %9579, %v7914_v45   ;;  %v9793_v31 = vld [vmem:[%s12295_s5 + $0x58] sm:$0xff]  }
 0x83c   : > { %v6626_v9 = vpop.permute.xlu1 %6625 }
 0x83d   : > { %v6630_v44 = vpop.permute.xlu0 %6629 }
 0x83f   : > { %7941 = vperm.xlu1 %9580, %v7915_v47   ;;  %7946 = vperm.xlu0 %9579, %v7916_v59  }
 0x840   : > { %v6628_v2 = vpop.permute.xlu1 %6627 }
 0x841   : > { %v6638_v49 = vsel %vm6637_vm3, %v6626_v9, %v6628_v2  ;;  %v6639_v46 = vsel %vm6637_vm3, %v6628_v2, %v6630_v44  ;;  %v6634_v51 = vpop.permute.xlu0 %6633  ;;  %v9794_v44 = vld [vmem:[%s12295_s5 + $0x60] sm:$0xff]  }
 0x842   : > { %6658 = vmatprep.subr.bf16.mxu1 %v6639_v46 }
 0x843   : > { %7951 = vperm.xlu1 %9580, %v7917_v48   ;;  %6659 = vmatpush1.bf16.msra.mxu1 %v6638_v49 }
 0x844   : > { %7956 = vperm.xlu0 %9579, %v7918_v8   ;;  %v9795_v8 = vld [vmem:[%s12295_s5 + $0x68] sm:$0xff]  }
 0x845   : > { %v6636_v50 = vpop.permute.xlu1 %6635  ;;  %v6632_v54 = vpop.permute.xlu0 %6631 }
 0x846   : > { %v6641_v55 = vsel %vm6637_vm3, %v6634_v51, %v6636_v50  ;;  %v6640_v56 = vsel %vm6637_vm3, %v6632_v54, %v6634_v51  ;;  %v9796_v54 = vld [vmem:[%s12295_s5 + $0x70] sm:$0xff]  }
 0x847   : > { %6660 = vmatprep.subr.bf16.mxu1 %v6641_v55  ;;  %v9797_v55 = vld [vmem:[%s12295_s5 + $0x78] sm:$0xff]  }
 0x848   : > { %6661 = vmatpush1.bf16.msra.mxu1 %v6640_v56 }
 0x849   : > { %v6754_v52 = vpop.permute.xlu1 %6753  ;;  %v6756_v58 = vpop.permute.xlu0 %6755 }
 0x84a   : > { %v6765_v35 = vsel %vm6763_vm4, %v6754_v52, %v6756_v58 }
 0x84b   : > { %8761 = vmatmul.mubr.msk.bf16.vlgmr.msra.gmra.mrb[24].mxu1 %vm448_vm2, %v9782_v53  ;;  %6784 = vmatprep.subr.bf16.mxu1 %v6765_v35  ;;  %v9798_v35 = vld [vmem:[%s12295_s5 + $0x80] sm:$0xff]  }
 0x84c   : > { %6700 = vmatprep.mubr.bf16.mxu1 %v10068_v19 }
 0x84d   : > { %v6752_v61 = vpop.permute.xlu1 %6751  ;;  %v6760_v63 = vpop.permute.xlu0 %6759 }
 0x84e   : > { %v6764_v16 = vsel %vm6763_vm4, %v6752_v61, %v6754_v52 }
 0x84f   : > { %6785 = vmatpush1.bf16.msra.mxu1 %v6764_v16 }
 0x851   : > { %v6762_v24 = vpop.permute.xlu1 %6761  ;;  %v6758_v22 = vpop.permute.xlu0 %6757 }
 0x852   : > { %v6767_v25 = vsel %vm6763_vm4, %v6760_v63, %v6762_v24  ;;  %v6766_v28 = vsel %vm6763_vm4, %v6758_v22, %v6760_v63  ;;  %v9799_v22 = vld [vmem:[%s12295_s5 + $0x88] sm:$0xff]  }
 0x853   : > { %6786 = vmatprep.subr.bf16.mxu1 %v6767_v25  ;;  %8762 = vmatmul.mubr.msk.bf16.gmra.mrb[28].mxu1 %vm448_vm2, %v9783_v17 }
 0x854   : > { %6787 = vmatpush1.bf16.msra.mxu1 %v6766_v28  ;;  %6710 = vmatprep.mubr.bf16.mxu1 %v10068_v19  ;;  %v9800_v28 = vld [vmem:[%s12295_s5 + $0x90] sm:$0xff]  }
 0x855   : > { %v6889_v29 = vpop.permute.xlu1 %6888  ;;  %v6891_v32 = vpop.permute.xlu0 %6890 }
 0x856   : > { %v6900_v60 = vsel %vm6898_vm5, %v6889_v29, %v6891_v32 }
 0x857   : > { %6919 = vmatprep.subr.bf16.mxu1 %v6900_v60 }
 0x859   : > { %v6887_v7 = vpop.permute.xlu1 %6886  ;;  %v6895_v3 = vpop.permute.xlu0 %6894 }
 0x85a   : > { %v6899_v4 = vsel %vm6898_vm5, %v6887_v7, %v6889_v29  ;;  %v9801_v29 = vld [vmem:[%s12295_s5 + $0x98] sm:$0xff]  }
 0x85b   : > { %8763 = vmatmul.mubr.msk.bf16.gmra.mrb[32].mxu1 %vm448_vm2, %v9784_v57  ;;  %v9818_v57 = vld [vmem:[#allocation5 + $0x40] sm:$0xff]   ;;  %v9820_v7 = vld [vmem:[#allocation5 + $0x48] sm:$0xff]  }
 0x85c   : > { %6720 = vmatprep.mubr.bf16.mxu1 %v10068_v19  ;;  %8945 = vmatprep.subr.bf16.mxu0 %v9818_v57 }
 0x85d   : > { %v6897_v6 = vpop.permute.xlu1 %6896  ;;  %v6893_v20 = vpop.permute.xlu0 %6892 }
 0x85e   : > { %v6902_v10 = vsel %vm6898_vm5, %v6895_v3, %v6897_v6  ;;  %v6901_v40 = vsel %vm6898_vm5, %v6893_v20, %v6895_v3  ;;  %v9821_v3 = vld [vmem:[#allocation5 + $0x8] sm:$0xff]  }
 0x861   : > { %v7040_v15 = vpop.permute.xlu1 %7039  ;;  %v7042_v14 = vpop.permute.xlu0 %7041 }
 0x862   : > { %v7050_v12 = vsel %vm1228_vm11, %v7040_v15, %v7042_v14 }
 0x863   : > { %8764 = vmatmul.mubr.msk.bf16.gmra.mrb[36].mxu1 %vm448_vm2, %v9785_v1  ;;  %v9819_v1 = vld [vmem:[#allocation5] sm:$0xff]  }
 0x864   : > { %6816 = vmatprep.mubr.bf16.mxu1 %v10068_v19  ;;  %8946 = vmatpush3.bf16.msra.mxu0 %v9819_v1 }
 0x865   : > { %v7038_v30 = vpop.permute.xlu1 %7037  ;;  %v7046_v18 = vpop.permute.xlu0 %7045  ;;  %8947 = vmatprep.subr.bf16.mxu0 %v9820_v7 }
 0x866   : > { %v7049_v38 = vsel %vm1228_vm11, %v7038_v30, %v7040_v15  ;;  %v9804_v30 = vld [vmem:[%s12295_s5 + $0xb0] sm:$0xff]  }
 0x868   : > { %8948 = vmatpush3.bf16.msra.mxu0 %v9821_v3 }
 0x869   : > { %v7048_v33 = vpop.permute.xlu1 %7047  ;;  %v7044_v27 = vpop.permute.xlu0 %7043 }
 0x86a   : > { %v7052_v39 = vsel %vm1228_vm11, %v7046_v18, %v7048_v33  ;;  %v7051_v41 = vsel %vm1228_vm11, %v7044_v27, %v7046_v18  ;;  %vm7499_vm11 = vcmask 662528   ;;  %v9805_v18 = vld [vmem:[%s12295_s5 + $0xb8] sm:$0xff]  }
 0x86b   : > { %8769 = vmatmul.mubr.msk.bf16.vlgmr.msra.gmra.mrb[24].mxu1 %vm448_vm2, %v9786_v13  ;;  %v9802_v13 = vld [vmem:[%s12295_s5 + $0xa0] sm:$0xff]  }
 0x86c   : > { %6920 = vmatpush1.bf16.msra.mxu1 %v6899_v4  ;;  %6826 = vmatprep.mubr.bf16.mxu1 %v10068_v19  ;;  %v9822_v4 = vld [vmem:[#allocation5 + $0x50] sm:$0xff]  }
 0x86d   : > { %6921 = vmatprep.subr.bf16.mxu1 %v6902_v10  ;;  %v7190_v34 = vpop.permute.xlu1 %7189  ;;  %v7192_v26 = vpop.permute.xlu0 %7191  ;;  %v9823_v10 = vld [vmem:[#allocation5 + $0x10] sm:$0xff]   ;;  %8949 = vmatprep.subr.bf16.mxu0 %v9822_v4 }
 0x86e   : > { %v7200_v62 = vsel %vm1475_vm12, %v7190_v34, %v7192_v26  ;;  %8950 = vmatpush3.bf16.msra.mxu0 %v9823_v10 }
 0x870   : > { %6922 = vmatpush1.bf16.msra.mxu1 %v6901_v40 }
 0x871   : > { %7069 = vmatprep.subr.bf16.mxu1 %v7050_v12  ;;  %v7188_v45 = vpop.permute.xlu1 %7187  ;;  %v7196_v9 = vpop.permute.xlu0 %7195 }
 0x872   : > { %v7199_v2 = vsel %vm1475_vm12, %v7188_v45, %v7190_v34  ;;  %v9808_v45 = vld [vmem:[%s12295_s5 + $0xd0] sm:$0xff]  }
 0x873   : > { %8770 = vmatmul.mubr.msk.bf16.gmra.mrb[28].mxu1 %vm448_vm2, %v9787_v11 }
 0x874   : > { %6836 = vmatprep.mubr.bf16.mxu1 %v10068_v19 }
 0x875   : > { %v7198_v47 = vpop.permute.xlu1 %7197  ;;  %v7194_v59 = vpop.permute.xlu0 %7193 }
 0x876   : > { %v7202_v48 = vsel %vm1475_vm12, %v7196_v9, %v7198_v47  ;;  %v7201_v51 = vsel %vm1475_vm12, %v7194_v59, %v7196_v9  ;;  %vm7650_vm12 = vcmask 654336   ;;  %v9809_v9 = vld [vmem:[%s12295_s5 + $0xd8] sm:$0xff]  }
 0x879   : > { %v7340_v49 = vpop.permute.xlu1 %7339  ;;  %v7342_v46 = vpop.permute.xlu0 %7341 }
 0x87a   : > { %v7350_v50 = vsel %vm1722_vm13, %v7340_v49, %v7342_v46 }
 0x87b   : > { %8771 = vmatmul.mubr.msk.bf16.gmra.mrb[32].mxu1 %vm448_vm2, %v9788_v21  ;;  %v9803_v21 = vld [vmem:[%s12295_s5 + $0xa8] sm:$0xff]  }
 0x87c   : > { %6846 = vmatprep.mubr.bf16.mxu1 %v10068_v19 }
 0x87d   : > { %v7338_v56 = vpop.permute.xlu1 %7337  ;;  %v7346_v53 = vpop.permute.xlu0 %7345 }
 0x87e   : > { %v7349_v61 = vsel %vm1722_vm13, %v7338_v56, %v7340_v49  ;;  %v9815_v56 = vld [vmem:[%s12295_s5 + $0x108] sm:$0xff]  }
 0x881   : > { %v7348_v52 = vpop.permute.xlu1 %7347  ;;  %v7344_v58 = vpop.permute.xlu0 %7343 }
 0x882   : > { %v7352_v63 = vsel %vm1722_vm13, %v7346_v53, %v7348_v52  ;;  %v7351_v24 = vsel %vm1722_vm13, %v7344_v58, %v7346_v53  ;;  %vm7801_vm13 = vcmask 646144   ;;  %v9816_v53 = vld [vmem:[%s12295_s5 + $0x110] sm:$0xff]   ;;  %v9817_v52 = vld [vmem:[%s12295_s5 + $0x118] sm:$0xff]   ;;  %v9824_v58 = vld [vmem:[#allocation5 + $0x58] sm:$0xff]  }
 0x883   : > { %8772 = vmatmul.mubr.msk.bf16.gmra.mrb[36].mxu1 %vm448_vm2, %v9789_v23  ;;  %8951 = vmatprep.subr.bf16.mxu0 %v9824_v58 }
 0x884   : > { %6951 = vmatprep.mubr.bf16.mxu1 %v10068_v19 }
 0x885   : > { %v7490_v16 = vpop.permute.xlu1 %7489  ;;  %v7492_v17 = vpop.permute.xlu0 %7491 }
 0x886   : > { %v7501_v25 = vsel %vm7499_vm11, %v7490_v16, %v7492_v17  ;;  %v9829_v17 = vld [vmem:[#allocation5 + $0x28] sm:$0xff]  }
 0x889   : > { %v7488_v32 = vpop.permute.xlu1 %7487  ;;  %v7496_v60 = vpop.permute.xlu0 %7495 }
 0x88a   : > { %v7500_v15 = vsel %vm7499_vm11, %v7488_v32, %v7490_v16  ;;  %v9828_v16 = vld [vmem:[#allocation5 + $0x68] sm:$0xff]  }
 0x88b   : > { %8785 = vmatmul.mubr.msk.bf16.vlgmr.msra.gmra.mrb[24].mxu1 %vm448_vm2, %v9790_v37 }
 0x88c   : > { %7070 = vmatpush1.bf16.msra.mxu1 %v7049_v38  ;;  %6961 = vmatprep.mubr.bf16.mxu1 %v10068_v19 }
 0x88d   : > { %7071 = vmatprep.subr.bf16.mxu1 %v7052_v39  ;;  %v7498_v6 = vpop.permute.xlu1 %7497  ;;  %v7494_v20 = vpop.permute.xlu0 %7493  ;;  %v9806_v39 = vld [vmem:[%s12295_s5 + $0xc0] sm:$0xff]  }
 0x88e   : > { %v7503_v14 = vsel %vm7499_vm11, %v7496_v60, %v7498_v6  ;;  %v7502_v12 = vsel %vm7499_vm11, %v7494_v20, %v7496_v60  ;;  %v7991_v60 = vld [vmem:[#allocation9] sm:$0x3] }
 0x890   : > { %7072 = vmatpush1.bf16.msra.mxu1 %v7051_v41 }
 0x891   : > { %7219 = vmatprep.subr.bf16.mxu1 %v7200_v62  ;;  %v7641_v40 = vpop.permute.xlu1 %7640  ;;  %v7643_v11 = vpop.permute.xlu0 %7642 }
 0x892   : > { %v7652_v23 = vsel %vm7650_vm12, %v7641_v40, %v7643_v11 }
 0x893   : > { %8786 = vmatmul.mubr.msk.bf16.gmra.mrb[28].mxu1 %vm448_vm2, %v9791_v42 }
 0x894   : > { %6971 = vmatprep.mubr.bf16.mxu1 %v10068_v19 }
 0x895   : > { %v7639_v33 = vpop.permute.xlu1 %7638  ;;  %v7647_v27 = vpop.permute.xlu0 %7646 }
 0x896   : > { %v7651_v34 = vsel %vm7650_vm12, %v7639_v33, %v7641_v40 }
 0x899   : > { %v7649_v37 = vpop.permute.xlu1 %7648  ;;  %v7645_v38 = vpop.permute.xlu0 %7644 }
 0x89a   : > { %v7654_v26 = vsel %vm7650_vm12, %v7647_v27, %v7649_v37  ;;  %v7653_v62 = vsel %vm7650_vm12, %v7645_v38, %v7647_v27 }
 0x89b   : > { %8787 = vmatmul.mubr.msk.bf16.gmra.mrb[32].mxu1 %vm448_vm2, %v9792_v43  ;;  %v9807_v43 = vld [vmem:[%s12295_s5 + $0xc8] sm:$0xff]  }
 0x89c   : > { %6981 = vmatprep.mubr.bf16.mxu1 %v10068_v19 }
 0x89d   : > { %v7792_v41 = vpop.permute.xlu1 %7791  ;;  %v7794_v42 = vpop.permute.xlu0 %7793 }
 0x8a1   : > { %v7790_v47 = vpop.permute.xlu1 %7789  ;;  %v7798_v59 = vpop.permute.xlu0 %7797 }
 0x8a3   : > { %8788 = vmatmul.mubr.msk.bf16.gmra.mrb[36].mxu1 %vm448_vm2, %v9793_v31  ;;  %v7803_v31 = vsel %vm7801_vm13, %v7792_v41, %v7794_v42 }
 0x8a4   : > { %7101 = vmatprep.mubr.bf16.mxu1 %v10068_v19 }
 0x8a5   : > { %v7796_v49 = vpop.permute.xlu0 %7795 }
 0x8ab   : > { %8801 = vmatmul.mubr.msk.bf16.vlgmr.msra.gmra.mrb[24].mxu1 %vm448_vm2, %v9794_v44  ;;  %v9810_v44 = vld [vmem:[%s12295_s5 + $0xe0] sm:$0xff]  }
 0x8ac   : > { %7220 = vmatpush1.bf16.msra.mxu1 %v7199_v2  ;;  %7111 = vmatprep.mubr.bf16.mxu1 %v10068_v19  ;;  %v7800_v2 = vpop.permute.xlu1 %7799 }
 0x8ad   : > { %7221 = vmatprep.subr.bf16.mxu1 %v7202_v48  ;;  %v7802_v48 = vsel %vm7801_vm13, %v7790_v47, %v7792_v41  ;;  %v7805_v46 = vsel %vm7801_vm13, %v7798_v59, %v7800_v2 }
 0x8b0   : > { %7222 = vmatpush1.bf16.msra.mxu1 %v7201_v51  ;;  %v7804_v51 = vsel %vm7801_vm13, %v7796_v49, %v7798_v59 }
 0x8b1   : > { %7369 = vmatprep.subr.bf16.mxu1 %v7350_v50  ;;  %v9812_v50 = vld [vmem:[%s12295_s5 + $0xf0] sm:$0xff]  }
 0x8b3   : > { %8802 = vmatmul.mubr.msk.bf16.gmra.mrb[28].mxu1 %vm448_vm2, %v9795_v8  ;;  %v9811_v8 = vld [vmem:[%s12295_s5 + $0xe8] sm:$0xff]  }
 0x8b4   : > { %7121 = vmatprep.mubr.bf16.mxu1 %v10068_v19 }
 0x8b6   : > { %v7927_v7 = vpop.permute.xlu0 %7926 }
 0x8bb   : > { %8803 = vmatmul.mubr.msk.bf16.gmra.mrb[32].mxu1 %vm448_vm2, %v9796_v54  ;;  %v9813_v54 = vld [vmem:[%s12295_s5 + $0xf8] sm:$0xff]  }
 0x8bc   : > { %7131 = vmatprep.mubr.bf16.mxu1 %v10068_v19 }
 0x8c3   : > { %8804 = vmatmul.mubr.msk.bf16.gmra.mrb[36].mxu1 %vm448_vm2, %v9797_v55  ;;  %v9814_v55 = vld [vmem:[%s12295_s5 + $0x100] sm:$0xff]  }
 0x8c4   : > { %7251 = vmatprep.mubr.bf16.mxu1 %v10068_v19 }
 0x8cb   : > { %8817 = vmatmul.mubr.msk.bf16.vlgmr.msra.gmra.mrb[24].mxu1 %vm448_vm2, %v9798_v35  ;;  %v9825_v35 = vld [vmem:[#allocation5 + $0x18] sm:$0xff]  }
 0x8cc   : > { %7370 = vmatpush1.bf16.msra.mxu1 %v7349_v61  ;;  %7261 = vmatprep.mubr.bf16.mxu1 %v10068_v19  ;;  %v9826_v61 = vld [vmem:[#allocation5 + $0x60] sm:$0xff]  }
 0x8cd   : > { %7371 = vmatprep.subr.bf16.mxu1 %v7352_v63  ;;  %8952 = vmatpush3.bf16.msra.mxu0 %v9825_v35  ;;  %v9827_v63 = vld [vmem:[#allocation5 + $0x20] sm:$0xff]  }
 0x8ce   : > { %8953 = vmatprep.subr.bf16.mxu0 %v9826_v61 }
 0x8d0   : > { %7372 = vmatpush1.bf16.msra.mxu1 %v7351_v24  ;;  %v9830_v24 = vld [vmem:[#allocation5 + $0x70] sm:$0xff]  }
 0x8d1   : > { %7520 = vmatprep.subr.bf16.mxu1 %v7501_v25  ;;  %8954 = vmatpush3.bf16.msra.mxu0 %v9827_v63  ;;  %v9832_v25 = vld [vmem:[#allocation5 + $0x78] sm:$0xff]  }
 0x8d2   : > { %8955 = vmatprep.subr.bf16.mxu0 %v9828_v16 }
 0x8d3   : > { %8818 = vmatmul.mubr.msk.bf16.gmra.mrb[28].mxu1 %vm448_vm2, %v9799_v22  ;;  %v9831_v22 = vld [vmem:[#allocation5 + $0x30] sm:$0xff]  }
 0x8d4   : > { %7271 = vmatprep.mubr.bf16.mxu1 %v10068_v19 }
 0x8d5   : > { %8956 = vmatpush3.bf16.msra.mxu0 %v9829_v17 }
 0x8d6   : > { %8957 = vmatprep.subr.bf16.mxu0 %v9830_v24 }
 0x8d9   : > { %8958 = vmatpush3.bf16.msra.mxu0 %v9831_v22 }
 0x8da   : > { %8959 = vmatprep.subr.bf16.mxu0 %v9832_v25 }
 0x8db   : > { %8819 = vmatmul.mubr.msk.bf16.gmra.mrb[32].mxu1 %vm448_vm2, %v9800_v28  ;;  %v9833_v28 = vld [vmem:[#allocation5 + $0x38] sm:$0xff]  }
 0x8dc   : > { %7281 = vmatprep.mubr.bf16.mxu1 %v10068_v19 }
 0x8dd   : > { %8960 = vmatpush3.bf16.msra.mxu0 %v9833_v28 }
 0x8e3   : > { %8820 = vmatmul.mubr.msk.bf16.gmra.mrb[36].mxu1 %vm448_vm2, %v9801_v29  ;;  %v7922_v29 = vpop.permute.xlu1 %7921 }
 0x8e4   : > { %7401 = vmatprep.mubr.bf16.mxu1 %v10068_v19 }
 0x8eb   : > { %8833 = vmatmul.mubr.msk.bf16.vlgmr.msra.gmra.mrb[24].mxu1 %vm448_vm2, %v9802_v13 }
 0x8ec   : > { %7521 = vmatpush1.bf16.msra.mxu1 %v7500_v15  ;;  %7411 = vmatprep.mubr.bf16.mxu1 %v10068_v19  ;;  %v7932_v15 = vpop.permute.xlu1 %7931 }
 0x8ed   : > { %7522 = vmatprep.subr.bf16.mxu1 %v7503_v14 }
 0x8f0   : > { %7523 = vmatpush1.bf16.msra.mxu1 %v7502_v12 }
 0x8f1   : > { %7671 = vmatprep.subr.bf16.mxu1 %v7652_v23 }
 0x8f3   : > { %8834 = vmatmul.mubr.msk.bf16.gmra.mrb[28].mxu1 %vm448_vm2, %v9803_v21  ;;  %v7937_v21 = vpop.permute.xlu0 %7936 }
 0x8f4   : > { %7421 = vmatprep.mubr.bf16.mxu1 %v10068_v19 }
 0x8fb   : > { %8835 = vmatmul.mubr.msk.bf16.gmra.mrb[32].mxu1 %vm448_vm2, %v9804_v30 }
 0x8fc   : > { %7431 = vmatprep.mubr.bf16.mxu1 %v10068_v19 }
 0x903   : > { %8836 = vmatmul.mubr.msk.bf16.gmra.mrb[36].mxu1 %vm448_vm2, %v9805_v18 }
 0x904   : > { %7552 = vmatprep.mubr.bf16.mxu1 %v10068_v19 }
 0x90b   : > { %8849 = vmatmul.mubr.msk.bf16.vlgmr.msra.gmra.mrb[24].mxu1 %vm448_vm2, %v9806_v39 }
 0x90c   : > { %7672 = vmatpush1.bf16.msra.mxu1 %v7651_v34  ;;  %7562 = vmatprep.mubr.bf16.mxu1 %v10068_v19 }
 0x90d   : > { %7673 = vmatprep.subr.bf16.mxu1 %v7654_v26 }
 0x910   : > { %7674 = vmatpush1.bf16.msra.mxu1 %v7653_v62 }
 0x911   : > { %7822 = vmatprep.subr.bf16.mxu1 %v7803_v31  ;;  %v7947_v31 = vpop.permute.xlu0 %7946 }
 0x913   : > { %8850 = vmatmul.mubr.msk.bf16.gmra.mrb[28].mxu1 %vm448_vm2, %v9807_v43 }
 0x914   : > { %7572 = vmatprep.mubr.bf16.mxu1 %v10068_v19 }
 0x91b   : > { %8851 = vmatmul.mubr.msk.bf16.gmra.mrb[32].mxu1 %vm448_vm2, %v9808_v45 }
 0x91c   : > { %7582 = vmatprep.mubr.bf16.mxu1 %v10068_v19 }
 0x923   : > { %8852 = vmatmul.mubr.msk.bf16.gmra.mrb[36].mxu1 %vm448_vm2, %v9809_v9 }
 0x924   : > { %7703 = vmatprep.mubr.bf16.mxu1 %v10068_v19 }
 0x92b   : > { %8865 = vmatmul.mubr.msk.bf16.vlgmr.msra.gmra.mrb[24].mxu1 %vm448_vm2, %v9810_v44 }
 0x92c   : > { %7823 = vmatpush1.bf16.msra.mxu1 %v7802_v48  ;;  %7713 = vmatprep.mubr.bf16.mxu1 %v10068_v19 }
 0x92d   : > { %7824 = vmatprep.subr.bf16.mxu1 %v7805_v46 }
 0x930   : > { %7825 = vmatpush1.bf16.msra.mxu1 %v7804_v51 }
 0x933   : > { %8866 = vmatmul.mubr.msk.bf16.gmra.mrb[28].mxu1 %vm448_vm2, %v9811_v8 }
 0x934   : > { %7723 = vmatprep.mubr.bf16.mxu1 %v10068_v19 }
 0x93b   : > { %8867 = vmatmul.mubr.msk.bf16.gmra.mrb[32].mxu1 %vm448_vm2, %v9812_v50 }
 0x93c   : > { %7733 = vmatprep.mubr.bf16.mxu1 %v10068_v19 }
 0x943   : > { %8868 = vmatmul.mubr.msk.bf16.gmra.mrb[36].mxu1 %vm448_vm2, %v9813_v54 }
 0x944   : > { %7854 = vmatprep.mubr.bf16.mxu1 %v10068_v19 }
 0x94b   : > { %8881 = vmatmul.mubr.msk.bf16.vlgmr.msra.gmra.mrb[24].mxu1 %vm448_vm2, %v9814_v55 }
 0x94c   : > { %7864 = vmatprep.mubr.bf16.mxu1 %v10068_v19 }
 0x953   : > { %8882 = vmatmul.mubr.msk.bf16.gmra.mrb[28].mxu1 %vm448_vm2, %v9815_v56 }
 0x954   : > { %7874 = vmatprep.mubr.bf16.mxu1 %v10068_v19 }
 0x95b   : > { %8883 = vmatmul.mubr.msk.bf16.gmra.mrb[32].mxu1 %vm448_vm2, %v9816_v53  ;;  %v7957_v53 = vpop.permute.xlu0 %7956 }
 0x95c   : > { %7884 = vmatprep.mubr.bf16.mxu1 %v10068_v19 }
 0x963   : > { %8884 = vmatmul.mubr.msk.bf16.gmra.mrb[36].mxu1 %vm448_vm2, %v9817_v52  ;;  %vm7992_vm2 = vcmp.gt.f32.partialorder %v7991_v60, 0.5 }
 0x964   : > { %v7993_v10 = vsel %vm7992_vm2, 1, %v10068_v19 }
 0x965   : > { %v8001_v12 = vrot.slane %v7993_v10, %v2739_v5  ;;  %v7997_v18 = vrot.slane %v7993_v10, %v2735_v0  ;;  %v7942_v5 = vpop.permute.xlu1 %7941 }
 0x967   : > { %vm8003_vm6 = vcmp.eq.s32.totalorder %v8001_v12, 1  ;;  %vm8002_vm8 = vcmp.eq.s32.totalorder %v7997_v18, 1 }
 0x968   : > { %vm12240_vm1 = vmpackc.low %vm8003_vm6, %vm8003_vm6 }
 0x969   : > { %vm12244_vm7 = vmpackc.low %vm8002_vm8, %vm8002_vm8  ;;  %v7952_v51 = vpop.permute.xlu1 %7951 }
 0xa1e   : > { %v7856_v32 = vpop.f32.mrb[24].mxu1 }
 0xa1f   : > { %v7959_v57 = vadd.f32 %v7922_v29, %v7856_v32  ;;  %v7858_v1 = vpop.f32.mrb[25].mxu1 }
 0xa20   : > { %v7960_v3 = vadd.f32 %v7922_v29, %v7858_v1  ;;  %v7860_v6 = vpop.f32.mrb[26].mxu1 }
 0xa21   : > { %9930 = vtanh.f32 %v7959_v57  ;;  %v7961_v20 = vadd.f32 %v7927_v7, %v7860_v6  ;;  %v7862_v13 = vpop.f32.mrb[27].mxu1 }
 0xa22   : > { %9932 = vtanh.f32 %v7960_v3  ;;  %v7962_v4 = vadd.f32 %v7927_v7, %v7862_v13 }
 0xa23   : > { %9934 = vtanh.f32 %v7961_v20 }
 0xa24   : > { %9936 = vtanh.f32 %v7962_v4 }
 0xa26   : > { %v7866_v14 = vpop.f32.mrb[28].mxu1 }
 0xa27   : > { %v7963_v40 = vadd.f32 %v7932_v15, %v7866_v14  ;;  %v7868_v11 = vpop.f32.mrb[29].mxu1 }
 0xa28   : > { %v7964_v23 = vadd.f32 %v7932_v15, %v7868_v11  ;;  %v7870_v30 = vpop.f32.mrb[30].mxu1 }
 0xa29   : > { %9938 = vtanh.f32 %v7963_v40  ;;  %v7965_v33 = vadd.f32 %v7937_v21, %v7870_v30  ;;  %v7872_v27 = vpop.f32.mrb[31].mxu1 }
 0xa2a   : > { %9940 = vtanh.f32 %v7964_v23  ;;  %v7966_v37 = vadd.f32 %v7937_v21, %v7872_v27 }
 0xa2b   : > { %v9931_v38 = vpop.eup %9930  ;;  %9942 = vtanh.f32 %v7965_v33 }
 0xa2c   : > { %v9933_v19 = vpop.eup %9932  ;;  %9944 = vtanh.f32 %v7966_v37 }
 0xa2d   : > { %v9935_v39 = vpop.eup %9934 }
 0xa2e   : > { %v9937_v34 = vpop.eup %9936  ;;  %v8905_v26 = vpack.c.bf16 %v9935_v39, %v9931_v38  ;;  %v7876_v41 = vpop.f32.mrb[32].mxu1 }
 0xa2f   : > { %v7967_v36 = vadd.f32 %v7942_v5, %v7876_v41  ;;  %v7878_v0 = vpop.f32.mrb[33].mxu1  ;;  %v8902_v62 = vpack.c.bf16 %v9937_v34, %v9933_v19 }
 0xa30   : > { %v7968_v45 = vadd.f32 %v7942_v5, %v7878_v0  ;;  %v7880_v9 = vpop.f32.mrb[34].mxu1 }
 0xa31   : > { %9946 = vtanh.f32 %v7967_v36  ;;  %v7969_v47 = vadd.f32 %v7947_v31, %v7880_v9  ;;  %v7882_v59 = vpop.f32.mrb[35].mxu1  ;;  %8903 = vmatprep.mubr.msk.bf16.mxu0 %vm12240_vm1, %v8902_v62 }
 0xa32   : > { %9948 = vtanh.f32 %v7968_v45  ;;  %v7970_v44 = vadd.f32 %v7947_v31, %v7882_v59  ;;  %8906 = vmatmul.mubr.msk.bf16.vlgmr.msra.gmra.mrb[36].mxu0 %vm12244_vm7, %v8905_v26 }
 0xa33   : > { %v9939_v2 = vpop.eup %9938  ;;  %9950 = vtanh.f32 %v7969_v47 }
 0xa34   : > { %v9941_v48 = vpop.eup %9940  ;;  %9952 = vtanh.f32 %v7970_v44 }
 0xa35   : > { %v9943_v49 = vpop.eup %9942 }
 0xa36   : > { %v9945_v46 = vpop.eup %9944  ;;  %v7886_v8 = vpop.f32.mrb[36].mxu1  ;;  %v8911_v50 = vpack.c.bf16 %v9943_v49, %v9939_v2 }
 0xa37   : > { %v7971_v54 = vadd.f32 %v7952_v51, %v7886_v8  ;;  %v7888_v55 = vpop.f32.mrb[37].mxu1  ;;  %v8908_v56 = vpack.c.bf16 %v9945_v46, %v9941_v48 }
 0xa38   : > { %v7972_v52 = vadd.f32 %v7952_v51, %v7888_v55  ;;  %v7890_v58 = vpop.f32.mrb[38].mxu1 }
 0xa39   : > { %9954 = vtanh.f32 %v7971_v54  ;;  %v7973_v35 = vadd.f32 %v7957_v53, %v7890_v58  ;;  %v7892_v61 = vpop.f32.mrb[39].mxu1  ;;  %8909 = vmatprep.mubr.msk.bf16.mxu0 %vm12240_vm1, %v8908_v56 }
 0xa3a   : > { %9956 = vtanh.f32 %v7972_v52  ;;  %v7974_v63 = vadd.f32 %v7957_v53, %v7892_v61  ;;  %8912 = vmatmul.mubr.msk.bf16.gmra.mrb[40].mxu0 %vm12244_vm7, %v8911_v50 }
 0xa3b   : > { %v9947_v16 = vpop.eup %9946  ;;  %9958 = vtanh.f32 %v7973_v35 }
 0xa3c   : > { %v9949_v17 = vpop.eup %9948  ;;  %9960 = vtanh.f32 %v7974_v63 }
 0xa3d   : > { %v9951_v24 = vpop.eup %9950 }
 0xa3e   : > { %v9953_v22 = vpop.eup %9952  ;;  %v8917_v25 = vpack.c.bf16 %v9951_v24, %v9947_v16 }
 0xa3f   : > { %v8914_v28 = vpack.c.bf16 %v9953_v22, %v9949_v17 }
 0xa41   : > { %8915 = vmatprep.mubr.msk.bf16.mxu0 %vm12240_vm1, %v8914_v28 }
 0xa42   : > { %8918 = vmatmul.mubr.msk.bf16.gmra.mrb[44].mxu0 %vm12244_vm7, %v8917_v25 }
 0xa43   : > { %v9955_v29 = vpop.eup %9954 }
 0xa44   : > { %v9957_v32 = vpop.eup %9956 }
 0xa45   : > { %v9959_v60 = vpop.eup %9958 }
 0xa46   : > { %v9961_v57 = vpop.eup %9960  ;;  %v8923_v1 = vpack.c.bf16 %v9959_v60, %v9955_v29 }
 0xa47   : > { %v8920_v7 = vpack.c.bf16 %v9961_v57, %v9957_v32 }
 0xa49   : > { %8921 = vmatprep.mubr.msk.bf16.mxu0 %vm12240_vm1, %v8920_v7 }
 0xa4a   : > { %8924 = vmatmul.mubr.msk.bf16.gmra.mrb[48].mxu0 %vm12244_vm7, %v8923_v1 }
 0xb05   : > { %v8961_v3 = vpop.f32.mrb[36].mxu0 }
 0xb06   : > { %v8962_v6 = vpop.f32.mrb[37].mxu0 }
 0xb07   : > { %v8963_v20 = vadd.f32 %v8962_v6, %v8961_v3  ;;  %v8964_v13 = vpop.f32.mrb[38].mxu0 }
 0xb08   : > { %v8965_v4 = vpop.f32.mrb[39].mxu0 }
 0xb09   : > { %v8937_v10 = vpack.c.bf16 %v8963_v20, %v8963_v20  ;;  %v8966_v15 = vadd.f32 %v8965_v4, %v8964_v13 }
 0xb0b   : > { %8254 = vst.msk [vmem:[%s12269_s13] sm:$0xf] %vm8253_vm9, %v8937_v10  ;;  %v8938_v14 = vpack.c.bf16 %v8966_v15, %v8966_v15 }
 0xb0d   : > { %8255 = vst.msk [vmem:[%s12269_s13 + $0x4] sm:$0xf] %vm8253_vm9, %v8938_v14  ;;  %v8967_v40 = vpop.f32.mrb[40].mxu0 }
 0xb0e   : > { %v8968_v11 = vpop.f32.mrb[41].mxu0 }
 0xb0f   : > { %v8969_v12 = vadd.f32 %v8968_v11, %v8967_v40  ;;  %v8970_v21 = vpop.f32.mrb[42].mxu0 }
 0xb10   : > { %v8971_v23 = vpop.f32.mrb[43].mxu0 }
 0xb11   : > { %v8939_v30 = vpack.c.bf16 %v8969_v12, %v8969_v12  ;;  %v8972_v18 = vadd.f32 %v8971_v23, %v8970_v21 }
 0xb13   : > { %8256 = vst.msk [vmem:[%s12269_s13 + $0x8] sm:$0xf] %vm8253_vm9, %v8939_v30  ;;  %v8940_v33 = vpack.c.bf16 %v8972_v18, %v8972_v18 }
 0xb15   : > { %8257 = vst.msk [vmem:[%s12269_s13 + $0xc] sm:$0xf] %vm8253_vm9, %v8940_v33  ;;  %v8973_v27 = vpop.f32.mrb[44].mxu0 }
 0xb16   : > { %v8974_v37 = vpop.f32.mrb[45].mxu0 }
 0xb17   : > { %v8975_v38 = vadd.f32 %v8974_v37, %v8973_v27  ;;  %v8976_v19 = vpop.f32.mrb[46].mxu0 }
 0xb18   : > { %v8977_v39 = vpop.f32.mrb[47].mxu0 }
 0xb19   : > { %v8941_v34 = vpack.c.bf16 %v8975_v38, %v8975_v38  ;;  %v8978_v5 = vadd.f32 %v8977_v39, %v8976_v19 }
 0xb1b   : > { %8258 = vst.msk [vmem:[%s12269_s13 + $0x10] sm:$0xf] %vm8253_vm9, %v8941_v34  ;;  %v8942_v26 = vpack.c.bf16 %v8978_v5, %v8978_v5 }
 0xb1d   : > { %8259 = vst.msk [vmem:[%s12269_s13 + $0x14] sm:$0xf] %vm8253_vm9, %v8942_v26  ;;  %v8979_v41 = vpop.f32.mrb[48].mxu0 }
 0xb1e   : > { %v8980_v42 = vpop.f32.mrb[49].mxu0 }
 0xb1f   : > { %v8981_v36 = vadd.f32 %v8980_v42, %v8979_v41  ;;  %v8982_v0 = vpop.f32.mrb[50].mxu0 }
 0xb20   : > { %v8983_v62 = vpop.f32.mrb[51].mxu0 }
 0xb21   : > { %v8943_v43 = vpack.c.bf16 %v8981_v36, %v8981_v36  ;;  %v8984_v31 = vadd.f32 %v8983_v62, %v8982_v0 }
 0xb23   : > { %8260 = vst.msk [vmem:[%s12269_s13 + $0x18] sm:$0xf] %vm8253_vm9, %v8943_v43  ;;  %v8944_v45 = vpack.c.bf16 %v8984_v31, %v8984_v31 }
 0xb25   : > { %8261 = vst.msk [vmem:[%s12269_s13 + $0x1c] sm:$0xf] %vm8253_vm9, %v8944_v45 }
 0xb26 PF: > { %s23_s17 = sadd.s32 1, %s10060_s17  }
 0xb27   : > { %p20_p5 = scmp.ge.s32.totalorder %s23_s17, 4  }
 0xb29   :  { %22 = sbr.rel (!%p20_p5) target bundleno = 2 (0x2), region = 131 }
 0xb30   :  { %8283 = vsyncpa [#allocation6], 1 }
 0xb31   :  { %8285 = vsyncpa [#allocation6 + $0x1], 1 }
 0xb32   :  { %8286 = vsyncpa [#allocation8], 1 }

</bundles_post_ra>
